<compile_context>
chip_gen: v6e
topology: v6e:2x2x1
jax: 0.10.0
libtpu: 0.0.40
codegen_flags: <defaults>
</compile_context>

<pallas_src>
import jax
import jax.numpy as jnp
from jax.experimental import pallas as pl
from jax.experimental.pallas import tpu as pltpu

LAYER_WIDTH = 1120


def _round_up(n, m):
    return ((n + m - 1) // m) * m


def dqn_kernel(x_ref,
               w1_ref, b1_ref,
               w2_ref, b2_ref,
               w4_ref, b4_ref,
               w5_ref, b5_ref,
               o_ref):
    # bf16 operands on the MXU, f32 accumulation.
    h = x_ref[...].astype(jnp.bfloat16)

    h = jnp.dot(h, w1_ref[...], preferred_element_type=jnp.float32) + b1_ref[...]
    h = jnp.maximum(h, 0.0).astype(jnp.bfloat16)

    h = jnp.dot(h, w2_ref[...], preferred_element_type=jnp.float32) + b2_ref[...]
    h = jnp.maximum(h, 0.0).astype(jnp.bfloat16)

    h = jnp.dot(h, w4_ref[...], preferred_element_type=jnp.float32) + b4_ref[...]
    h = jnp.maximum(h, 0.0).astype(jnp.bfloat16)

    out = jnp.dot(h, w5_ref[...], preferred_element_type=jnp.float32) + b5_ref[...]
    o_ref[...] = out.astype(o_ref.dtype)


def init_params(key, observation_count, action_count):
    """Deterministic synthetic init (uniform, roughly matching nn.Linear scale).

    Master copy is f32 in (in_features, out_features) layout.
    """
    def linear(key, fan_in, fan_out):
        kw, kb = jax.random.split(key)
        bound = 1.0 / jnp.sqrt(jnp.float32(fan_in))
        w = jax.random.uniform(kw, (fan_in, fan_out), jnp.float32, -bound, bound)
        b = jax.random.uniform(kb, (1, fan_out), jnp.float32, -bound, bound)
        return w, b

    k1, k2, k4, k5 = jax.random.split(key, 4)
    w1, b1 = linear(k1, observation_count, LAYER_WIDTH)
    w2, b2 = linear(k2, LAYER_WIDTH, LAYER_WIDTH)
    w4, b4 = linear(k4, LAYER_WIDTH, LAYER_WIDTH)
    w5, b5 = linear(k5, LAYER_WIDTH, action_count)
    return {"w1": w1, "b1": b1, "w2": w2, "b2": b2,
            "w4": w4, "b4": b4, "w5": w5, "b5": b5}


def prepare_params(params_f32):
    """Zero-pad hidden width to a multiple of 128 and cast weights to bf16.

    Padding is exact: padded hidden units get zero bias and zero outgoing
    weights (relu(0)=0 contributes nothing), padded output columns are
    sliced off in the wrapper.
    """
    Wp = _round_up(LAYER_WIDTH, 128)            # 1152
    obs = params_f32["w1"].shape[0]
    act = params_f32["w5"].shape[1]
    act_p = _round_up(act, 128)                 # lane-dense output

    def pad(a, shape):
        return jnp.zeros(shape, a.dtype).at[: a.shape[0], : a.shape[1]].set(a)

    padded = {
        "w1": pad(params_f32["w1"], (obs, Wp)).astype(jnp.bfloat16),
        "b1": pad(params_f32["b1"], (1, Wp)),
        "w2": pad(params_f32["w2"], (Wp, Wp)).astype(jnp.bfloat16),
        "b2": pad(params_f32["b2"], (1, Wp)),
        "w4": pad(params_f32["w4"], (Wp, Wp)).astype(jnp.bfloat16),
        "b4": pad(params_f32["b4"], (1, Wp)),
        "w5": pad(params_f32["w5"], (Wp, act_p)).astype(jnp.bfloat16),
        "b5": pad(params_f32["b5"], (1, act_p)),
    }
    return padded, act


def dqn_forward(x, padded_params, action_count, *, tile_b=128):
    """x: (B, observation_count) f32. Returns (B, action_count) f32."""
    p = padded_params
    B, obs = x.shape
    Wp = p["w2"].shape[0]
    act_p = p["w5"].shape[1]

    # Batch tile: multiple of 8 sublanes, capped at 128 (MXU-friendly M tile).
    tb = min(tile_b, _round_up(B, 8))
    Bp = _round_up(B, tb)
    if Bp != B:
        x = jnp.pad(x, ((0, Bp - B), (0, 0)))
    nb = Bp // tb

    row = lambda i: (i, 0)      # batch-tiled arrays
    const = lambda i: (0, 0)    # weights/biases: VMEM-resident across grid steps

    flops = 2 * Bp * (obs * Wp + 2 * Wp * Wp + Wp * act_p)
    bytes_accessed = (
        Bp * obs * 4 + Bp * act_p * 4
        + sum(int(p[k].size) * p[k].dtype.itemsize
              for k in ("w1", "b1", "w2", "b2", "w4", "b4", "w5", "b5"))
    )

    out = pl.pallas_call(
        dqn_kernel,
        out_shape=jax.ShapeDtypeStruct((Bp, act_p), jnp.float32),
        grid=(nb,),
        in_specs=[
            pl.BlockSpec((tb, obs), row),
            pl.BlockSpec((obs, Wp), const),
            pl.BlockSpec((1, Wp), const),
            pl.BlockSpec((Wp, Wp), const),
            pl.BlockSpec((1, Wp), const),
            pl.BlockSpec((Wp, Wp), const),
            pl.BlockSpec((1, Wp), const),
            pl.BlockSpec((Wp, act_p), const),
            pl.BlockSpec((1, act_p), const),
        ],
        out_specs=pl.BlockSpec((tb, act_p), row),
        compiler_params=pltpu.CompilerParams(
            dimension_semantics=("parallel",),
            vmem_limit_bytes=32 << 20,
        ),
        cost_estimate=pl.CostEstimate(
            flops=flops, transcendentals=0, bytes_accessed=bytes_accessed),
    )(
        x,
        p["w1"], p["b1"],
        p["w2"], p["b2"],
        p["w4"], p["b4"],
        p["w5"], p["b5"],
    )

    return out[:B, :action_count]


def dqn_ref(x, p):
    h = jnp.maximum(x @ p["w1"] + p["b1"], 0.0)
    h = jnp.maximum(h @ p["w2"] + p["b2"], 0.0)
    h = jnp.maximum(h @ p["w4"] + p["b4"], 0.0)
    return h @ p["w5"] + p["b5"]


if __name__ == "__main__":
    observation_count = 32
    action_count = 6
    batch = 2

    key = jax.random.PRNGKey(0)
    kx, kp = jax.random.split(key)
    x = jax.random.normal(kx, (batch, observation_count), jnp.float32)
    params = init_params(kp, observation_count, action_count)

    padded_params, act = prepare_params(params)

    out = dqn_forward(x, padded_params, act)
    out = jax.block_until_ready(out)

    ref = dqn_ref(x, params)  # f32 reference
    assert out.shape == (batch, action_count)
    # bf16 weights/activations inside the kernel -> relaxed tolerance vs f32 ref.
    assert jnp.allclose(out, ref, atol=5e-2, rtol=5e-2), float(
        jnp.max(jnp.abs(out - ref)))

    print("KERNEL_OK")
</pallas_src>

<mosaic_0001>
module attributes {stable_mosaic.version = 11 : i64} {
  func.func @dqn_kernel(%arg0: i32, %arg1: memref<8x32xf32, #tpu.memory_space<vmem>>, %arg2: memref<32x1152xbf16, #tpu.memory_space<vmem>>, %arg3: memref<1x1152xf32, #tpu.memory_space<vmem>>, %arg4: memref<1152x1152xbf16, #tpu.memory_space<vmem>>, %arg5: memref<1x1152xf32, #tpu.memory_space<vmem>>, %arg6: memref<1152x1152xbf16, #tpu.memory_space<vmem>>, %arg7: memref<1x1152xf32, #tpu.memory_space<vmem>>, %arg8: memref<1152x128xbf16, #tpu.memory_space<vmem>>, %arg9: memref<1x128xf32, #tpu.memory_space<vmem>>, %arg10: memref<8x128xf32, #tpu.memory_space<vmem>>) attributes {dimension_semantics = [#tpu.dimension_semantics<parallel>], iteration_bounds = array<i64: 1>, scalar_prefetch = 0 : i64, scratch_operands = 0 : i64, tpu.core_type = #tpu.core_type<tc>, window_params = [{transform_indices = @transform_0, window_bounds = array<i64: 8, 32>}, {pipeline_mode = #tpu.pipeline_mode<synchronous>, transform_indices = @transform_1, window_bounds = array<i64: 32, 1152>}, {pipeline_mode = #tpu.pipeline_mode<synchronous>, transform_indices = @transform_2, window_bounds = array<i64: 1, 1152>}, {pipeline_mode = #tpu.pipeline_mode<synchronous>, transform_indices = @transform_3, window_bounds = array<i64: 1152, 1152>}, {pipeline_mode = #tpu.pipeline_mode<synchronous>, transform_indices = @transform_4, window_bounds = array<i64: 1, 1152>}, {pipeline_mode = #tpu.pipeline_mode<synchronous>, transform_indices = @transform_5, window_bounds = array<i64: 1152, 1152>}, {pipeline_mode = #tpu.pipeline_mode<synchronous>, transform_indices = @transform_6, window_bounds = array<i64: 1, 1152>}, {pipeline_mode = #tpu.pipeline_mode<synchronous>, transform_indices = @transform_7, window_bounds = array<i64: 1152, 128>}, {pipeline_mode = #tpu.pipeline_mode<synchronous>, transform_indices = @transform_8, window_bounds = array<i64: 1, 128>}, {transform_indices = @transform_9, window_bounds = array<i64: 8, 128>}]} {
    %c0 = arith.constant 0 : index
    %c0_0 = arith.constant 0 : index
    %0 = vector.load %arg1[%c0, %c0_0] : memref<8x32xf32, #tpu.memory_space<vmem>>, vector<8x32xf32>
    %1 = arith.truncf %0 : vector<8x32xf32> to vector<8x32xbf16>
    %c0_1 = arith.constant 0 : index
    %c0_2 = arith.constant 0 : index
    %2 = vector.load %arg2[%c0_1, %c0_2] : memref<32x1152xbf16, #tpu.memory_space<vmem>>, vector<32x1152xbf16>
    %cst = arith.constant dense<0.000000e+00> : vector<8x1152xf32>
    %3 = tpu.matmul %1, %2, %cst {dimension_numbers = #tpu.dot_dimension_numbers<[1], [0], [0], [1], [0, 0, 1, 1], [], []>} : vector<8x32xbf16>, vector<32x1152xbf16>, vector<8x1152xf32> -> vector<8x1152xf32>
    %c0_3 = arith.constant 0 : index
    %c0_4 = arith.constant 0 : index
    %4 = vector.load %arg3[%c0_3, %c0_4] : memref<1x1152xf32, #tpu.memory_space<vmem>>, vector<1x1152xf32>
    %5 = vector.broadcast %4 : vector<1x1152xf32> to vector<8x1152xf32>
    %6 = arith.addf %3, %5 : vector<8x1152xf32>
    %cst_5 = arith.constant 0.000000e+00 : f32
    %7 = vector.broadcast %cst_5 : f32 to vector<8x1152xf32>
    %8 = arith.maximumf %6, %7 : vector<8x1152xf32>
    %9 = arith.truncf %8 : vector<8x1152xf32> to vector<8x1152xbf16>
    %c0_6 = arith.constant 0 : index
    %c0_7 = arith.constant 0 : index
    %10 = vector.load %arg4[%c0_6, %c0_7] : memref<1152x1152xbf16, #tpu.memory_space<vmem>>, vector<1152x1152xbf16>
    %cst_8 = arith.constant dense<0.000000e+00> : vector<8x1152xf32>
    %11 = tpu.matmul %9, %10, %cst_8 {dimension_numbers = #tpu.dot_dimension_numbers<[1], [0], [0], [1], [0, 0, 1, 1], [], []>} : vector<8x1152xbf16>, vector<1152x1152xbf16>, vector<8x1152xf32> -> vector<8x1152xf32>
    %c0_9 = arith.constant 0 : index
    %c0_10 = arith.constant 0 : index
    %12 = vector.load %arg5[%c0_9, %c0_10] : memref<1x1152xf32, #tpu.memory_space<vmem>>, vector<1x1152xf32>
    %13 = vector.broadcast %12 : vector<1x1152xf32> to vector<8x1152xf32>
    %14 = arith.addf %11, %13 : vector<8x1152xf32>
    %cst_11 = arith.constant 0.000000e+00 : f32
    %15 = vector.broadcast %cst_11 : f32 to vector<8x1152xf32>
    %16 = arith.maximumf %14, %15 : vector<8x1152xf32>
    %17 = arith.truncf %16 : vector<8x1152xf32> to vector<8x1152xbf16>
    %c0_12 = arith.constant 0 : index
    %c0_13 = arith.constant 0 : index
    %18 = vector.load %arg6[%c0_12, %c0_13] : memref<1152x1152xbf16, #tpu.memory_space<vmem>>, vector<1152x1152xbf16>
    %cst_14 = arith.constant dense<0.000000e+00> : vector<8x1152xf32>
    %19 = tpu.matmul %17, %18, %cst_14 {dimension_numbers = #tpu.dot_dimension_numbers<[1], [0], [0], [1], [0, 0, 1, 1], [], []>} : vector<8x1152xbf16>, vector<1152x1152xbf16>, vector<8x1152xf32> -> vector<8x1152xf32>
    %c0_15 = arith.constant 0 : index
    %c0_16 = arith.constant 0 : index
    %20 = vector.load %arg7[%c0_15, %c0_16] : memref<1x1152xf32, #tpu.memory_space<vmem>>, vector<1x1152xf32>
    %21 = vector.broadcast %20 : vector<1x1152xf32> to vector<8x1152xf32>
    %22 = arith.addf %19, %21 : vector<8x1152xf32>
    %cst_17 = arith.constant 0.000000e+00 : f32
    %23 = vector.broadcast %cst_17 : f32 to vector<8x1152xf32>
    %24 = arith.maximumf %22, %23 : vector<8x1152xf32>
    %25 = arith.truncf %24 : vector<8x1152xf32> to vector<8x1152xbf16>
    %c0_18 = arith.constant 0 : index
    %c0_19 = arith.constant 0 : index
    %26 = vector.load %arg8[%c0_18, %c0_19] : memref<1152x128xbf16, #tpu.memory_space<vmem>>, vector<1152x128xbf16>
    %cst_20 = arith.constant dense<0.000000e+00> : vector<8x128xf32>
    %27 = tpu.matmul %25, %26, %cst_20 {dimension_numbers = #tpu.dot_dimension_numbers<[1], [0], [0], [1], [0, 0, 1, 1], [], []>} : vector<8x1152xbf16>, vector<1152x128xbf16>, vector<8x128xf32> -> vector<8x128xf32>
    %c0_21 = arith.constant 0 : index
    %c0_22 = arith.constant 0 : index
    %28 = vector.load %arg9[%c0_21, %c0_22] : memref<1x128xf32, #tpu.memory_space<vmem>>, vector<1x128xf32>
    %29 = vector.broadcast %28 : vector<1x128xf32> to vector<8x128xf32>
    %30 = arith.addf %27, %29 : vector<8x128xf32>
    %c0_23 = arith.constant 0 : index
    %c0_24 = arith.constant 0 : index
    %31 = vector.load %arg10[%c0_23, %c0_24] : memref<8x128xf32, #tpu.memory_space<vmem>>, vector<8x128xf32>
    tpu.vector_store %arg10[%c0_23, %c0_24], %30 {strides = array<i32>} : memref<8x128xf32, #tpu.memory_space<vmem>>, vector<8x128xf32>,
    return
  }
  func.func @transform_0(%arg0: i32) -> (i32, i32) {
    %c0_i32 = arith.constant 0 : i32
    %c0_i32_0 = arith.constant 0 : i32
    return %arg0, %c0_i32 : i32, i32
  }
  func.func @transform_1(%arg0: i32) -> (i32, i32) {
    %c0_i32 = arith.constant 0 : i32
    %c0_i32_0 = arith.constant 0 : i32
    %c0_i32_1 = arith.constant 0 : i32
    return %c0_i32, %c0_i32_0 : i32, i32
  }
  func.func @transform_2(%arg0: i32) -> (i32, i32) {
    %c0_i32 = arith.constant 0 : i32
    %c0_i32_0 = arith.constant 0 : i32
    %c0_i32_1 = arith.constant 0 : i32
    return %c0_i32, %c0_i32_0 : i32, i32
  }
  func.func @transform_3(%arg0: i32) -> (i32, i32) {
    %c0_i32 = arith.constant 0 : i32
    %c0_i32_0 = arith.constant 0 : i32
    %c0_i32_1 = arith.constant 0 : i32
    return %c0_i32, %c0_i32_0 : i32, i32
  }
  func.func @transform_4(%arg0: i32) -> (i32, i32) {
    %c0_i32 = arith.constant 0 : i32
    %c0_i32_0 = arith.constant 0 : i32
    %c0_i32_1 = arith.constant 0 : i32
    return %c0_i32, %c0_i32_0 : i32, i32
  }
  func.func @transform_5(%arg0: i32) -> (i32, i32) {
    %c0_i32 = arith.constant 0 : i32
    %c0_i32_0 = arith.constant 0 : i32
    %c0_i32_1 = arith.constant 0 : i32
    return %c0_i32, %c0_i32_0 : i32, i32
  }
  func.func @transform_6(%arg0: i32) -> (i32, i32) {
    %c0_i32 = arith.constant 0 : i32
    %c0_i32_0 = arith.constant 0 : i32
    %c0_i32_1 = arith.constant 0 : i32
    return %c0_i32, %c0_i32_0 : i32, i32
  }
  func.func @transform_7(%arg0: i32) -> (i32, i32) {
    %c0_i32 = arith.constant 0 : i32
    %c0_i32_0 = arith.constant 0 : i32
    %c0_i32_1 = arith.constant 0 : i32
    return %c0_i32, %c0_i32_0 : i32, i32
  }
  func.func @transform_8(%arg0: i32) -> (i32, i32) {
    %c0_i32 = arith.constant 0 : i32
    %c0_i32_0 = arith.constant 0 : i32
    %c0_i32_1 = arith.constant 0 : i32
    return %c0_i32, %c0_i32_0 : i32, i32
  }
  func.func @transform_9(%arg0: i32) -> (i32, i32) {
    %c0_i32 = arith.constant 0 : i32
    %c0_i32_0 = arith.constant 0 : i32
    return %arg0, %c0_i32 : i32, i32
  }
}

</mosaic_0001>

<bundles_post_ra>
// kernel: tpu_custom_call.1
= control target key start
LH: loop header
LB: loop body
LE: loop exit
PB: predicated region body
PF: predicated region fallthrough
CT: control target
= control target key end

     0   :  { %14 = vsyncpa [#allocation3], 0  ;;  %s16024_s0 = inlined_call_operand.hbm [shape: f32[8,32], index: 0, kind: input, shape index: {}]   ;;  %s16025_s1 = inlined_call_operand.hbm [shape: bf16[32,1152], index: 1, kind: input, shape index: {}]   ;;  %s16026_s2 = inlined_call_operand.hbm [shape: f32[1,1152], index: 2, kind: input, shape index: {}]   ;;  %s16027_s3 = inlined_call_operand.hbm [shape: bf16[1152,1152], index: 3, kind: input, shape index: {}]   ;;  %s16028_s4 = inlined_call_operand.hbm [shape: f32[1,1152], index: 4, kind: input, shape index: {}]   ;;  %s16029_s5 = inlined_call_operand.hbm [shape: bf16[1152,1152], index: 5, kind: input, shape index: {}]   ;;  %s16030_s6 = inlined_call_operand.hbm [shape: f32[1,1152], index: 6, kind: input, shape index: {}]   ;;  %s16031_s7 = inlined_call_operand.hbm [shape: bf16[1152,128], index: 7, kind: input, shape index: {}]   ;;  %s16032_s8 = inlined_call_operand.hbm [shape: f32[1,128], index: 8, kind: input, shape index: {}]   ;;  %s16033_s9 = inlined_call_operand.hbm [shape: f32[8,128], index: 9, kind: output, shape index: {}]  }
   0x1   :  { %15 = vsyncpa [#allocation6], 0 }
   0x2   :  { %16 = vsyncpa [#allocation9], 0 }
   0x3   :  { %17 = vsyncpa [#allocation12], 0 }
   0x4   :  { %18 = vsyncpa [#allocation15], 0 }
   0x5   :  { %19 = vsyncpa [#allocation4], 0  ;;  %s15536_s30 = smov [#allocation5]  }
   0x6   :  { %s35_s10 = sshll.u32 %s15536_s30, 4  ;;  %s36_s10 = int_to_ptr.vmem [resolvable:$true] %s35_s10 }
   0x7   :  { %s15332_s11 = scalar_lea.vmem %s36_s10, 2304  ;;  %p15337_p1 = scmp.lt.s32.totalorder %s36_s10, %s36_s10 }
   0x8   :  { %p15333_p0 = scmp.ne.s32.totalorder %s36_s10, %s15332_s11  ;;  %p15338_p2 = scmp.lt.s32.totalorder %s15332_s11, %s15332_s11 }
   0xa   :  { %p15339_p3 = por %p15338_p2, %p15337_p1 }
   0xc   :  { %p15340_p4 = pnand %p15339_p3, %p15333_p0 }
   0xe   :  { %15343 = shalt.err (!%p15340_p4)
}
   0xf   :  { %s15537_s12 = smov 576   ;;  %s15538_s13 = smov 36  }
  0x10   :  { %41 = dma.hbm_to_vmem [thread:$0]  %s16025_s1, 2304, %s36_s10, [#allocation6], %s15537_s12, %s15537_s12, %s15538_s13  }
  0x11   :  { %s15539_s16 = smov [#allocation8]   ;;  %s15540_s18 = smov [#allocation11]  }
  0x12   :  { %s57_s17 = sshll.u32 %s15539_s16, 4  ;;  %s79_s19 = sshll.u32 %s15540_s18, 4  ;;  %s58_s17 = int_to_ptr.vmem [resolvable:$true] %s57_s17  ;;  %s80_s19 = int_to_ptr.vmem [resolvable:$true] %s79_s19 }
  0x13   :  { %s15352_s20 = scalar_lea.vmem %s58_s17, 82944  ;;  %p15357_p6 = scmp.lt.s32.totalorder %s58_s17, %s58_s17 }
  0x14   :  { %p15353_p5 = scmp.ne.s32.totalorder %s58_s17, %s15352_s20  ;;  %p15358_p7 = scmp.lt.s32.totalorder %s15352_s20, %s15352_s20 }
  0x16   :  { %p15359_p8 = por %p15358_p7, %p15357_p6 }
  0x18   :  { %p15360_p9 = pnand %p15359_p8, %p15353_p5 }
  0x1a   :  { %15363 = shalt.err (!%p15360_p9)
}
  0x1b   :  { %63 = dma.hbm_to_vmem [thread:$0]  %s16027_s3, 82944, %s58_s17, [#allocation9], %s15537_s12, %s15537_s12, %s15538_s13  }
  0x1c   :  { %s15372_s23 = scalar_lea.vmem %s80_s19, 82944  ;;  %p15377_p11 = scmp.lt.s32.totalorder %s80_s19, %s80_s19 }
  0x1d   :  { %p15373_p10 = scmp.ne.s32.totalorder %s80_s19, %s15372_s23  ;;  %p15378_p12 = scmp.lt.s32.totalorder %s15372_s23, %s15372_s23 }
  0x1f   :  { %p15379_p13 = por %p15378_p12, %p15377_p11 }
  0x21   :  { %p15380_p0 = pnand %p15379_p13, %p15373_p10 }
  0x23   :  { %15383 = shalt.err (!%p15380_p0)
}
  0x24   :  { %85 = dma.hbm_to_vmem [thread:$0]  %s16029_s5, 82944, %s80_s19, [#allocation12], %s15537_s12, %s15537_s12, %s15538_s13  }
  0x25   :  { %s15541_s25 = smov [#allocation14]  }
  0x26   :  { %s101_s26 = sshll.u32 %s15541_s25, 4  ;;  %s102_s26 = int_to_ptr.vmem [resolvable:$true] %s101_s26 }
  0x27   :  { %s15392_s27 = scalar_lea.vmem %s102_s26, 9216  ;;  %p15397_p2 = scmp.lt.s32.totalorder %s102_s26, %s102_s26 }
  0x28   :  { %p15393_p1 = scmp.ne.s32.totalorder %s102_s26, %s15392_s27  ;;  %p15398_p3 = scmp.lt.s32.totalorder %s15392_s27, %s15392_s27 }
  0x2a   :  { %p15399_p4 = por %p15398_p3, %p15397_p2 }
  0x2c   :  { %p15400_p5 = pnand %p15399_p4, %p15393_p1 }
  0x2e   :  { %15403 = shalt.err (!%p15400_p5)
}
  0x2f   :  { %s15542_s3 = smov 64   ;;  %s15543_s28 = smov 4  }
  0x30   :  { %107 = dma.hbm_to_vmem [thread:$0]  %s16031_s7, 9216, %s102_s26, [#allocation15], %s15542_s3, %s15542_s3, %s15543_s28  }
  0x31   :  { %s15544_s10 = smov [#allocation2]   ;;  %s15545_s14 = smov [#allocation7]  }
  0x32   :  { %s26_s11 = sshll.u32 %s15544_s10, 4  ;;  %s48_s5 = sshll.u32 %s15545_s14, 4  ;;  %s27_s11 = int_to_ptr.vmem [resolvable:$true] %s26_s11  ;;  %s49_s5 = int_to_ptr.vmem [resolvable:$true] %s48_s5 }
  0x33   :  { %s15412_s12 = scalar_lea.vmem %s27_s11, 128  ;;  %p15417_p7 = scmp.lt.s32.totalorder %s27_s11, %s27_s11 }
  0x34   :  { %p15413_p6 = scmp.ne.s32.totalorder %s27_s11, %s15412_s12  ;;  %p15418_p8 = scmp.lt.s32.totalorder %s15412_s12, %s15412_s12 }
  0x36   :  { %p15419_p9 = por %p15418_p8, %p15417_p7 }
  0x38   :  { %p15420_p10 = pnand %p15419_p9, %p15413_p6 }
  0x3a   :  { %15423 = shalt.err (!%p15420_p10)
}
  0x3b   :  { %29 = dma.hbm_to_vmem [thread:$0]  %s16024_s0, 128, %s27_s11, [#allocation3]  }
  0x3c   :  { %s15432_s16 = scalar_lea.vmem %s49_s5, 144  ;;  %s15436_s7 = scalar_lea.vmem %s49_s5, 160 }
  0x3d   :  { %p15433_p11 = scmp.ne.s32.totalorder %s49_s5, %s15432_s16  ;;  %p15437_p12 = scmp.lt.s32.totalorder %s49_s5, %s49_s5 }
  0x3e   :  { %p15438_p13 = scmp.lt.s32.totalorder %s15436_s7, %s15432_s16 }
  0x40   :  { %p15439_p0 = por %p15438_p13, %p15437_p12 }
  0x42   :  { %p15440_p1 = pnand %p15439_p0, %p15433_p11 }
  0x44   :  { %15443 = shalt.err (!%p15440_p1)
}
  0x45   :  { %51 = dma.hbm_to_vmem [thread:$0]  %s16026_s2, 144, %s49_s5, [#allocation6]  }
  0x46   :  { %s15546_s19 = smov [#allocation10]   ;;  %s15547_s21 = smov [#allocation13]  }
  0x47   :  { %s70_s20 = sshll.u32 %s15546_s19, 4  ;;  %s92_s22 = sshll.u32 %s15547_s21, 4  ;;  %s71_s20 = int_to_ptr.vmem [resolvable:$true] %s70_s20  ;;  %s93_s22 = int_to_ptr.vmem [resolvable:$true] %s92_s22 }
  0x48   :  { %s15452_s23 = scalar_lea.vmem %s71_s20, 144  ;;  %s15456_s0 = scalar_lea.vmem %s71_s20, 160 }
  0x49   :  { %p15453_p2 = scmp.ne.s32.totalorder %s71_s20, %s15452_s23  ;;  %p15457_p3 = scmp.lt.s32.totalorder %s71_s20, %s71_s20 }
  0x4a   :  { %p15458_p4 = scmp.lt.s32.totalorder %s15456_s0, %s15452_s23 }
  0x4c   :  { %p15459_p5 = por %p15458_p4, %p15457_p3 }
  0x4e   :  { %p15460_p6 = pnand %p15459_p5, %p15453_p2 }
  0x50   :  { %15463 = shalt.err (!%p15460_p6)
}
  0x51   :  { %73 = dma.hbm_to_vmem [thread:$0]  %s16028_s4, 144, %s71_s20, [#allocation9]  }
  0x52   :  { %s15472_s25 = scalar_lea.vmem %s93_s22, 144  ;;  %s15476_s2 = scalar_lea.vmem %s93_s22, 160 }
  0x53   :  { %p15473_p7 = scmp.ne.s32.totalorder %s93_s22, %s15472_s25  ;;  %p15477_p8 = scmp.lt.s32.totalorder %s93_s22, %s93_s22 }
  0x54   :  { %p15478_p9 = scmp.lt.s32.totalorder %s15476_s2, %s15472_s25 }
  0x56   :  { %p15479_p10 = por %p15478_p9, %p15477_p8 }
  0x58   :  { %p15480_p11 = pnand %p15479_p10, %p15473_p7 }
  0x5a   :  { %15483 = shalt.err (!%p15480_p11)
}
  0x5b   :  { %95 = dma.hbm_to_vmem [thread:$0]  %s16030_s6, 144, %s93_s22, [#allocation12]  }
  0x5c   :  { %s15548_s3 = smov [#allocation16]  }
  0x5d   :  { %s114_s28 = sshll.u32 %s15548_s3, 4  ;;  %s115_s28 = int_to_ptr.vmem [resolvable:$true] %s114_s28 }
  0x5e   :  { %s15492_s29 = scalar_lea.vmem %s115_s28, 16  ;;  %s15496_s30 = scalar_lea.vmem %s115_s28, 32 }
  0x5f   :  { %p15493_p12 = scmp.ne.s32.totalorder %s115_s28, %s15492_s29  ;;  %p15497_p13 = scmp.lt.s32.totalorder %s115_s28, %s115_s28 }
  0x60   :  { %p15498_p0 = scmp.lt.s32.totalorder %s15496_s30, %s15492_s29 }
  0x62   :  { %p15499_p1 = por %p15498_p0, %p15497_p13 }
  0x64   :  { %p15500_p2 = pnand %p15499_p1, %p15493_p12 }
  0x66   :  { %15503 = shalt.err (!%p15500_p2)
}
  0x67   :  { %117 = dma.hbm_to_vmem [thread:$0]  %s16032_s8, 16, %s115_s28, [#allocation15]  }
  0x68   :  { %15524 = dma.done.wait [#allocation3], 128  }
  0x69   :  { %15525 = vsyncadd [#allocation3], 4294967168 }
  0x6a   :  { %15526 = dma.done.wait [#allocation6], 2448  }
  0x6b   :  { %15527 = vsyncadd [#allocation6], 4294964848 }
  0x6c   :  { %15528 = dma.done.wait [#allocation9], 83088  }
  0x6d   :  { %15529 = vsyncadd [#allocation9], 4294884208 }
  0x6e   :  { %15530 = dma.done.wait [#allocation12], 83088  }
  0x6f   :  { %15531 = vsyncadd [#allocation12], 4294884208 }
  0x70   :  { %15532 = dma.done.wait [#allocation15], 9232  }
  0x71   :  { %15533 = vsyncadd [#allocation15], 4294958064  ;;  %v15549_v0 = vmov 0   ;;  %v13350_v1 = vld [vmem:[#allocation5 + $0x4c] ss:$36 sps:$4 sm:$0xff]   ;;  %v146_v5 = vld [vmem:[#allocation2] sm:$0xff] }
  0x72   :  { %345 = vmatprep.mubr.bf16.mxu0 %v15549_v0  ;;  %468 = vmatprep.mubr.bf16.mxu1 %v15549_v0  ;;  %v13352_v2 = vld [vmem:[#allocation5 + $0x48] ss:$36 sps:$4 sm:$0xff]   ;;  %v13355_v4 = vld [vmem:[#allocation5] ss:$36 sps:$4 sm:$0xff]   ;;  %v13358_v6 = vld [vmem:[#allocation5 + $0x54] ss:$36 sps:$4 sm:$0xff]   ;;  %v15632_v7 = vpack.c.bf16 %v146_v5, %v146_v5 }
  0x73   :  { %325 = vmatprep.subr.bf16.mxu0 %v13350_v1  ;;  %v13353_v3 = vld [vmem:[#allocation5 + $0x4] ss:$36 sps:$4 sm:$0xff]   ;;  %vm309_vm0 = vcmask 261120   ;;  %v13356_v8 = vld [vmem:[#allocation5 + $0x50] ss:$36 sps:$4 sm:$0xff]   ;;  %v15550_v25 = vmov 0.0  }
  0x74   :  { %326 = vmatpush1.bf16.msra.mxu0 %v13352_v2  ;;  %v13361_v9 = vld [vmem:[#allocation5 + $0xc] ss:$36 sps:$4 sm:$0xff]   ;;  %v13368_v10 = vld [vmem:[#allocation5 + $0x64] ss:$36 sps:$4 sm:$0xff]   ;;  %v13371_v12 = vld [vmem:[#allocation5 + $0x1c] ss:$36 sps:$4 sm:$0xff]  }
  0x75   :  { %327 = vmatprep.subr.bf16.mxu0 %v13353_v3  ;;  %v13370_v11 = vld [vmem:[#allocation5 + $0x60] ss:$36 sps:$4 sm:$0xff]   ;;  %v13359_v13 = vld [vmem:[#allocation5 + $0x8] ss:$36 sps:$4 sm:$0xff]   ;;  %448 = vmatprep.subr.bf16.mxu1 %v13368_v10  ;;  %v13373_v15 = vld [vmem:[#allocation5 + $0x18] ss:$36 sps:$4 sm:$0xff]  }
  0x76   :  { %v13364_v14 = vld [vmem:[#allocation5 + $0x5c] ss:$36 sps:$4 sm:$0xff]   ;;  %449 = vmatpush1.bf16.msra.mxu1 %v13370_v11  ;;  %v13367_v18 = vld [vmem:[#allocation5 + $0x14] ss:$36 sps:$4 sm:$0xff]   ;;  %v13379_v22 = vld [vmem:[#allocation8 + $0x1b0] ss:$36 sps:$4 sm:$0xff]  }
  0x77   :  { %450 = vmatprep.subr.bf16.mxu1 %v13371_v12  ;;  %v13378_v16 = vld [vmem:[#allocation8 + $0x1fc] ss:$36 sps:$4 sm:$0xff]   ;;  %v13381_v20 = vld [vmem:[#allocation8 + $0x1b4] ss:$36 sps:$4 sm:$0xff]   ;;  %v13384_v23 = vld [vmem:[#allocation8 + $0x16c] ss:$36 sps:$4 sm:$0xff]  }
  0x78   :  { %328 = vmatpush1.bf16.msra.mxu0 %v13355_v4  ;;  %v13362_v17 = vld [vmem:[#allocation5 + $0x58] ss:$36 sps:$4 sm:$0xff]   ;;  %v13365_v21 = vld [vmem:[#allocation5 + $0x10] ss:$36 sps:$4 sm:$0xff]   ;;  %v13374_v24 = vld [vmem:[#allocation5 + $0x68] ss:$36 sps:$4 sm:$0xff]  }
  0x79   :  { %366 = vmatprep.subr.bf16.mxu0 %v13358_v6  ;;  %v13376_v19 = vld [vmem:[#allocation8 + $0x1f8] ss:$36 sps:$4 sm:$0xff]   ;;  %v13382_v26 = vld [vmem:[#allocation8 + $0x168] ss:$36 sps:$4 sm:$0xff]   ;;  %vm15551_vm1 = vmmov 0   ;;  %s15552_s6 = smov [#allocation17]  }
  0x7a   :  { %451 = vmatpush1.bf16.msra.mxu1 %v13373_v15  ;;  %v13390_v27 = vld [vmem:[#allocation8 + $0x124] ss:$36 sps:$4 sm:$0xff]   ;;  %v13387_v29 = vld [vmem:[#allocation8 + $0x67c] ss:$36 sps:$4 sm:$0xff]   ;;  %v13393_v33 = vld [vmem:[#allocation8 + $0x634] ss:$36 sps:$4 sm:$0xff]  }
  0x7b   :  { %11595 = vmatmul.mubr.msk.bf16.vlgmr.msra.gmra.mxu0 %vm309_vm0, %v15632_v7  ;;  %4616 = vmatprep.subr.bf16.mxu1 %v13378_v16  ;;  %v13375_v28 = vld [vmem:[#allocation5 + $0x20] ss:$36 sps:$4 sm:$0xff]   ;;  %v13396_v31 = vld [vmem:[#allocation8 + $0xdc] ss:$36 sps:$4 sm:$0xff]   ;;  %v13402_v35 = vld [vmem:[#allocation8 + $0x94] ss:$36 sps:$4 sm:$0xff]  }
  0x7c   :  { %367 = vmatpush1.bf16.msra.mxu0 %v13356_v8  ;;  %386 = vmatprep.mubr.bf16.mxu0 %v15549_v0  ;;  %v13388_v30 = vld [vmem:[#allocation8 + $0x120] ss:$36 sps:$4 sm:$0xff]   ;;  %v13385_v32 = vld [vmem:[#allocation8 + $0x678] ss:$36 sps:$4 sm:$0xff]   ;;  %v13391_v36 = vld [vmem:[#allocation8 + $0x630] ss:$36 sps:$4 sm:$0xff]  }
  0x7d   :  { %368 = vmatprep.subr.bf16.mxu0 %v13361_v9  ;;  %11598 = vmatmul.mubr.msk.bf16.vlgmr.msra.gmra.mxu1 %vm309_vm0, %v15632_v7  ;;  %v13394_v34 = vld [vmem:[#allocation8 + $0xd8] ss:$36 sps:$4 sm:$0xff]   ;;  %v13399_v37 = vld [vmem:[#allocation8 + $0x5ec] ss:$36 sps:$4 sm:$0xff]   ;;  %v13405_v41 = vld [vmem:[#allocation8 + $0x5a4] ss:$36 sps:$4 sm:$0xff]  }
  0x7e   :  { %4617 = vmatpush1.bf16.msra.mxu1 %v13376_v19  ;;  %v13400_v38 = vld [vmem:[#allocation8 + $0x90] ss:$36 sps:$4 sm:$0xff]   ;;  %v13397_v40 = vld [vmem:[#allocation8 + $0x5e8] ss:$36 sps:$4 sm:$0xff]   ;;  %v13403_v44 = vld [vmem:[#allocation8 + $0x5a0] ss:$36 sps:$4 sm:$0xff]  }
  0x7f   :  { %4618 = vmatprep.subr.bf16.mxu1 %v13381_v20  ;;  %v13408_v39 = vld [vmem:[#allocation8 + $0x4c] ss:$36 sps:$4 sm:$0xff]   ;;  %v13414_v43 = vld [vmem:[#allocation8 + $0x4] ss:$36 sps:$4 sm:$0xff]   ;;  %v13411_v45 = vld [vmem:[#allocation8 + $0x55c] ss:$36 sps:$4 sm:$0xff]  }
  0x80   :  { %369 = vmatpush1.bf16.msra.mxu0 %v13359_v13  ;;  %v13406_v42 = vld [vmem:[#allocation8 + $0x48] ss:$36 sps:$4 sm:$0xff]   ;;  %v13412_v46 = vld [vmem:[#allocation8] ss:$36 sps:$4 sm:$0xff]   ;;  %v13409_v48 = vld [vmem:[#allocation8 + $0x558] ss:$36 sps:$4 sm:$0xff]  }
  0x81   :  { %407 = vmatprep.subr.bf16.mxu0 %v13364_v14  ;;  %v13420_v47 = vld [vmem:[#allocation8 + $0x43c] ss:$36 sps:$4 sm:$0xff]   ;;  %v13417_v49 = vld [vmem:[#allocation8 + $0x514] ss:$36 sps:$4 sm:$0xff]   ;;  %v13423_v53 = vld [vmem:[#allocation8 + $0x4cc] ss:$36 sps:$4 sm:$0xff]  }
  0x82   :  { %4619 = vmatpush1.bf16.msra.mxu1 %v13379_v22  ;;  %v13418_v50 = vld [vmem:[#allocation8 + $0x438] ss:$36 sps:$4 sm:$0xff]   ;;  %v13415_v52 = vld [vmem:[#allocation8 + $0x510] ss:$36 sps:$4 sm:$0xff]   ;;  %v13421_v56 = vld [vmem:[#allocation8 + $0x4c8] ss:$36 sps:$4 sm:$0xff]  }
  0x83   :  { %11596 = vmatmul.mubr.msk.bf16.vlgmr.msra.gmra.mxu0 %vm309_vm0, %v15632_v7  ;;  %4620 = vmatprep.subr.bf16.mxu1 %v13384_v23  ;;  %v13426_v51 = vld [vmem:[#allocation8 + $0x3f4] ss:$36 sps:$4 sm:$0xff]   ;;  %v13432_v55 = vld [vmem:[#allocation8 + $0x3ac] ss:$36 sps:$4 sm:$0xff]   ;;  %v13429_v57 = vld [vmem:[#allocation8 + $0x484] ss:$36 sps:$4 sm:$0xff]  }
  0x84   :  { %408 = vmatpush1.bf16.msra.mxu0 %v13362_v17  ;;  %427 = vmatprep.mubr.bf16.mxu0 %v15549_v0  ;;  %v13424_v54 = vld [vmem:[#allocation8 + $0x3f0] ss:$36 sps:$4 sm:$0xff]   ;;  %v13430_v58 = vld [vmem:[#allocation8 + $0x3a8] ss:$36 sps:$4 sm:$0xff]   ;;  %v13427_v60 = vld [vmem:[#allocation8 + $0x480] ss:$36 sps:$4 sm:$0xff]  }
  0x85   :  { %409 = vmatprep.subr.bf16.mxu0 %v13367_v18  ;;  %v13438_v59 = vld [vmem:[#allocation8 + $0x364] ss:$36 sps:$4 sm:$0xff]   ;;  %v13435_v61 = vld [vmem:[#allocation8 + $0x8bc] ss:$36 sps:$4 sm:$0xff]   ;;  %v13441_v2 = vld [vmem:[#allocation8 + $0x874] ss:$36 sps:$4 sm:$0xff]  }
  0x86   :  { %4621 = vmatpush1.bf16.msra.mxu1 %v13382_v26  ;;  %v13436_v62 = vld [vmem:[#allocation8 + $0x360] ss:$36 sps:$4 sm:$0xff]   ;;  %v13433_v1 = vld [vmem:[#allocation8 + $0x8b8] ss:$36 sps:$4 sm:$0xff]   ;;  %v13439_v5 = vld [vmem:[#allocation8 + $0x870] ss:$36 sps:$4 sm:$0xff]   ;;  %v172_v26 = vlaneseq }
  0x87   :  { %4622 = vmatprep.subr.bf16.mxu1 %v13390_v27  ;;  %v13444_v63 = vld [vmem:[#allocation8 + $0x31c] ss:$36 sps:$4 sm:$0xff]   ;;  %v13450_v4 = vld [vmem:[#allocation8 + $0x2d4] ss:$36 sps:$4 sm:$0xff]   ;;  %v13447_v6 = vld [vmem:[#allocation8 + $0x82c] ss:$36 sps:$4 sm:$0xff]  }
  0x88   :  { %410 = vmatpush1.bf16.msra.mxu0 %v13365_v21  ;;  %v13442_v3 = vld [vmem:[#allocation8 + $0x318] ss:$36 sps:$4 sm:$0xff]   ;;  %v13445_v8 = vld [vmem:[#allocation8 + $0x828] ss:$36 sps:$4 sm:$0xff]   ;;  %v13451_v10 = vld [vmem:[#allocation8 + $0x7e0] ss:$36 sps:$4 sm:$0xff]  }
  0x89   :  { %13265 = vmatprep.subr.bf16.mxu0 %v15550_v25  ;;  %v13453_v9 = vld [vmem:[#allocation8 + $0x7e4] ss:$36 sps:$4 sm:$0xff]   ;;  %v13456_v11 = vld [vmem:[#allocation8 + $0x28c] ss:$36 sps:$4 sm:$0xff]   ;;  %v13459_v13 = vld [vmem:[#allocation8 + $0x79c] ss:$36 sps:$4 sm:$0xff]  }
  0x8a   :  { %4623 = vmatpush1.bf16.msra.mxu1 %v13388_v30  ;;  %v13454_v12 = vld [vmem:[#allocation8 + $0x288] ss:$36 sps:$4 sm:$0xff]   ;;  %v13457_v14 = vld [vmem:[#allocation8 + $0x798] ss:$36 sps:$4 sm:$0xff]   ;;  %v13460_v16 = vld [vmem:[#allocation8 + $0x240] ss:$36 sps:$4 sm:$0xff]  }
  0x8b   :  { %11597 = vmatmul.mubr.msk.bf16.vlgmr.msra.gmra.mxu0 %vm309_vm0, %v15632_v7  ;;  %4624 = vmatprep.subr.bf16.mxu1 %v13396_v31  ;;  %v13462_v15 = vld [vmem:[#allocation8 + $0x244] ss:$36 sps:$4 sm:$0xff]   ;;  %v13465_v17 = vld [vmem:[#allocation8 + $0x754] ss:$36 sps:$4 sm:$0xff]   ;;  %v13471_v18 = vld [vmem:[#allocation8 + $0xafc] ss:$36 sps:$4 sm:$0xff]  }
  0x8c   :  { %13266 = vmatpush3.bf16.msra.mxu0 %v13374_v24  ;;  %13269 = vmatprep.mubr.msk.bf16.mxu0 %vm15551_vm1, %v15550_v25  ;;  %v13463_v19 = vld [vmem:[#allocation8 + $0x750] ss:$36 sps:$4 sm:$0xff]   ;;  %v13466_v21 = vld [vmem:[#allocation8 + $0x708] ss:$36 sps:$4 sm:$0xff]   ;;  %v13472_v23 = vld [vmem:[#allocation8 + $0x6c0] ss:$36 sps:$4 sm:$0xff]  }
  0x8d   :  { %13267 = vmatprep.subr.bf16.mxu0 %v15550_v25  ;;  %v13468_v20 = vld [vmem:[#allocation8 + $0x70c] ss:$36 sps:$4 sm:$0xff]   ;;  %v13474_v22 = vld [vmem:[#allocation8 + $0x6c4] ss:$36 sps:$4 sm:$0xff]   ;;  %v13483_v24 = vld [vmem:[#allocation8 + $0xf7c] ss:$36 sps:$4 sm:$0xff]  }
  0x8e   :  { %4625 = vmatpush1.bf16.msra.mxu1 %v13394_v34  ;;  %v15650_v27 = vshrl.u32 %v172_v26, 7  ;;  %s11563_s8 = sshll.u32 %s15552_s6, 4  ;;  %s11564_s8 = int_to_ptr.vmem [resolvable:$true] %s11563_s8 }
  0x8f   :  { %4626 = vmatprep.subr.bf16.mxu1 %v13402_v35  ;;  %s15504_s11 = scalar_lea.vmem %s11564_s8, 128  ;;  %p15509_p4 = scmp.lt.s32.totalorder %s11564_s8, %s11564_s8 }
  0x90   :  { %13268 = vmatpush3.bf16.msra.mxu0 %v13375_v28  ;;  %v15652_v28 = vld [vmem:[#allocation7] sm:$0xff]  ;;  %v15658_v30 = vsub.s32 1, %v15650_v27  ;;  %v15665_v35 = vsub.s32 2, %v15650_v27  ;;  %p15505_p3 = scmp.ne.s32.totalorder %s11564_s8, %s15504_s11  ;;  %p15510_p5 = scmp.lt.s32.totalorder %s15504_s11, %s15504_s11 }
  0x91   :  { %4657 = vmatprep.subr.bf16.mxu0 %v13387_v29  ;;  %v15655_v29 = vsub.s32 0, %v15650_v27 }
  0x92   :  { %4627 = vmatpush1.bf16.msra.mxu1 %v13400_v38  ;;  %v15668_v38 = vsub.s32 3, %v15650_v27  ;;  %p15511_p6 = por %p15510_p5, %p15509_p4 }
  0x93   :  { %13270 = vmatmul.mubr.msk.bf16.vlgmr.msra.gmra.mxu0 %vm309_vm0, %v15632_v7  ;;  %4628 = vmatprep.subr.bf16.mxu1 %v13408_v39  ;;  %v13448_v7 = vld [vmem:[#allocation8 + $0x2d0] ss:$36 sps:$4 sm:$0xff]   ;;  %v175_v31 = vrot.slane %v15652_v28, %v15655_v29 }
  0x94   :  { %4658 = vmatpush1.bf16.msra.mxu0 %v13385_v32  ;;  %v179_v32 = vrot.slane %v15652_v28, %v15658_v30  ;;  %p15512_p7 = pnand %p15511_p6, %p15505_p3 }
  0x95   :  { %4659 = vmatprep.subr.bf16.mxu0 %v13393_v33 }
  0x96   :  { %4629 = vmatpush1.bf16.msra.mxu1 %v13406_v42  ;;  %v183_v42 = vrot.slane %v15652_v28, %v15665_v35 }
  0x97   :  { %4630 = vmatprep.subr.bf16.mxu1 %v13414_v43  ;;  %v15673_v43 = vsub.s32 7, %v15650_v27 }
  0x98   :  { %4660 = vmatpush1.bf16.msra.mxu0 %v13391_v36 }
  0x99   :  { %4661 = vmatprep.subr.bf16.mxu0 %v13399_v37 }
  0x9a   :  { %4631 = vmatpush1.bf16.msra.mxu1 %v13412_v46  ;;  %v13469_v46 = vld [vmem:[#allocation8 + $0xaf8] ss:$36 sps:$4 sm:$0xff]  }
  0x9b   :  { %4632 = vmatprep.subr.bf16.mxu1 %v13420_v47  ;;  %v187_v47 = vrot.slane %v15652_v28, %v15668_v38 }
  0x9c   :  { %4662 = vmatpush1.bf16.msra.mxu0 %v13397_v40 }
  0x9d   :  { %4663 = vmatprep.subr.bf16.mxu0 %v13405_v41 }
  0x9e   :  { %4633 = vmatpush2.bf16.msra.mxu1 %v13418_v50  ;;  %v13477_v50 = vld [vmem:[#allocation8 + $0xab4] ss:$36 sps:$4 sm:$0xff]  }
  0x9f   :  { %4634 = vmatprep.subr.bf16.mxu1 %v13426_v51 }
  0xa0   :  { %4664 = vmatpush1.bf16.msra.mxu0 %v13403_v44 }
  0xa1   :  { %4665 = vmatprep.subr.bf16.mxu0 %v13411_v45 }
  0xa2   :  { %4635 = vmatpush2.bf16.msra.mxu1 %v13424_v54 }
  0xa3   :  { %4636 = vmatprep.subr.bf16.mxu1 %v13432_v55 }
  0xa4   :  { %4666 = vmatpush1.bf16.msra.mxu0 %v13409_v48 }
  0xa5   :  { %4667 = vmatprep.subr.bf16.mxu0 %v13417_v49 }
  0xa6   :  { %4637 = vmatpush2.bf16.msra.mxu1 %v13430_v58  ;;  %v15688_v58 = vsub.s32 5, %v15650_v27 }
  0xa7   :  { %4638 = vmatprep.subr.bf16.mxu1 %v13438_v59  ;;  %v13480_v59 = vld [vmem:[#allocation8 + $0xa6c] ss:$36 sps:$4 sm:$0xff]  }
  0xa8   :  { %4668 = vmatpush1.bf16.msra.mxu0 %v13415_v52  ;;  %v203_v52 = vrot.slane %v15652_v28, %v15673_v43 }
  0xa9   :  { %4669 = vmatprep.subr.bf16.mxu0 %v13423_v53 }
  0xaa   :  { %4639 = vmatpush2.bf16.msra.mxu1 %v13436_v62 }
  0xab   :  { %4640 = vmatprep.subr.bf16.mxu1 %v13444_v63  ;;  %v13478_v63 = vld [vmem:[#allocation8 + $0xa68] ss:$36 sps:$4 sm:$0xff]  }
  0xac   :  { %4670 = vmatpush1.bf16.msra.mxu0 %v13421_v56 }
  0xad   :  { %4671 = vmatprep.subr.bf16.mxu0 %v13429_v57  ;;  %v13475_v57 = vld [vmem:[#allocation8 + $0xab0] ss:$36 sps:$4 sm:$0xff]  }
  0xae   :  { %4641 = vmatpush2.bf16.msra.mxu1 %v13442_v3 }
  0xaf   :  { %4642 = vmatprep.subr.bf16.mxu1 %v13450_v4  ;;  %v13486_v4 = vld [vmem:[#allocation8 + $0xa24] ss:$36 sps:$4 sm:$0xff]  }
  0xb0   :  { %4672 = vmatpush1.bf16.msra.mxu0 %v13427_v60 }
  0xb1   :  { %4673 = vmatprep.subr.bf16.mxu0 %v13435_v61 }
  0xb2   :  { %4643 = vmatpush2.bf16.msra.mxu1 %v13448_v7 }
  0xb3   :  { %4644 = vmatprep.subr.bf16.mxu1 %v13456_v11 }
  0xb4   :  { %4674 = vmatpush2.bf16.msra.mxu0 %v13433_v1  ;;  %v13481_v1 = vld [vmem:[#allocation8 + $0xf78] ss:$36 sps:$4 sm:$0xff]  }
  0xb5   :  { %4675 = vmatprep.subr.bf16.mxu0 %v13441_v2 }
  0xb6   :  { %4645 = vmatpush2.bf16.msra.mxu1 %v13454_v12 }
  0xb7   :  { %4646 = vmatprep.subr.bf16.mxu1 %v13462_v15  ;;  %v13487_v15 = vld [vmem:[#allocation8 + $0xf30] ss:$36 sps:$4 sm:$0xff]  }
  0xb8   :  { %4676 = vmatpush2.bf16.msra.mxu0 %v13439_v5  ;;  %v13489_v5 = vld [vmem:[#allocation8 + $0xf34] ss:$36 sps:$4 sm:$0xff]  }
  0xb9   :  { %4677 = vmatprep.subr.bf16.mxu0 %v13447_v6 }
  0xba   :  { %4647 = vmatpush2.bf16.msra.mxu1 %v13460_v16 }
  0xbb   :  { %4698 = vmatprep.subr.bf16.mxu1 %v13471_v18  ;;  %v13492_v18 = vld [vmem:[#allocation8 + $0x9dc] ss:$36 sps:$4 sm:$0xff]  }
  0xbc   :  { %4678 = vmatpush2.bf16.msra.mxu0 %v13445_v8 }
  0xbd   :  { %4679 = vmatprep.subr.bf16.mxu0 %v13453_v9  ;;  %v195_v9 = vrot.slane %v15652_v28, %v15688_v58 }
  0xc0   :  { %4680 = vmatpush2.bf16.msra.mxu0 %v13451_v10 }
  0xc1   :  { %4681 = vmatprep.subr.bf16.mxu0 %v13459_v13 }
  0xc4   :  { %4682 = vmatpush2.bf16.msra.mxu0 %v13457_v14  ;;  %v13484_v14 = vld [vmem:[#allocation8 + $0xa20] ss:$36 sps:$4 sm:$0xff]  }
  0xc5   :  { %4683 = vmatprep.subr.bf16.mxu0 %v13465_v17 }
  0xc8   :  { %4684 = vmatpush2.bf16.msra.mxu0 %v13463_v19  ;;  %v13495_v19 = vld [vmem:[#allocation8 + $0xeec] ss:$36 sps:$4 sm:$0xff]  }
  0xc9   :  { %4685 = vmatprep.subr.bf16.mxu0 %v13468_v20 }
  0xcc   :  { %4686 = vmatpush2.bf16.msra.mxu0 %v13466_v21 }
  0xcd   :  { %4687 = vmatprep.subr.bf16.mxu0 %v13474_v22 }
  0xd0   :  { %4688 = vmatpush2.bf16.msra.mxu0 %v13472_v23  ;;  %v13490_v23 = vld [vmem:[#allocation8 + $0x9d8] ss:$36 sps:$4 sm:$0xff]  }
  0xd1   :  { %4739 = vmatprep.subr.bf16.mxu0 %v13483_v24  ;;  %v13493_v24 = vld [vmem:[#allocation8 + $0xee8] ss:$36 sps:$4 sm:$0xff]  }
 0x13b   :  { %v347_v33 = vpop.f32.mrf.mxu0 }
 0x13c   :  { %v348_v34 = vadd.f32 %v347_v33, %v175_v31  ;;  %v13498_v31 = vld [vmem:[#allocation8 + $0x994] ss:$36 sps:$4 sm:$0xff]  }
 0x13d   :  { %v349_v36 = vpop.f32.mrf.mxu0  ;;  %v15685_v54 = vpop.f32.mrf.mxu1 }
 0x13e   :  { %v350_v37 = vadd.f32 %v349_v36, %v179_v32  ;;  %v517_v39 = vmax.f32 %v348_v34, 0.0  ;;  %v13501_v32 = vld [vmem:[#allocation8 + $0xea4] ss:$36 sps:$4 sm:$0xff]   ;;  %v13496_v36 = vld [vmem:[#allocation8 + $0x990] ss:$36 sps:$4 sm:$0xff]  }
 0x13f   :  { %v351_v40 = vpop.f32.mrf.mxu0  ;;  %v472_v61 = vpop.f32.mrf.mxu1 }
 0x140   :  { %v518_v41 = vmax.f32 %v350_v37, 0.0  ;;  %v15679_v48 = vpack.c.bf16 %v517_v39, %v517_v39  ;;  %v473_v2 = vadd.f32 %v472_v61, %v203_v52  ;;  %v13499_v37 = vld [vmem:[#allocation8 + $0xea0] ss:$36 sps:$4 sm:$0xff]   ;;  %v13504_v39 = vld [vmem:[#allocation8 + $0x94c] ss:$36 sps:$4 sm:$0xff]  }
 0x141   :  { %v352_v44 = vpop.f32.mrf.mxu0  ;;  %v474_v7 = vpop.f32.mrf.mxu1  ;;  %v13507_v40 = vld [vmem:[#allocation8 + $0xe5c] ss:$36 sps:$4 sm:$0xff]  }
 0x142   :  { %v15675_v45 = vpack.c.bf16 %v518_v41, %v518_v41  ;;  %v524_v10 = vmax.f32 %v473_v2, 0.0  ;;  %v13502_v44 = vld [vmem:[#allocation8 + $0x948] ss:$36 sps:$4 sm:$0xff]   ;;  %v13516_v52 = vld [vmem:[#allocation8 + $0xd3c] ss:$36 sps:$4 sm:$0xff]  }
 0x143   :  { %v388_v49 = vpop.f32.mrf.mxu0  ;;  %v475_v12 = vpop.f32.mrf.mxu1  ;;  %v13523_v61 = vld [vmem:[#allocation8 + $0xd80] ss:$36 sps:$4 sm:$0xff]   ;;  %v13529_v2 = vld [vmem:[#allocation8 + $0x11b8] ss:$36 sps:$4 sm:$0xff]   ;;  %v13535_v7 = vld [vmem:[#allocation8 + $0x1170] ss:$36 sps:$4 sm:$0xff]  }
 0x144   :  { %v389_v51 = vadd.f32 %v388_v49, %v183_v42  ;;  %4648 = vmatprep.mubr.bf16.mxu1 %v15675_v45  ;;  %v15699_v13 = vpack.c.bf16 %v524_v10, %v524_v10  ;;  %v13513_v49 = vld [vmem:[#allocation8 + $0xe14] ss:$36 sps:$4 sm:$0xff]   ;;  %v13543_v10 = vld [vmem:[#allocation8 + $0x112c] ss:$36 sps:$4 sm:$0xff]  }
 0x145   :  { %v390_v53 = vpop.f32.mrf.mxu0  ;;  %4649 = vmatmul.mubr.bf16.vlgmr.msra.gmra.mxu1 %v15679_v48  ;;  %v13538_v12 = vld [vmem:[#allocation8 + $0xc18] ss:$36 sps:$4 sm:$0xff]  }
 0x146   :  { %v519_v55 = vmax.f32 %v389_v51, 0.0  ;;  %v391_v56 = vadd.f32 %v390_v53, %v187_v47  ;;  %4699 = vmatpush1.bf16.msra.mxu1 %v13469_v46  ;;  %v13505_v46 = vld [vmem:[#allocation8 + $0xe58] ss:$36 sps:$4 sm:$0xff]   ;;  %v13510_v47 = vld [vmem:[#allocation8 + $0x904] ss:$36 sps:$4 sm:$0xff]  }
 0x147   :  { %4700 = vmatprep.subr.bf16.mxu1 %v13477_v50  ;;  %v392_v60 = vpop.f32.mrf.mxu0  ;;  %v13508_v50 = vld [vmem:[#allocation8 + $0x900] ss:$36 sps:$4 sm:$0xff]   ;;  %v13511_v51 = vld [vmem:[#allocation8 + $0xe10] ss:$36 sps:$4 sm:$0xff]  }
 0x148   :  { %v520_v62 = vmax.f32 %v391_v56, 0.0  ;;  %v15690_v3 = vpack.c.bf16 %v519_v55, %v519_v55  ;;  %v13519_v53 = vld [vmem:[#allocation8 + $0xdcc] ss:$36 sps:$4 sm:$0xff]   ;;  %v13514_v55 = vld [vmem:[#allocation8 + $0xd38] ss:$36 sps:$4 sm:$0xff]  }
 0x149   :  { %v393_v6 = vpop.f32.mrf.mxu0  ;;  %v13517_v56 = vld [vmem:[#allocation8 + $0xdc8] ss:$36 sps:$4 sm:$0xff]   ;;  %v13520_v60 = vld [vmem:[#allocation8 + $0xcf0] ss:$36 sps:$4 sm:$0xff]  }
 0x14a   :  { %v15692_v8 = vpack.c.bf16 %v520_v62, %v520_v62  ;;  %4701 = vmatpush1.bf16.msra.mxu1 %v13475_v57  ;;  %v13522_v57 = vld [vmem:[#allocation8 + $0xcf4] ss:$36 sps:$4 sm:$0xff]   ;;  %v13528_v62 = vld [vmem:[#allocation8 + $0xcac] ss:$36 sps:$4 sm:$0xff]   ;;  %v13532_v6 = vld [vmem:[#allocation8 + $0xc60] ss:$36 sps:$4 sm:$0xff]  }
 0x14b   :  { %4702 = vmatprep.subr.bf16.mxu1 %v13480_v59  ;;  %v15696_v11 = vpop.f32.mrf.mxu0  ;;  %v13525_v59 = vld [vmem:[#allocation8 + $0xd84] ss:$36 sps:$4 sm:$0xff]  }
 0x14c   :  { %4689 = vmatprep.mubr.bf16.mxu0 %v15692_v8 }
 0x14d   :  { %4690 = vmatmul.mubr.bf16.vlgmr.msra.gmra.mxu0 %v15690_v3  ;;  %v431_v16 = vpop.f32.mrf.mxu0 }
 0x14e   :  { %4703 = vmatpush1.bf16.msra.mxu1 %v13478_v63  ;;  %4740 = vmatpush1.bf16.msra.mxu0 %v13481_v1  ;;  %v432_v17 = vadd.f32 %v431_v16, %v195_v9  ;;  %v13531_v63 = vld [vmem:[#allocation8 + $0x11bc] ss:$36 sps:$4 sm:$0xff]   ;;  %v13526_v1 = vld [vmem:[#allocation8 + $0xca8] ss:$36 sps:$4 sm:$0xff]   ;;  %v13546_v16 = vld [vmem:[#allocation8 + $0xbd4] ss:$36 sps:$4 sm:$0xff]  }
 0x14f   :  { %4704 = vmatprep.subr.bf16.mxu1 %v13486_v4  ;;  %4741 = vmatprep.subr.bf16.mxu0 %v13489_v5  ;;  %v433_v20 = vpop.f32.mrf.mxu0  ;;  %v13534_v4 = vld [vmem:[#allocation8 + $0xc64] ss:$36 sps:$4 sm:$0xff]   ;;  %v13537_v5 = vld [vmem:[#allocation8 + $0x1174] ss:$36 sps:$4 sm:$0xff]   ;;  %v13540_v9 = vld [vmem:[#allocation8 + $0xc1c] ss:$36 sps:$4 sm:$0xff]  }
 0x150   :  { %v522_v21 = vmax.f32 %v432_v17, 0.0  ;;  %4771 = vmatprep.mubr.bf16.mxu0 %v15699_v13  ;;  %v13549_v17 = vld [vmem:[#allocation8 + $0x10e4] ss:$36 sps:$4 sm:$0xff]  }
 0x151   :  { %v434_v22 = vpop.f32.mrf.mxu0 }
 0x152   :  { %4705 = vmatpush1.bf16.msra.mxu1 %v13484_v14  ;;  %4742 = vmatpush1.bf16.msra.mxu0 %v13487_v15  ;;  %v15703_v26 = vpack.c.bf16 %v522_v21, %v522_v21  ;;  %v13541_v14 = vld [vmem:[#allocation8 + $0x1128] ss:$36 sps:$4 sm:$0xff]   ;;  %v15709_v15 = vsub.s32 4, %v15650_v27  ;;  %v13555_v22 = vld [vmem:[#allocation8 + $0x109c] ss:$36 sps:$4 sm:$0xff]  }
 0x153   :  { %4706 = vmatprep.subr.bf16.mxu1 %v13492_v18  ;;  %4743 = vmatprep.subr.bf16.mxu0 %v13495_v19  ;;  %v15705_v33 = vpop.f32.mrf.mxu0  ;;  %v13544_v18 = vld [vmem:[#allocation8 + $0xbd0] ss:$36 sps:$4 sm:$0xff]   ;;  %v13547_v19 = vld [vmem:[#allocation8 + $0x10e0] ss:$36 sps:$4 sm:$0xff]  }
 0x154   :  { %4730 = vmatprep.mubr.bf16.mxu1 %v15703_v26  ;;  %v191_v20 = vrot.slane %v15652_v28, %v15709_v15  ;;  %v13552_v21 = vld [vmem:[#allocation8 + $0xb8c] ss:$36 sps:$4 sm:$0xff]  }
 0x155   :  { %v13271_v34 = vpop.f32.mrf.mxu0 }
 0x156   :  { %4707 = vmatpush1.bf16.msra.mxu1 %v13490_v23  ;;  %4744 = vmatpush1.bf16.msra.mxu0 %v13493_v24  ;;  %v15714_v23 = vsub.s32 6, %v15650_v27  ;;  %v13550_v24 = vld [vmem:[#allocation8 + $0xb88] ss:$36 sps:$4 sm:$0xff]  }
 0x157   :  { %4708 = vmatprep.subr.bf16.mxu1 %v13498_v31  ;;  %4745 = vmatprep.subr.bf16.mxu0 %v13501_v32  ;;  %v514_v41 = vpop.f32.mrf.mxu0  ;;  %v13553_v31 = vld [vmem:[#allocation8 + $0x1098] ss:$36 sps:$4 sm:$0xff]   ;;  %v430_v32 = vadd.f32 %v15696_v11, %v191_v20  ;;  %v13558_v34 = vld [vmem:[#allocation8 + $0xb44] ss:$36 sps:$4 sm:$0xff]   ;;  %v13564_v27 = vld [vmem:[#allocation8 + $0x100c] ss:$36 sps:$4 sm:$0xff]  }
 0x158   :  { %v13562_v11 = vld [vmem:[#allocation8 + $0x1008] ss:$36 sps:$4 sm:$0xff]   ;;  %v13609_v20 = vld [vmem:[#allocation8 + $0x9c] ss:$36 sps:$4 sm:$0xff]  }
 0x159   :  { %v13272_v42 = vpop.f32.mrf.mxu0  ;;  %v521_v41 = vmax.f32 %v430_v32, 0.0  ;;  %v13615_v32 = vld [vmem:[#allocation8 + $0x684] ss:$36 sps:$4 sm:$0xff]  }
 0x15a   :  { %4709 = vmatpush1.bf16.msra.mxu1 %v13496_v36  ;;  %4746 = vmatpush1.bf16.msra.mxu0 %v13499_v37  ;;  %v13561_v36 = vld [vmem:[#allocation8 + $0x1054] ss:$36 sps:$4 sm:$0xff]   ;;  %v199_v37 = vrot.slane %v15652_v28, %v15714_v23  ;;  %v13567_v42 = vld [vmem:[#allocation8 + $0x13fc] ss:$36 sps:$4 sm:$0xff]   ;;  %v13570_v28 = vld [vmem:[#allocation8 + $0xfc4] ss:$36 sps:$4 sm:$0xff]  }
 0x15b   :  { %4710 = vmatprep.subr.bf16.mxu1 %v13504_v39  ;;  %4747 = vmatprep.subr.bf16.mxu0 %v13507_v40  ;;  %v13556_v39 = vld [vmem:[#allocation8 + $0xb40] ss:$36 sps:$4 sm:$0xff]   ;;  %v13559_v40 = vld [vmem:[#allocation8 + $0x1050] ss:$36 sps:$4 sm:$0xff]  }
 0x15e   :  { %4711 = vmatpush1.bf16.msra.mxu1 %v13502_v44  ;;  %4748 = vmatpush1.bf16.msra.mxu0 %v13505_v46  ;;  %v471_v44 = vadd.f32 %v15685_v54, %v199_v37  ;;  %v13565_v46 = vld [vmem:[#allocation8 + $0x13f8] ss:$36 sps:$4 sm:$0xff]   ;;  %v13574_v54 = vld [vmem:[#allocation8 + $0x1368] ss:$36 sps:$4 sm:$0xff]  }
 0x15f   :  { %4712 = vmatprep.subr.bf16.mxu1 %v13510_v47  ;;  %4749 = vmatprep.subr.bf16.mxu0 %v13513_v49  ;;  %v15720_v47 = vpack.c.bf16 %v521_v41, %v521_v41  ;;  %v13573_v49 = vld [vmem:[#allocation8 + $0x13b4] ss:$36 sps:$4 sm:$0xff]   ;;  %v13618_v37 = vld [vmem:[#allocation8 + $0xc] ss:$36 sps:$4 sm:$0xff]  }
 0x160   :  { %v13619_v41 = vld [vmem:[#allocation8 + $0x638] ss:$36 sps:$4 sm:$0xff]  }
 0x162   :  { %4713 = vmatpush1.bf16.msra.mxu1 %v13508_v50  ;;  %4750 = vmatpush1.bf16.msra.mxu0 %v13511_v51  ;;  %v13568_v50 = vld [vmem:[#allocation8 + $0xfc0] ss:$36 sps:$4 sm:$0xff]   ;;  %v13571_v51 = vld [vmem:[#allocation8 + $0x13b0] ss:$36 sps:$4 sm:$0xff]  }
 0x163   :  { %4714 = vmatprep.subr.bf16.mxu1 %v13516_v52  ;;  %4751 = vmatprep.subr.bf16.mxu0 %v13519_v53  ;;  %v523_v52 = vmax.f32 %v471_v44, 0.0  ;;  %v13576_v53 = vld [vmem:[#allocation8 + $0x136c] ss:$36 sps:$4 sm:$0xff]   ;;  %v13622_v44 = vld [vmem:[#allocation8 + $0x440] ss:$36 sps:$4 sm:$0xff]  }
 0x166   :  { %4715 = vmatpush2.bf16.msra.mxu1 %v13514_v55  ;;  %4752 = vmatpush1.bf16.msra.mxu0 %v13517_v56  ;;  %v13579_v55 = vld [vmem:[#allocation8 + $0x204] ss:$36 sps:$4 sm:$0xff]  }
 0x167   :  { %4716 = vmatprep.subr.bf16.mxu1 %v13522_v57  ;;  %4753 = vmatprep.subr.bf16.mxu0 %v13525_v59  ;;  %v13577_v56 = vld [vmem:[#allocation8 + $0x200] ss:$36 sps:$4 sm:$0xff]   ;;  %v15724_v57 = vpack.c.bf16 %v523_v52, %v523_v52 }
 0x168   :  { %v13582_v59 = vld [vmem:[#allocation8 + $0x1324] ss:$36 sps:$4 sm:$0xff]  }
 0x169   :  { %v13639_v52 = vld [vmem:[#allocation8 + $0x564] ss:$36 sps:$4 sm:$0xff]  }
 0x16a   :  { %4717 = vmatpush2.bf16.msra.mxu1 %v13520_v60  ;;  %4754 = vmatpush1.bf16.msra.mxu0 %v13523_v61  ;;  %v13580_v60 = vld [vmem:[#allocation8 + $0x1320] ss:$36 sps:$4 sm:$0xff]   ;;  %v13583_v61 = vld [vmem:[#allocation8 + $0x1b8] ss:$36 sps:$4 sm:$0xff]  }
 0x16b   :  { %4718 = vmatprep.subr.bf16.mxu1 %v13528_v62  ;;  %4755 = vmatprep.subr.bf16.mxu0 %v13531_v63  ;;  %v13585_v62 = vld [vmem:[#allocation8 + $0x1bc] ss:$36 sps:$4 sm:$0xff]  }
 0x16c   :  { %v13588_v63 = vld [vmem:[#allocation8 + $0x12dc] ss:$36 sps:$4 sm:$0xff]  }
 0x16e   :  { %4719 = vmatpush2.bf16.msra.mxu1 %v13526_v1  ;;  %4756 = vmatpush2.bf16.msra.mxu0 %v13529_v2  ;;  %v13591_v1 = vld [vmem:[#allocation8 + $0x174] ss:$36 sps:$4 sm:$0xff]  }
 0x16f   :  { %4720 = vmatprep.subr.bf16.mxu1 %v13534_v4  ;;  %4757 = vmatprep.subr.bf16.mxu0 %v13537_v5  ;;  %v13586_v2 = vld [vmem:[#allocation8 + $0x12d8] ss:$36 sps:$4 sm:$0xff]   ;;  %v13589_v4 = vld [vmem:[#allocation8 + $0x170] ss:$36 sps:$4 sm:$0xff]  }
 0x170   :  { %v13594_v5 = vld [vmem:[#allocation8 + $0x1294] ss:$36 sps:$4 sm:$0xff]  }
 0x172   :  { %4721 = vmatpush2.bf16.msra.mxu1 %v13532_v6  ;;  %4758 = vmatpush2.bf16.msra.mxu0 %v13535_v7  ;;  %v13597_v6 = vld [vmem:[#allocation8 + $0x12c] ss:$36 sps:$4 sm:$0xff]   ;;  %v11576_v7 = vld [vmem:[#allocation7 + $0x8] ss:$0 sm:$0xff] }
 0x173   :  { %4722 = vmatprep.subr.bf16.mxu1 %v13540_v9  ;;  %4759 = vmatprep.subr.bf16.mxu0 %v13543_v10  ;;  %v13592_v9 = vld [vmem:[#allocation8 + $0x1290] ss:$36 sps:$4 sm:$0xff]   ;;  %v13595_v10 = vld [vmem:[#allocation8 + $0x128] ss:$36 sps:$4 sm:$0xff]  }
 0x176   :  { %4723 = vmatpush2.bf16.msra.mxu1 %v13538_v12  ;;  %4760 = vmatpush2.bf16.msra.mxu0 %v13541_v14  ;;  %v13600_v12 = vld [vmem:[#allocation8 + $0x124c] ss:$36 sps:$4 sm:$0xff]   ;;  %v13603_v14 = vld [vmem:[#allocation8 + $0xe4] ss:$36 sps:$4 sm:$0xff]  }
 0x177   :  { %4724 = vmatprep.subr.bf16.mxu1 %v13546_v16  ;;  %4761 = vmatprep.subr.bf16.mxu0 %v13549_v17  ;;  %v512_v16 = vadd.f32 %v11576_v7, %v15705_v33  ;;  %v13598_v17 = vld [vmem:[#allocation8 + $0x1248] ss:$36 sps:$4 sm:$0xff]   ;;  %v13660_v7 = vld [vmem:[#allocation8 + $0x294] ss:$36 sps:$4 sm:$0xff]  }
 0x17a   :  { %4725 = vmatpush2.bf16.msra.mxu1 %v13544_v18  ;;  %4762 = vmatpush2.bf16.msra.mxu0 %v13547_v19  ;;  %v13601_v18 = vld [vmem:[#allocation8 + $0xe0] ss:$36 sps:$4 sm:$0xff]  }
 0x17b   :  { %4726 = vmatprep.subr.bf16.mxu1 %v13552_v21  ;;  %4763 = vmatprep.subr.bf16.mxu0 %v13555_v22  ;;  %v13606_v19 = vld [vmem:[#allocation8 + $0x1204] ss:$36 sps:$4 sm:$0xff]   ;;  %v525_v21 = vmax.f32 %v512_v16, 0.0  ;;  %v13669_v16 = vld [vmem:[#allocation8 + $0x87c] ss:$36 sps:$4 sm:$0xff]  }
 0x17c   :  { %v13604_v22 = vld [vmem:[#allocation8 + $0x1200] ss:$36 sps:$4 sm:$0xff]  }
 0x17d   :  { %v15729_v33 = vpack.c.bf16 %v525_v21, %v525_v21  ;;  %v13670_v21 = vld [vmem:[#allocation8 + $0x830] ss:$36 sps:$4 sm:$0xff]  }
 0x17e   :  { %4727 = vmatpush2.bf16.msra.mxu1 %v13550_v24  ;;  %4764 = vmatpush2.bf16.msra.mxu0 %v13553_v31  ;;  %v13607_v24 = vld [vmem:[#allocation8 + $0x98] ss:$36 sps:$4 sm:$0xff]  }
 0x17f   :  { %4728 = vmatprep.subr.bf16.mxu1 %v13558_v34  ;;  %4765 = vmatprep.subr.bf16.mxu0 %v13561_v36  ;;  %v13612_v31 = vld [vmem:[#allocation8 + $0x54] ss:$36 sps:$4 sm:$0xff]   ;;  %v13613_v36 = vld [vmem:[#allocation8 + $0x680] ss:$36 sps:$4 sm:$0xff]  }
 0x180   :  { %v13610_v34 = vld [vmem:[#allocation8 + $0x50] ss:$36 sps:$4 sm:$0xff]  }
 0x182   :  { %4729 = vmatpush2.bf16.msra.mxu1 %v13556_v39  ;;  %4766 = vmatpush2.bf16.msra.mxu0 %v13559_v40  ;;  %v13621_v39 = vld [vmem:[#allocation8 + $0x63c] ss:$36 sps:$4 sm:$0xff]   ;;  %v13616_v40 = vld [vmem:[#allocation8 + $0x8] ss:$36 sps:$4 sm:$0xff]  }
 0x183   :  { %4767 = vmatprep.subr.bf16.mxu0 %v13564_v27  ;;  %4780 = vmatprep.subr.bf16.mxu1 %v13567_v42  ;;  %v13624_v27 = vld [vmem:[#allocation8 + $0x444] ss:$36 sps:$4 sm:$0xff]   ;;  %v13627_v42 = vld [vmem:[#allocation8 + $0x5f4] ss:$36 sps:$4 sm:$0xff]  }
 0x185   :  { %4731 = vmatmul.mubr.bf16.vlgmr.msra.gmra.mxu1 %v15720_v47 }
 0x186   :  { %4768 = vmatpush2.bf16.msra.mxu0 %v13562_v11  ;;  %4781 = vmatpush1.bf16.msra.mxu1 %v13565_v46  ;;  %v13625_v11 = vld [vmem:[#allocation8 + $0x5f0] ss:$36 sps:$4 sm:$0xff]   ;;  %v13630_v46 = vld [vmem:[#allocation8 + $0x3fc] ss:$36 sps:$4 sm:$0xff]  }
 0x187   :  { %4769 = vmatprep.subr.bf16.mxu0 %v13570_v28  ;;  %4782 = vmatprep.subr.bf16.mxu1 %v13573_v49  ;;  %v13633_v28 = vld [vmem:[#allocation8 + $0x5ac] ss:$36 sps:$4 sm:$0xff]   ;;  %v13628_v49 = vld [vmem:[#allocation8 + $0x3f8] ss:$36 sps:$4 sm:$0xff]  }
 0x188   :  { %4812 = vmatprep.mubr.bf16.mxu1 %v15549_v0 }
 0x18a   :  { %4770 = vmatpush2.bf16.msra.mxu0 %v13568_v50  ;;  %4783 = vmatpush1.bf16.msra.mxu1 %v13571_v51  ;;  %v13631_v50 = vld [vmem:[#allocation8 + $0x5a8] ss:$36 sps:$4 sm:$0xff]   ;;  %v13636_v51 = vld [vmem:[#allocation8 + $0x3b4] ss:$36 sps:$4 sm:$0xff]  }
 0x18b   :  { %4784 = vmatprep.subr.bf16.mxu1 %v13576_v53  ;;  %4821 = vmatprep.subr.bf16.mxu0 %v13579_v55  ;;  %v13634_v53 = vld [vmem:[#allocation8 + $0x3b0] ss:$36 sps:$4 sm:$0xff]   ;;  %v13637_v55 = vld [vmem:[#allocation8 + $0x560] ss:$36 sps:$4 sm:$0xff]  }
 0x18d   :  { %4772 = vmatmul.mubr.bf16.vlgmr.msra.gmra.mxu0 %v15724_v57 }
 0x18e   :  { %4785 = vmatpush1.bf16.msra.mxu1 %v13574_v54  ;;  %4822 = vmatpush1.bf16.msra.mxu0 %v13577_v56  ;;  %v13642_v54 = vld [vmem:[#allocation8 + $0x36c] ss:$36 sps:$4 sm:$0xff]   ;;  %v13645_v56 = vld [vmem:[#allocation8 + $0x51c] ss:$36 sps:$4 sm:$0xff]  }
 0x18f   :  { %4853 = vmatprep.mubr.bf16.mxu0 %v15675_v45  ;;  %4786 = vmatprep.subr.bf16.mxu1 %v13582_v59  ;;  %v13640_v59 = vld [vmem:[#allocation8 + $0x368] ss:$36 sps:$4 sm:$0xff]  }
 0x190   :  { %4823 = vmatprep.subr.bf16.mxu0 %v13585_v62  ;;  %v13651_v62 = vld [vmem:[#allocation8 + $0x4d4] ss:$36 sps:$4 sm:$0xff]  }
 0x192   :  { %4787 = vmatpush1.bf16.msra.mxu1 %v13580_v60  ;;  %4824 = vmatpush1.bf16.msra.mxu0 %v13583_v61  ;;  %v13643_v60 = vld [vmem:[#allocation8 + $0x518] ss:$36 sps:$4 sm:$0xff]   ;;  %v13648_v61 = vld [vmem:[#allocation8 + $0x324] ss:$36 sps:$4 sm:$0xff]  }
 0x193   :  { %4788 = vmatprep.subr.bf16.mxu1 %v13588_v63  ;;  %4825 = vmatprep.subr.bf16.mxu0 %v13591_v1  ;;  %v13646_v63 = vld [vmem:[#allocation8 + $0x320] ss:$36 sps:$4 sm:$0xff]   ;;  %v13649_v1 = vld [vmem:[#allocation8 + $0x4d0] ss:$36 sps:$4 sm:$0xff]  }
 0x196   :  { %4789 = vmatpush1.bf16.msra.mxu1 %v13586_v2  ;;  %4826 = vmatpush1.bf16.msra.mxu0 %v13589_v4  ;;  %v13654_v2 = vld [vmem:[#allocation8 + $0x2dc] ss:$36 sps:$4 sm:$0xff]   ;;  %v13657_v4 = vld [vmem:[#allocation8 + $0x48c] ss:$36 sps:$4 sm:$0xff]  }
 0x197   :  { %4790 = vmatprep.subr.bf16.mxu1 %v13594_v5  ;;  %4827 = vmatprep.subr.bf16.mxu0 %v13597_v6  ;;  %v13652_v5 = vld [vmem:[#allocation8 + $0x2d8] ss:$36 sps:$4 sm:$0xff]   ;;  %v13655_v6 = vld [vmem:[#allocation8 + $0x488] ss:$36 sps:$4 sm:$0xff]  }
 0x19a   :  { %4791 = vmatpush1.bf16.msra.mxu1 %v13592_v9  ;;  %4828 = vmatpush1.bf16.msra.mxu0 %v13595_v10  ;;  %v13663_v9 = vld [vmem:[#allocation8 + $0x8c4] ss:$36 sps:$4 sm:$0xff]   ;;  %v13658_v10 = vld [vmem:[#allocation8 + $0x290] ss:$36 sps:$4 sm:$0xff]  }
 0x19b   :  { %4792 = vmatprep.subr.bf16.mxu1 %v13600_v12  ;;  %4829 = vmatprep.subr.bf16.mxu0 %v13603_v14  ;;  %v13661_v12 = vld [vmem:[#allocation8 + $0x8c0] ss:$36 sps:$4 sm:$0xff]   ;;  %v13666_v14 = vld [vmem:[#allocation8 + $0x24c] ss:$36 sps:$4 sm:$0xff]  }
 0x19e   :  { %4793 = vmatpush1.bf16.msra.mxu1 %v13598_v17  ;;  %4830 = vmatpush1.bf16.msra.mxu0 %v13601_v18  ;;  %v13664_v17 = vld [vmem:[#allocation8 + $0x248] ss:$36 sps:$4 sm:$0xff]   ;;  %v13667_v18 = vld [vmem:[#allocation8 + $0x878] ss:$36 sps:$4 sm:$0xff]  }
 0x19f   :  { %4794 = vmatprep.subr.bf16.mxu1 %v13606_v19  ;;  %4831 = vmatprep.subr.bf16.mxu0 %v13609_v20  ;;  %v13672_v19 = vld [vmem:[#allocation8 + $0x834] ss:$36 sps:$4 sm:$0xff]   ;;  %v13675_v20 = vld [vmem:[#allocation8 + $0xb04] ss:$36 sps:$4 sm:$0xff]  }
 0x1a2   :  { %4795 = vmatpush1.bf16.msra.mxu1 %v13604_v22  ;;  %4832 = vmatpush1.bf16.msra.mxu0 %v13607_v24  ;;  %v13673_v22 = vld [vmem:[#allocation8 + $0xb00] ss:$36 sps:$4 sm:$0xff]   ;;  %v13678_v24 = vld [vmem:[#allocation8 + $0x7ec] ss:$36 sps:$4 sm:$0xff]  }
 0x1a3   :  { %4833 = vmatprep.subr.bf16.mxu0 %v13612_v31  ;;  %4862 = vmatprep.subr.bf16.mxu1 %v13615_v32  ;;  %v13676_v31 = vld [vmem:[#allocation8 + $0x7e8] ss:$36 sps:$4 sm:$0xff]   ;;  %v13679_v32 = vld [vmem:[#allocation8 + $0xab8] ss:$36 sps:$4 sm:$0xff]  }
 0x1a5   :  { %4813 = vmatmul.mubr.bf16.vlgmr.msra.gmra.mxu1 %v15729_v33 }
 0x1a6   :  { %4834 = vmatpush1.bf16.msra.mxu0 %v13610_v34  ;;  %4863 = vmatpush1.bf16.msra.mxu1 %v13613_v36  ;;  %v13681_v34 = vld [vmem:[#allocation8 + $0xabc] ss:$36 sps:$4 sm:$0xff]   ;;  %v13684_v36 = vld [vmem:[#allocation8 + $0x7a4] ss:$36 sps:$4 sm:$0xff]  }
 0x1a7   :  { %4894 = vmatprep.mubr.bf16.mxu1 %v15692_v8  ;;  %4835 = vmatprep.subr.bf16.mxu0 %v13618_v37  ;;  %v13687_v37 = vld [vmem:[#allocation8 + $0xa74] ss:$36 sps:$4 sm:$0xff]  }
 0x1a8   :  { %4864 = vmatprep.subr.bf16.mxu1 %v13621_v39  ;;  %v13682_v39 = vld [vmem:[#allocation8 + $0x7a0] ss:$36 sps:$4 sm:$0xff]  }
 0x1aa   :  { %4836 = vmatpush1.bf16.msra.mxu0 %v13616_v40  ;;  %4865 = vmatpush1.bf16.msra.mxu1 %v13619_v41  ;;  %v13685_v40 = vld [vmem:[#allocation8 + $0xa70] ss:$36 sps:$4 sm:$0xff]   ;;  %v13690_v41 = vld [vmem:[#allocation8 + $0x75c] ss:$36 sps:$4 sm:$0xff]  }
 0x1ab   :  { %4837 = vmatprep.subr.bf16.mxu0 %v13624_v27  ;;  %4866 = vmatprep.subr.bf16.mxu1 %v13627_v42  ;;  %v13693_v27 = vld [vmem:[#allocation8 + $0xa2c] ss:$36 sps:$4 sm:$0xff]   ;;  %v13688_v42 = vld [vmem:[#allocation8 + $0x758] ss:$36 sps:$4 sm:$0xff]  }
 0x1ae   :  { %4838 = vmatpush2.bf16.msra.mxu0 %v13622_v44  ;;  %4867 = vmatpush1.bf16.msra.mxu1 %v13625_v11  ;;  %v13691_v44 = vld [vmem:[#allocation8 + $0xa28] ss:$36 sps:$4 sm:$0xff]   ;;  %v13696_v11 = vld [vmem:[#allocation8 + $0x714] ss:$36 sps:$4 sm:$0xff]  }
 0x1af   :  { %4839 = vmatprep.subr.bf16.mxu0 %v13630_v46  ;;  %4868 = vmatprep.subr.bf16.mxu1 %v13633_v28  ;;  %v13699_v46 = vld [vmem:[#allocation8 + $0x9e4] ss:$36 sps:$4 sm:$0xff]   ;;  %v13694_v28 = vld [vmem:[#allocation8 + $0x710] ss:$36 sps:$4 sm:$0xff]  }
 0x1b2   :  { %4840 = vmatpush2.bf16.msra.mxu0 %v13628_v49  ;;  %4869 = vmatpush1.bf16.msra.mxu1 %v13631_v50  ;;  %v13697_v49 = vld [vmem:[#allocation8 + $0x9e0] ss:$36 sps:$4 sm:$0xff]   ;;  %v13702_v50 = vld [vmem:[#allocation8 + $0x6cc] ss:$36 sps:$4 sm:$0xff]  }
 0x1b3   :  { %4841 = vmatprep.subr.bf16.mxu0 %v13636_v51  ;;  %4870 = vmatprep.subr.bf16.mxu1 %v13639_v52  ;;  %v13705_v51 = vld [vmem:[#allocation8 + $0x99c] ss:$36 sps:$4 sm:$0xff]   ;;  %v13700_v52 = vld [vmem:[#allocation8 + $0x6c8] ss:$36 sps:$4 sm:$0xff]  }
 0x1b6   :  { %4842 = vmatpush2.bf16.msra.mxu0 %v13634_v53  ;;  %4871 = vmatpush1.bf16.msra.mxu1 %v13637_v55  ;;  %v13703_v53 = vld [vmem:[#allocation8 + $0x998] ss:$36 sps:$4 sm:$0xff]  }
 0x1b7   :  { %4843 = vmatprep.subr.bf16.mxu0 %v13642_v54  ;;  %4872 = vmatprep.subr.bf16.mxu1 %v13645_v56  ;;  %v13708_v55 = vld [vmem:[#allocation8 + $0x954] ss:$36 sps:$4 sm:$0xff]   ;;  %v13711_v54 = vld [vmem:[#allocation8 + $0xf84] ss:$36 sps:$4 sm:$0xff]  }
 0x1b8   :  { %v13706_v56 = vld [vmem:[#allocation8 + $0x950] ss:$36 sps:$4 sm:$0xff]  }
 0x1ba   :  { %4844 = vmatpush2.bf16.msra.mxu0 %v13640_v59  ;;  %4873 = vmatpush1.bf16.msra.mxu1 %v13643_v60  ;;  %v13709_v59 = vld [vmem:[#allocation8 + $0xf80] ss:$36 sps:$4 sm:$0xff]   ;;  %v13714_v60 = vld [vmem:[#allocation8 + $0x90c] ss:$36 sps:$4 sm:$0xff]  }
 0x1bb   :  { %4845 = vmatprep.subr.bf16.mxu0 %v13648_v61  ;;  %4874 = vmatprep.subr.bf16.mxu1 %v13651_v62  ;;  %v13712_v61 = vld [vmem:[#allocation8 + $0x908] ss:$36 sps:$4 sm:$0xff]   ;;  %v13715_v62 = vld [vmem:[#allocation8 + $0xf38] ss:$36 sps:$4 sm:$0xff]  }
 0x1be   :  { %4846 = vmatpush2.bf16.msra.mxu0 %v13646_v63  ;;  %4875 = vmatpush1.bf16.msra.mxu1 %v13649_v1  ;;  %v13717_v63 = vld [vmem:[#allocation8 + $0xf3c] ss:$36 sps:$4 sm:$0xff]   ;;  %v13720_v1 = vld [vmem:[#allocation8 + $0xd44] ss:$36 sps:$4 sm:$0xff]  }
 0x1bf   :  { %4847 = vmatprep.subr.bf16.mxu0 %v13654_v2  ;;  %4876 = vmatprep.subr.bf16.mxu1 %v13657_v4  ;;  %v13723_v2 = vld [vmem:[#allocation8 + $0xef4] ss:$36 sps:$4 sm:$0xff]   ;;  %v13718_v4 = vld [vmem:[#allocation8 + $0xd40] ss:$36 sps:$4 sm:$0xff]  }
 0x1c2   :  { %4848 = vmatpush2.bf16.msra.mxu0 %v13652_v5  ;;  %4877 = vmatpush1.bf16.msra.mxu1 %v13655_v6  ;;  %v13721_v5 = vld [vmem:[#allocation8 + $0xef0] ss:$36 sps:$4 sm:$0xff]   ;;  %v13726_v6 = vld [vmem:[#allocation8 + $0xcfc] ss:$36 sps:$4 sm:$0xff]  }
 0x1c3   :  { %4849 = vmatprep.subr.bf16.mxu0 %v13660_v7  ;;  %4878 = vmatprep.subr.bf16.mxu1 %v13663_v9  ;;  %v13729_v7 = vld [vmem:[#allocation8 + $0xeac] ss:$36 sps:$4 sm:$0xff]   ;;  %v13724_v9 = vld [vmem:[#allocation8 + $0xcf8] ss:$36 sps:$4 sm:$0xff]  }
 0x1c6   :  { %4850 = vmatpush2.bf16.msra.mxu0 %v13658_v10  ;;  %4879 = vmatpush2.bf16.msra.mxu1 %v13661_v12  ;;  %v13727_v10 = vld [vmem:[#allocation8 + $0xea8] ss:$36 sps:$4 sm:$0xff]   ;;  %v13732_v12 = vld [vmem:[#allocation8 + $0xcb4] ss:$36 sps:$4 sm:$0xff]  }
 0x1c7   :  { %4851 = vmatprep.subr.bf16.mxu0 %v13666_v14  ;;  %4880 = vmatprep.subr.bf16.mxu1 %v13669_v16  ;;  %v13735_v14 = vld [vmem:[#allocation8 + $0xe64] ss:$36 sps:$4 sm:$0xff]   ;;  %v13730_v16 = vld [vmem:[#allocation8 + $0xcb0] ss:$36 sps:$4 sm:$0xff]  }
 0x1ca   :  { %4852 = vmatpush2.bf16.msra.mxu0 %v13664_v17  ;;  %4881 = vmatpush2.bf16.msra.mxu1 %v13667_v18  ;;  %v13733_v17 = vld [vmem:[#allocation8 + $0xe60] ss:$36 sps:$4 sm:$0xff]   ;;  %v13738_v18 = vld [vmem:[#allocation8 + $0xc6c] ss:$36 sps:$4 sm:$0xff]  }
 0x1cb   :  { %4882 = vmatprep.subr.bf16.mxu1 %v13672_v19  ;;  %4903 = vmatprep.subr.bf16.mxu0 %v13675_v20  ;;  %v13741_v19 = vld [vmem:[#allocation8 + $0xe1c] ss:$36 sps:$4 sm:$0xff]   ;;  %v13736_v20 = vld [vmem:[#allocation8 + $0xc68] ss:$36 sps:$4 sm:$0xff]  }
 0x1cd   :  { %4854 = vmatmul.mubr.bf16.vlgmr.msra.gmra.mxu0 %v15679_v48 }
 0x1ce   :  { %4883 = vmatpush2.bf16.msra.mxu1 %v13670_v21  ;;  %4904 = vmatpush1.bf16.msra.mxu0 %v13673_v22  ;;  %v13739_v21 = vld [vmem:[#allocation8 + $0xe18] ss:$36 sps:$4 sm:$0xff]   ;;  %v13744_v22 = vld [vmem:[#allocation8 + $0xc24] ss:$36 sps:$4 sm:$0xff]  }
 0x1cf   :  { %4935 = vmatprep.mubr.bf16.mxu0 %v15703_v26  ;;  %4884 = vmatprep.subr.bf16.mxu1 %v13678_v24  ;;  %v13747_v24 = vld [vmem:[#allocation8 + $0xdd4] ss:$36 sps:$4 sm:$0xff]  }
 0x1d0   :  { %4905 = vmatprep.subr.bf16.mxu0 %v13681_v34  ;;  %v13750_v34 = vld [vmem:[#allocation8 + $0xbdc] ss:$36 sps:$4 sm:$0xff]  }
 0x1d2   :  { %4885 = vmatpush2.bf16.msra.mxu1 %v13676_v31  ;;  %4906 = vmatpush1.bf16.msra.mxu0 %v13679_v32  ;;  %v13742_v31 = vld [vmem:[#allocation8 + $0xc20] ss:$36 sps:$4 sm:$0xff]   ;;  %v13745_v32 = vld [vmem:[#allocation8 + $0xdd0] ss:$36 sps:$4 sm:$0xff]  }
 0x1d3   :  { %4886 = vmatprep.subr.bf16.mxu1 %v13684_v36  ;;  %4907 = vmatprep.subr.bf16.mxu0 %v13687_v37  ;;  %v13753_v36 = vld [vmem:[#allocation8 + $0xd8c] ss:$36 sps:$4 sm:$0xff]   ;;  %v13748_v37 = vld [vmem:[#allocation8 + $0xbd8] ss:$36 sps:$4 sm:$0xff]  }
 0x1d6   :  { %4887 = vmatpush2.bf16.msra.mxu1 %v13682_v39  ;;  %4908 = vmatpush1.bf16.msra.mxu0 %v13685_v40  ;;  %v13751_v39 = vld [vmem:[#allocation8 + $0xd88] ss:$36 sps:$4 sm:$0xff]   ;;  %v13756_v40 = vld [vmem:[#allocation8 + $0xb94] ss:$36 sps:$4 sm:$0xff]  }
 0x1d7   :  { %4888 = vmatprep.subr.bf16.mxu1 %v13690_v41  ;;  %4909 = vmatprep.subr.bf16.mxu0 %v13693_v27  ;;  %v13759_v41 = vld [vmem:[#allocation8 + $0x11c4] ss:$36 sps:$4 sm:$0xff]   ;;  %v13754_v27 = vld [vmem:[#allocation8 + $0xb90] ss:$36 sps:$4 sm:$0xff]  }
 0x1da   :  { %4889 = vmatpush2.bf16.msra.mxu1 %v13688_v42  ;;  %4910 = vmatpush1.bf16.msra.mxu0 %v13691_v44  ;;  %v13757_v42 = vld [vmem:[#allocation8 + $0x11c0] ss:$36 sps:$4 sm:$0xff]  }
 0x1db   :  { %4890 = vmatprep.subr.bf16.mxu1 %v13696_v11  ;;  %4911 = vmatprep.subr.bf16.mxu0 %v13699_v46  ;;  %v1255_v44 = vld [vmem:[#allocation10] sm:$0xff]  ;;  %v13762_v11 = vld [vmem:[#allocation8 + $0xb4c] ss:$36 sps:$4 sm:$0xff]  }
 0x1dc   :  { %v13765_v46 = vld [vmem:[#allocation8 + $0x117c] ss:$36 sps:$4 sm:$0xff]  }
 0x1de   :  { %4891 = vmatpush2.bf16.msra.mxu1 %v13694_v28  ;;  %4912 = vmatpush1.bf16.msra.mxu0 %v13697_v49  ;;  %v13760_v49 = vld [vmem:[#allocation8 + $0xb48] ss:$36 sps:$4 sm:$0xff]  }
 0x1df   :  { %4892 = vmatprep.subr.bf16.mxu1 %v13702_v50  ;;  %4913 = vmatprep.subr.bf16.mxu0 %v13705_v51  ;;  %v13763_v50 = vld [vmem:[#allocation8 + $0x1178] ss:$36 sps:$4 sm:$0xff]  }
 0x1e2   :  { %4893 = vmatpush2.bf16.msra.mxu1 %v13700_v52  ;;  %4914 = vmatpush1.bf16.msra.mxu0 %v13703_v53  ;;  %v13768_v52 = vld [vmem:[#allocation8 + $0x1134] ss:$36 sps:$4 sm:$0xff]   ;;  %v13771_v53 = vld [vmem:[#allocation8 + $0x1404] ss:$36 sps:$4 sm:$0xff]  }
 0x1e3   :  { %4915 = vmatprep.subr.bf16.mxu0 %v13708_v55  ;;  %4944 = vmatprep.subr.bf16.mxu1 %v13711_v54  ;;  %v1262_v55 = vrot.slane %v1255_v44, %v15655_v29  ;;  %v13766_v54 = vld [vmem:[#allocation8 + $0x1130] ss:$36 sps:$4 sm:$0xff]  }
 0x1e5   :  { %4895 = vmatmul.mubr.bf16.vlgmr.msra.gmra.mxu1 %v15690_v3 }
 0x1e6   :  { %4916 = vmatpush1.bf16.msra.mxu0 %v13706_v56  ;;  %4945 = vmatpush1.bf16.msra.mxu1 %v13709_v59  ;;  %v13769_v56 = vld [vmem:[#allocation8 + $0x1400] ss:$36 sps:$4 sm:$0xff]  }
 0x1e7   :  { %4976 = vmatprep.mubr.bf16.mxu1 %v15699_v13  ;;  %4917 = vmatprep.subr.bf16.mxu0 %v13714_v60  ;;  %v13774_v60 = vld [vmem:[#allocation8 + $0x10ec] ss:$36 sps:$4 sm:$0xff]  }
 0x1e8   :  { %4946 = vmatprep.subr.bf16.mxu1 %v13717_v63 }
 0x1ea   :  { %4918 = vmatpush1.bf16.msra.mxu0 %v13712_v61  ;;  %4947 = vmatpush1.bf16.msra.mxu1 %v13715_v62  ;;  %v13777_v61 = vld [vmem:[#allocation8 + $0x13bc] ss:$36 sps:$4 sm:$0xff]   ;;  %v1266_v62 = vrot.slane %v1255_v44, %v15658_v30  ;;  %v13802_v44 = vld [vmem:[#allocation8 + $0x1250] ss:$36 sps:$4 sm:$0xff]  }
 0x1eb   :  { %4919 = vmatprep.subr.bf16.mxu0 %v13720_v1  ;;  %4948 = vmatprep.subr.bf16.mxu1 %v13723_v2  ;;  %v13772_v2 = vld [vmem:[#allocation8 + $0x10e8] ss:$36 sps:$4 sm:$0xff]  }
 0x1ee   :  { %4920 = vmatpush2.bf16.msra.mxu0 %v13718_v4  ;;  %4949 = vmatpush1.bf16.msra.mxu1 %v13721_v5  ;;  %v13775_v4 = vld [vmem:[#allocation8 + $0x13b8] ss:$36 sps:$4 sm:$0xff]  }
 0x1ef   :  { %4921 = vmatprep.subr.bf16.mxu0 %v13726_v6  ;;  %4950 = vmatprep.subr.bf16.mxu1 %v13729_v7  ;;  %v13780_v6 = vld [vmem:[#allocation8 + $0x10a4] ss:$36 sps:$4 sm:$0xff]   ;;  %v13783_v7 = vld [vmem:[#allocation8 + $0x1374] ss:$36 sps:$4 sm:$0xff]  }
 0x1f2   :  { %4922 = vmatpush2.bf16.msra.mxu0 %v13724_v9  ;;  %4951 = vmatpush1.bf16.msra.mxu1 %v13727_v10 }
 0x1f3   :  { %4923 = vmatprep.subr.bf16.mxu0 %v13732_v12  ;;  %4952 = vmatprep.subr.bf16.mxu1 %v13735_v14 }
 0x1f6   :  { %4924 = vmatpush2.bf16.msra.mxu0 %v13730_v16  ;;  %4953 = vmatpush1.bf16.msra.mxu1 %v13733_v17  ;;  %v13778_v16 = vld [vmem:[#allocation8 + $0x10a0] ss:$36 sps:$4 sm:$0xff]   ;;  %v13781_v17 = vld [vmem:[#allocation8 + $0x1370] ss:$36 sps:$4 sm:$0xff]  }
 0x1f7   :  { %4925 = vmatprep.subr.bf16.mxu0 %v13738_v18  ;;  %4954 = vmatprep.subr.bf16.mxu1 %v13741_v19  ;;  %v13786_v19 = vld [vmem:[#allocation8 + $0x105c] ss:$36 sps:$4 sm:$0xff]  }
 0x1fa   :  { %4926 = vmatpush2.bf16.msra.mxu0 %v13736_v20  ;;  %4955 = vmatpush1.bf16.msra.mxu1 %v13739_v21  ;;  %v13789_v20 = vld [vmem:[#allocation8 + $0x132c] ss:$36 sps:$4 sm:$0xff]  }
 0x1fb   :  { %4927 = vmatprep.subr.bf16.mxu0 %v13744_v22  ;;  %4956 = vmatprep.subr.bf16.mxu1 %v13747_v24  ;;  %v13784_v22 = vld [vmem:[#allocation8 + $0x1058] ss:$36 sps:$4 sm:$0xff]   ;;  %v13787_v24 = vld [vmem:[#allocation8 + $0x1328] ss:$36 sps:$4 sm:$0xff]  }
 0x1fe   :  { %4928 = vmatpush2.bf16.msra.mxu0 %v13742_v31  ;;  %4957 = vmatpush1.bf16.msra.mxu1 %v13745_v32  ;;  %v13792_v31 = vld [vmem:[#allocation8 + $0x1014] ss:$36 sps:$4 sm:$0xff]   ;;  %v13795_v32 = vld [vmem:[#allocation8 + $0x12e4] ss:$36 sps:$4 sm:$0xff]  }
 0x1ff   :  { %4929 = vmatprep.subr.bf16.mxu0 %v13750_v34  ;;  %4958 = vmatprep.subr.bf16.mxu1 %v13753_v36  ;;  %v13790_v34 = vld [vmem:[#allocation8 + $0x1010] ss:$36 sps:$4 sm:$0xff]   ;;  %v13793_v36 = vld [vmem:[#allocation8 + $0x12e0] ss:$36 sps:$4 sm:$0xff]  }
 0x202   :  { %4930 = vmatpush2.bf16.msra.mxu0 %v13748_v37  ;;  %4959 = vmatpush1.bf16.msra.mxu1 %v13751_v39  ;;  %v13798_v37 = vld [vmem:[#allocation8 + $0xfcc] ss:$36 sps:$4 sm:$0xff]   ;;  %v13801_v39 = vld [vmem:[#allocation8 + $0x129c] ss:$36 sps:$4 sm:$0xff]  }
 0x203   :  { %4931 = vmatprep.subr.bf16.mxu0 %v13756_v40  ;;  %4960 = vmatprep.subr.bf16.mxu1 %v13759_v41  ;;  %v13796_v40 = vld [vmem:[#allocation8 + $0xfc8] ss:$36 sps:$4 sm:$0xff]   ;;  %v13799_v41 = vld [vmem:[#allocation8 + $0x1298] ss:$36 sps:$4 sm:$0xff]  }
 0x205   :  { %v4650_v28 = vpop.f32.mrf.mxu1 }
 0x206   :  { %4932 = vmatpush2.bf16.msra.mxu0 %v13754_v27  ;;  %4961 = vmatpush2.bf16.msra.mxu1 %v13757_v42  ;;  %v4651_v1 = vadd.f32 %v4650_v28, %v1262_v55  ;;  %v13804_v27 = vld [vmem:[#allocation8 + $0x1254] ss:$36 sps:$4 sm:$0xff]   ;;  %v13807_v42 = vld [vmem:[#allocation8 + $0x20c] ss:$36 sps:$4 sm:$0xff]  }
 0x207   :  { %v4652_v51 = vpop.f32.mrf.mxu1  ;;  %4933 = vmatprep.subr.bf16.mxu0 %v13762_v11  ;;  %4962 = vmatprep.subr.bf16.mxu1 %v13765_v46  ;;  %v13805_v11 = vld [vmem:[#allocation8 + $0x208] ss:$36 sps:$4 sm:$0xff]  }
 0x208   :  { %v4653_v9 = vadd.f32 %v4652_v51, %v1266_v62  ;;  %v13810_v46 = vld [vmem:[#allocation8 + $0x120c] ss:$36 sps:$4 sm:$0xff]   ;;  %v13816_v51 = vld [vmem:[#allocation8 + $0x17c] ss:$36 sps:$4 sm:$0xff]  }
 0x209   :  { %v4654_v59 = vpop.f32.mrf.mxu1  ;;  %v13808_v28 = vld [vmem:[#allocation8 + $0x1208] ss:$36 sps:$4 sm:$0xff]   ;;  %v13831_v62 = vld [vmem:[#allocation8 + $0x5fc] ss:$36 sps:$4 sm:$0xff]  }
 0x20a   :  { %4934 = vmatpush2.bf16.msra.mxu0 %v13760_v49  ;;  %4963 = vmatpush2.bf16.msra.mxu1 %v13763_v50  ;;  %v13811_v49 = vld [vmem:[#allocation8 + $0x1c0] ss:$36 sps:$4 sm:$0xff]   ;;  %v13817_v55 = vld [vmem:[#allocation8 + $0x688] ss:$36 sps:$4 sm:$0xff]   ;;  %v13820_v59 = vld [vmem:[#allocation8 + $0x130] ss:$36 sps:$4 sm:$0xff]  }
 0x20b   :  { %v4655_v63 = vpop.f32.mrf.mxu1  ;;  %4964 = vmatprep.subr.bf16.mxu1 %v13768_v52  ;;  %4985 = vmatprep.subr.bf16.mxu0 %v13771_v53  ;;  %v13813_v50 = vld [vmem:[#allocation8 + $0x1c4] ss:$36 sps:$4 sm:$0xff]   ;;  %v13819_v52 = vld [vmem:[#allocation8 + $0x68c] ss:$36 sps:$4 sm:$0xff]   ;;  %v13814_v53 = vld [vmem:[#allocation8 + $0x178] ss:$36 sps:$4 sm:$0xff]  }
 0x20c   :  { %v13826_v63 = vld [vmem:[#allocation8 + $0xe8] ss:$36 sps:$4 sm:$0xff]  }
 0x20d   :  { %4936 = vmatmul.mubr.bf16.vlgmr.msra.gmra.mxu0 %v15720_v47  ;;  %v4691_v5 = vpop.f32.mrf.mxu0 }
 0x20e   :  { %v15740_v10 = vadd.f32 %v4691_v5, %v4651_v1  ;;  %4965 = vmatpush2.bf16.msra.mxu1 %v13766_v54  ;;  %4986 = vmatpush1.bf16.msra.mxu0 %v13769_v56  ;;  %v13822_v54 = vld [vmem:[#allocation8 + $0x134] ss:$36 sps:$4 sm:$0xff]   ;;  %v13825_v56 = vld [vmem:[#allocation8 + $0x644] ss:$36 sps:$4 sm:$0xff]  }
 0x20f   :  { %v4693_v12 = vpop.f32.mrf.mxu0  ;;  %4966 = vmatprep.subr.bf16.mxu1 %v13774_v60  ;;  %4987 = vmatprep.subr.bf16.mxu0 %v13777_v61  ;;  %v13823_v60 = vld [vmem:[#allocation8 + $0x640] ss:$36 sps:$4 sm:$0xff]   ;;  %v13828_v61 = vld [vmem:[#allocation8 + $0xec] ss:$36 sps:$4 sm:$0xff]   ;;  %v13829_v1 = vld [vmem:[#allocation8 + $0x5f8] ss:$36 sps:$4 sm:$0xff]  }
 0x210   :  { %v15742_v14 = vadd.f32 %v4693_v12, %v4653_v9  ;;  %5017 = vmatprep.mubr.bf16.mxu0 %v15549_v0  ;;  %v13832_v5 = vld [vmem:[#allocation8 + $0xa0] ss:$36 sps:$4 sm:$0xff]   ;;  %v13843_v9 = vld [vmem:[#allocation8 + $0x56c] ss:$36 sps:$4 sm:$0xff]   ;;  %v13838_v12 = vld [vmem:[#allocation8 + $0x58] ss:$36 sps:$4 sm:$0xff]  }
 0x211   :  { %v4695_v18 = vpop.f32.mrf.mxu0 }
 0x212   :  { %4967 = vmatpush2.bf16.msra.mxu1 %v13772_v2  ;;  %4988 = vmatpush1.bf16.msra.mxu0 %v13775_v4  ;;  %v13834_v2 = vld [vmem:[#allocation8 + $0xa4] ss:$36 sps:$4 sm:$0xff]   ;;  %v13837_v4 = vld [vmem:[#allocation8 + $0x5b4] ss:$36 sps:$4 sm:$0xff]  }
 0x213   :  { %4968 = vmatprep.subr.bf16.mxu1 %v13780_v6  ;;  %4989 = vmatprep.subr.bf16.mxu0 %v13783_v7  ;;  %v4696_v21 = vpop.f32.mrf.mxu0  ;;  %v13835_v6 = vld [vmem:[#allocation8 + $0x5b0] ss:$36 sps:$4 sm:$0xff]   ;;  %v13840_v7 = vld [vmem:[#allocation8 + $0x5c] ss:$36 sps:$4 sm:$0xff]   ;;  %v13849_v18 = vld [vmem:[#allocation8 + $0x524] ss:$36 sps:$4 sm:$0xff]  }
 0x214   :  { %v13852_v21 = vld [vmem:[#allocation8 + $0x44c] ss:$36 sps:$4 sm:$0xff]  }
 0x216   :  { %4969 = vmatpush2.bf16.msra.mxu1 %v13778_v16  ;;  %4990 = vmatpush1.bf16.msra.mxu0 %v13781_v17  ;;  %v13841_v16 = vld [vmem:[#allocation8 + $0x568] ss:$36 sps:$4 sm:$0xff]   ;;  %v13846_v17 = vld [vmem:[#allocation8 + $0x14] ss:$36 sps:$4 sm:$0xff]  }
 0x217   :  { %4970 = vmatprep.subr.bf16.mxu1 %v13786_v19  ;;  %4991 = vmatprep.subr.bf16.mxu0 %v13789_v20  ;;  %v13844_v19 = vld [vmem:[#allocation8 + $0x10] ss:$36 sps:$4 sm:$0xff]   ;;  %v13847_v20 = vld [vmem:[#allocation8 + $0x520] ss:$36 sps:$4 sm:$0xff]  }
 0x21a   :  { %4971 = vmatpush2.bf16.msra.mxu1 %v13784_v22  ;;  %4992 = vmatpush1.bf16.msra.mxu0 %v13787_v24  ;;  %v13855_v22 = vld [vmem:[#allocation8 + $0x4dc] ss:$36 sps:$4 sm:$0xff]   ;;  %v13850_v24 = vld [vmem:[#allocation8 + $0x448] ss:$36 sps:$4 sm:$0xff]  }
 0x21b   :  { %4972 = vmatprep.subr.bf16.mxu1 %v13792_v31  ;;  %4993 = vmatprep.subr.bf16.mxu0 %v13795_v32  ;;  %v13853_v31 = vld [vmem:[#allocation8 + $0x4d8] ss:$36 sps:$4 sm:$0xff]   ;;  %v13858_v32 = vld [vmem:[#allocation8 + $0x404] ss:$36 sps:$4 sm:$0xff]  }
 0x21e   :  { %4973 = vmatpush2.bf16.msra.mxu1 %v13790_v34  ;;  %4994 = vmatpush1.bf16.msra.mxu0 %v13793_v36  ;;  %v13861_v34 = vld [vmem:[#allocation8 + $0x494] ss:$36 sps:$4 sm:$0xff]  }
 0x21f   :  { %4974 = vmatprep.subr.bf16.mxu1 %v13798_v37  ;;  %4995 = vmatprep.subr.bf16.mxu0 %v13801_v39  ;;  %v13856_v37 = vld [vmem:[#allocation8 + $0x400] ss:$36 sps:$4 sm:$0xff]   ;;  %v13859_v39 = vld [vmem:[#allocation8 + $0x490] ss:$36 sps:$4 sm:$0xff]  }
 0x222   :  { %4975 = vmatpush2.bf16.msra.mxu1 %v13796_v40  ;;  %4996 = vmatpush1.bf16.msra.mxu0 %v13799_v41 }
 0x223   :  { %4997 = vmatprep.subr.bf16.mxu0 %v13804_v27  ;;  %5026 = vmatprep.subr.bf16.mxu1 %v13807_v42  ;;  %v13864_v27 = vld [vmem:[#allocation8 + $0x3bc] ss:$36 sps:$4 sm:$0xff]   ;;  %v13867_v42 = vld [vmem:[#allocation8 + $0x8cc] ss:$36 sps:$4 sm:$0xff]  }
 0x225   :  { %4977 = vmatmul.mubr.bf16.vlgmr.msra.gmra.mxu1 %v15724_v57 }
 0x226   :  { %4998 = vmatpush1.bf16.msra.mxu0 %v13802_v44  ;;  %5027 = vmatpush1.bf16.msra.mxu1 %v13805_v11  ;;  %v13862_v11 = vld [vmem:[#allocation8 + $0x3b8] ss:$36 sps:$4 sm:$0xff]  }
 0x227   :  { %5058 = vmatprep.mubr.bf16.mxu1 %v15675_v45  ;;  %4999 = vmatprep.subr.bf16.mxu0 %v13810_v46  ;;  %v13865_v46 = vld [vmem:[#allocation8 + $0x8c8] ss:$36 sps:$4 sm:$0xff]  }
 0x228   :  { %5028 = vmatprep.subr.bf16.mxu1 %v13813_v50  ;;  %v13873_v50 = vld [vmem:[#allocation8 + $0x884] ss:$36 sps:$4 sm:$0xff]  }
 0x22a   :  { %5000 = vmatpush1.bf16.msra.mxu0 %v13808_v28  ;;  %5029 = vmatpush1.bf16.msra.mxu1 %v13811_v49  ;;  %v13870_v49 = vld [vmem:[#allocation8 + $0x374] ss:$36 sps:$4 sm:$0xff]  }
 0x22b   :  { %5030 = vmatprep.subr.bf16.mxu1 %v13816_v51  ;;  %5067 = vmatprep.subr.bf16.mxu0 %v13819_v52  ;;  %v13871_v52 = vld [vmem:[#allocation8 + $0x880] ss:$36 sps:$4 sm:$0xff]  }
 0x22d   :  { %5018 = vmatmul.mubr.bf16.vlgmr.msra.gmra.mxu0 %v15729_v33 }
 0x22e   :  { %5031 = vmatpush1.bf16.msra.mxu1 %v13814_v53  ;;  %5068 = vmatpush1.bf16.msra.mxu0 %v13817_v55  ;;  %v13876_v55 = vld [vmem:[#allocation8 + $0x32c] ss:$36 sps:$4 sm:$0xff]  }
 0x22f   :  { %5099 = vmatprep.mubr.bf16.mxu0 %v15692_v8  ;;  %5032 = vmatprep.subr.bf16.mxu1 %v13822_v54  ;;  %v13879_v54 = vld [vmem:[#allocation8 + $0x83c] ss:$36 sps:$4 sm:$0xff]  }
 0x230   :  { %5069 = vmatprep.subr.bf16.mxu0 %v13825_v56 }
 0x232   :  { %5033 = vmatpush1.bf16.msra.mxu1 %v13820_v59  ;;  %5070 = vmatpush1.bf16.msra.mxu0 %v13823_v60  ;;  %v13874_v60 = vld [vmem:[#allocation8 + $0x328] ss:$36 sps:$4 sm:$0xff]  }
 0x233   :  { %5034 = vmatprep.subr.bf16.mxu1 %v13828_v61  ;;  %5071 = vmatprep.subr.bf16.mxu0 %v13831_v62  ;;  %v13877_v61 = vld [vmem:[#allocation8 + $0x838] ss:$36 sps:$4 sm:$0xff]  }
 0x236   :  { %5035 = vmatpush1.bf16.msra.mxu1 %v13826_v63  ;;  %5072 = vmatpush1.bf16.msra.mxu0 %v13829_v1  ;;  %v13882_v63 = vld [vmem:[#allocation8 + $0x2e4] ss:$36 sps:$4 sm:$0xff]   ;;  %v13885_v1 = vld [vmem:[#allocation8 + $0x7f4] ss:$36 sps:$4 sm:$0xff]  }
 0x237   :  { %5036 = vmatprep.subr.bf16.mxu1 %v13834_v2  ;;  %5073 = vmatprep.subr.bf16.mxu0 %v13837_v4  ;;  %v13880_v4 = vld [vmem:[#allocation8 + $0x2e0] ss:$36 sps:$4 sm:$0xff]  }
 0x23a   :  { %5037 = vmatpush1.bf16.msra.mxu1 %v13832_v5  ;;  %5074 = vmatpush1.bf16.msra.mxu0 %v13835_v6  ;;  %v13883_v5 = vld [vmem:[#allocation8 + $0x7f0] ss:$36 sps:$4 sm:$0xff]   ;;  %v13888_v6 = vld [vmem:[#allocation8 + $0x29c] ss:$36 sps:$4 sm:$0xff]  }
 0x23b   :  { %5038 = vmatprep.subr.bf16.mxu1 %v13840_v7  ;;  %5075 = vmatprep.subr.bf16.mxu0 %v13843_v9  ;;  %v13891_v7 = vld [vmem:[#allocation8 + $0x7ac] ss:$36 sps:$4 sm:$0xff]   ;;  %v13886_v9 = vld [vmem:[#allocation8 + $0x298] ss:$36 sps:$4 sm:$0xff]  }
 0x23e   :  { %5039 = vmatpush1.bf16.msra.mxu1 %v13838_v12  ;;  %5076 = vmatpush1.bf16.msra.mxu0 %v13841_v16  ;;  %v13889_v12 = vld [vmem:[#allocation8 + $0x7a8] ss:$36 sps:$4 sm:$0xff]   ;;  %v13894_v16 = vld [vmem:[#allocation8 + $0x254] ss:$36 sps:$4 sm:$0xff]  }
 0x23f   :  { %5040 = vmatprep.subr.bf16.mxu1 %v13846_v17  ;;  %5077 = vmatprep.subr.bf16.mxu0 %v13849_v18  ;;  %v13897_v17 = vld [vmem:[#allocation8 + $0x764] ss:$36 sps:$4 sm:$0xff]   ;;  %v13892_v18 = vld [vmem:[#allocation8 + $0x250] ss:$36 sps:$4 sm:$0xff]  }
 0x242   :  { %5041 = vmatpush1.bf16.msra.mxu1 %v13844_v19  ;;  %5078 = vmatpush1.bf16.msra.mxu0 %v13847_v20  ;;  %v13895_v19 = vld [vmem:[#allocation8 + $0x760] ss:$36 sps:$4 sm:$0xff]  }
 0x243   :  { %5042 = vmatprep.subr.bf16.mxu1 %v13852_v21  ;;  %5079 = vmatprep.subr.bf16.mxu0 %v13855_v22  ;;  %v13900_v20 = vld [vmem:[#allocation8 + $0x71c] ss:$36 sps:$4 sm:$0xff]   ;;  %v13903_v21 = vld [vmem:[#allocation8 + $0xb0c] ss:$36 sps:$4 sm:$0xff]  }
 0x244   :  { %v13898_v22 = vld [vmem:[#allocation8 + $0x718] ss:$36 sps:$4 sm:$0xff]  }
 0x245   :  { %v4732_v36 = vpop.f32.mrf.mxu1 }
 0x246   :  { %v4733_v40 = vadd.f32 %v4732_v36, %v15740_v10  ;;  %5043 = vmatpush2.bf16.msra.mxu1 %v13850_v24  ;;  %5080 = vmatpush1.bf16.msra.mxu0 %v13853_v31  ;;  %v13868_v10 = vld [vmem:[#allocation8 + $0x370] ss:$36 sps:$4 sm:$0xff]   ;;  %v13901_v24 = vld [vmem:[#allocation8 + $0xb08] ss:$36 sps:$4 sm:$0xff]   ;;  %v13907_v36 = vld [vmem:[#allocation8 + $0xac0] ss:$36 sps:$4 sm:$0xff]  }
 0x247   :  { %v4734_v41 = vpop.f32.mrf.mxu1  ;;  %5044 = vmatprep.subr.bf16.mxu1 %v13858_v32  ;;  %5081 = vmatprep.subr.bf16.mxu0 %v13861_v34  ;;  %v13906_v31 = vld [vmem:[#allocation8 + $0x6d4] ss:$36 sps:$4 sm:$0xff]   ;;  %v13909_v32 = vld [vmem:[#allocation8 + $0xac4] ss:$36 sps:$4 sm:$0xff]  }
 0x248   :  { %v4735_v44 = vadd.f32 %v4734_v41, %v15742_v14  ;;  %v13904_v34 = vld [vmem:[#allocation8 + $0x6d0] ss:$36 sps:$4 sm:$0xff]  }
 0x249   :  { %v4736_v28 = vpop.f32.mrf.mxu1 }
 0x24a   :  { %5045 = vmatpush2.bf16.msra.mxu1 %v13856_v37  ;;  %5082 = vmatpush1.bf16.msra.mxu0 %v13859_v39  ;;  %v13912_v39 = vld [vmem:[#allocation8 + $0xa7c] ss:$36 sps:$4 sm:$0xff]   ;;  %v13918_v28 = vld [vmem:[#allocation8 + $0xa34] ss:$36 sps:$4 sm:$0xff]  }
 0x24b   :  { %v4737_v51 = vpop.f32.mrf.mxu1  ;;  %5046 = vmatprep.subr.bf16.mxu1 %v13864_v27  ;;  %5083 = vmatprep.subr.bf16.mxu0 %v13867_v42 }
 0x24c   :  { %v13919_v51 = vld [vmem:[#allocation8 + $0xf40] ss:$36 sps:$4 sm:$0xff]  }
 0x24d   :  { %v4773_v53 = vpop.f32.mrf.mxu0 }
 0x24e   :  { %v4774_v56 = vadd.f32 %v4773_v53, %v4733_v40  ;;  %5047 = vmatpush2.bf16.msra.mxu1 %v13862_v11  ;;  %5084 = vmatpush2.bf16.msra.mxu0 %v13865_v46  ;;  %v13915_v40 = vld [vmem:[#allocation8 + $0xf8c] ss:$36 sps:$4 sm:$0xff]   ;;  %v13927_v53 = vld [vmem:[#allocation8 + $0xefc] ss:$36 sps:$4 sm:$0xff]  }
 0x24f   :  { %v4775_v59 = vpop.f32.mrf.mxu0  ;;  %5048 = vmatprep.subr.bf16.mxu1 %v13870_v49  ;;  %5085 = vmatprep.subr.bf16.mxu0 %v13873_v50  ;;  %v13913_v46 = vld [vmem:[#allocation8 + $0xf88] ss:$36 sps:$4 sm:$0xff]   ;;  %v13916_v50 = vld [vmem:[#allocation8 + $0xa30] ss:$36 sps:$4 sm:$0xff]  }
 0x250   :  { %v4776_v14 = vadd.f32 %v4775_v59, %v4735_v44  ;;  %v13910_v44 = vld [vmem:[#allocation8 + $0xa78] ss:$36 sps:$4 sm:$0xff]  }
 0x251   :  { %v4777_v62 = vpop.f32.mrf.mxu0  ;;  %v13933_v59 = vld [vmem:[#allocation8 + $0xeb4] ss:$36 sps:$4 sm:$0xff]  }
 0x252   :  { %5049 = vmatpush2.bf16.msra.mxu1 %v13868_v10  ;;  %5086 = vmatpush2.bf16.msra.mxu0 %v13871_v52  ;;  %v13921_v10 = vld [vmem:[#allocation8 + $0xf44] ss:$36 sps:$4 sm:$0xff]   ;;  %v13924_v52 = vld [vmem:[#allocation8 + $0x9ec] ss:$36 sps:$4 sm:$0xff]  }
 0x253   :  { %5050 = vmatprep.subr.bf16.mxu1 %v13876_v55  ;;  %5087 = vmatprep.subr.bf16.mxu0 %v13879_v54  ;;  %v4778_v2 = vpop.f32.mrf.mxu0  ;;  %v13922_v55 = vld [vmem:[#allocation8 + $0x9e8] ss:$36 sps:$4 sm:$0xff]   ;;  %v13925_v54 = vld [vmem:[#allocation8 + $0xef8] ss:$36 sps:$4 sm:$0xff]  }
 0x254   :  { %v13939_v62 = vld [vmem:[#allocation8 + $0xe6c] ss:$36 sps:$4 sm:$0xff]   ;;  %v13942_v2 = vld [vmem:[#allocation8 + $0x914] ss:$36 sps:$4 sm:$0xff]  }
 0x256   :  { %5051 = vmatpush2.bf16.msra.mxu1 %v13874_v60  ;;  %5088 = vmatpush2.bf16.msra.mxu0 %v13877_v61  ;;  %v13931_v60 = vld [vmem:[#allocation8 + $0xeb0] ss:$36 sps:$4 sm:$0xff]   ;;  %v13936_v61 = vld [vmem:[#allocation8 + $0x95c] ss:$36 sps:$4 sm:$0xff]  }
 0x257   :  { %5052 = vmatprep.subr.bf16.mxu1 %v13882_v63  ;;  %5089 = vmatprep.subr.bf16.mxu0 %v13885_v1  ;;  %v13934_v63 = vld [vmem:[#allocation8 + $0x958] ss:$36 sps:$4 sm:$0xff]   ;;  %v13937_v1 = vld [vmem:[#allocation8 + $0xe68] ss:$36 sps:$4 sm:$0xff]  }
 0x25a   :  { %5053 = vmatpush2.bf16.msra.mxu1 %v13880_v4  ;;  %5090 = vmatpush2.bf16.msra.mxu0 %v13883_v5  ;;  %v13945_v4 = vld [vmem:[#allocation8 + $0xe24] ss:$36 sps:$4 sm:$0xff]   ;;  %v13940_v5 = vld [vmem:[#allocation8 + $0x910] ss:$36 sps:$4 sm:$0xff]  }
 0x25b   :  { %5054 = vmatprep.subr.bf16.mxu1 %v13888_v6  ;;  %5091 = vmatprep.subr.bf16.mxu0 %v13891_v7  ;;  %v13943_v6 = vld [vmem:[#allocation8 + $0xe20] ss:$36 sps:$4 sm:$0xff]   ;;  %v13948_v7 = vld [vmem:[#allocation8 + $0xd4c] ss:$36 sps:$4 sm:$0xff]  }
 0x25e   :  { %5055 = vmatpush2.bf16.msra.mxu1 %v13886_v9  ;;  %5092 = vmatpush2.bf16.msra.mxu0 %v13889_v12  ;;  %v13951_v9 = vld [vmem:[#allocation8 + $0xddc] ss:$36 sps:$4 sm:$0xff]   ;;  %v13946_v12 = vld [vmem:[#allocation8 + $0xd48] ss:$36 sps:$4 sm:$0xff]  }
 0x25f   :  { %5056 = vmatprep.subr.bf16.mxu1 %v13894_v16  ;;  %5093 = vmatprep.subr.bf16.mxu0 %v13897_v17  ;;  %v13949_v16 = vld [vmem:[#allocation8 + $0xdd8] ss:$36 sps:$4 sm:$0xff]   ;;  %v13954_v17 = vld [vmem:[#allocation8 + $0xd04] ss:$36 sps:$4 sm:$0xff]  }
 0x262   :  { %5057 = vmatpush2.bf16.msra.mxu1 %v13892_v18  ;;  %5094 = vmatpush2.bf16.msra.mxu0 %v13895_v19  ;;  %v13957_v18 = vld [vmem:[#allocation8 + $0xd94] ss:$36 sps:$4 sm:$0xff]   ;;  %v13952_v19 = vld [vmem:[#allocation8 + $0xd00] ss:$36 sps:$4 sm:$0xff]  }
 0x263   :  { %5095 = vmatprep.subr.bf16.mxu0 %v13900_v20  ;;  %5108 = vmatprep.subr.bf16.mxu1 %v13903_v21  ;;  %v13955_v20 = vld [vmem:[#allocation8 + $0xd90] ss:$36 sps:$4 sm:$0xff]   ;;  %v13960_v21 = vld [vmem:[#allocation8 + $0xcbc] ss:$36 sps:$4 sm:$0xff]  }
 0x265   :  { %v4814_v37 = vpop.f32.mrf.mxu1  ;;  %5059 = vmatmul.mubr.bf16.vlgmr.msra.gmra.mxu1 %v15679_v48 }
 0x266   :  { %v15752_v41 = vadd.f32 %v4814_v37, %v4774_v56  ;;  %5096 = vmatpush2.bf16.msra.mxu0 %v13898_v22  ;;  %5109 = vmatpush1.bf16.msra.mxu1 %v13901_v24  ;;  %v13930_v56 = vld [vmem:[#allocation8 + $0x9a4] ss:$36 sps:$4 sm:$0xff]   ;;  %v13963_v22 = vld [vmem:[#allocation8 + $0x11cc] ss:$36 sps:$4 sm:$0xff]   ;;  %v13958_v24 = vld [vmem:[#allocation8 + $0xcb8] ss:$36 sps:$4 sm:$0xff]  }
 0x267   :  { %5140 = vmatprep.mubr.bf16.mxu1 %v15703_v26  ;;  %v4816_v27 = vpop.f32.mrf.mxu1  ;;  %5097 = vmatprep.subr.bf16.mxu0 %v13906_v31  ;;  %v13961_v31 = vld [vmem:[#allocation8 + $0x11c8] ss:$36 sps:$4 sm:$0xff]   ;;  %v13964_v37 = vld [vmem:[#allocation8 + $0xc70] ss:$36 sps:$4 sm:$0xff]  }
 0x268   :  { %v15755_v42 = vadd.f32 %v4816_v27, %v4776_v14  ;;  %5110 = vmatprep.subr.bf16.mxu1 %v13909_v32  ;;  %v13928_v14 = vld [vmem:[#allocation8 + $0x9a0] ss:$36 sps:$4 sm:$0xff]   ;;  %v13966_v32 = vld [vmem:[#allocation8 + $0xc74] ss:$36 sps:$4 sm:$0xff]   ;;  %v13972_v27 = vld [vmem:[#allocation8 + $0xc2c] ss:$36 sps:$4 sm:$0xff]  }
 0x269   :  { %v4818_v11 = vpop.f32.mrf.mxu1 }
 0x26a   :  { %5098 = vmatpush2.bf16.msra.mxu0 %v13904_v34  ;;  %5111 = vmatpush1.bf16.msra.mxu1 %v13907_v36  ;;  %v13969_v34 = vld [vmem:[#allocation8 + $0x1184] ss:$36 sps:$4 sm:$0xff]  }
 0x26b   :  { %v4819_v49 = vpop.f32.mrf.mxu1  ;;  %5112 = vmatprep.subr.bf16.mxu1 %v13912_v39  ;;  %5149 = vmatprep.subr.bf16.mxu0 %v13915_v40  ;;  %v13967_v39 = vld [vmem:[#allocation8 + $0x1180] ss:$36 sps:$4 sm:$0xff]  }
 0x26d   :  { %5100 = vmatmul.mubr.bf16.vlgmr.msra.gmra.mxu0 %v15690_v3 }
 0x26e   :  { %5113 = vmatpush1.bf16.msra.mxu1 %v13910_v44  ;;  %5150 = vmatpush1.bf16.msra.mxu0 %v13913_v46  ;;  %v13975_v44 = vld [vmem:[#allocation8 + $0x113c] ss:$36 sps:$4 sm:$0xff]   ;;  %v13970_v46 = vld [vmem:[#allocation8 + $0xc28] ss:$36 sps:$4 sm:$0xff]  }
 0x26f   :  { %5181 = vmatprep.mubr.bf16.mxu0 %v15699_v13  ;;  %5114 = vmatprep.subr.bf16.mxu1 %v13918_v28  ;;  %v13973_v28 = vld [vmem:[#allocation8 + $0x1138] ss:$36 sps:$4 sm:$0xff]  }
 0x270   :  { %5151 = vmatprep.subr.bf16.mxu0 %v13921_v10  ;;  %v13976_v10 = vld [vmem:[#allocation8 + $0xbe0] ss:$36 sps:$4 sm:$0xff]  }
 0x272   :  { %5115 = vmatpush1.bf16.msra.mxu1 %v13916_v50  ;;  %5152 = vmatpush1.bf16.msra.mxu0 %v13919_v51  ;;  %v13978_v50 = vld [vmem:[#allocation8 + $0xbe4] ss:$36 sps:$4 sm:$0xff]   ;;  %v13981_v51 = vld [vmem:[#allocation8 + $0x10f4] ss:$36 sps:$4 sm:$0xff]  }
 0x273   :  { %5116 = vmatprep.subr.bf16.mxu1 %v13924_v52  ;;  %5153 = vmatprep.subr.bf16.mxu0 %v13927_v53  ;;  %v13979_v52 = vld [vmem:[#allocation8 + $0x10f0] ss:$36 sps:$4 sm:$0xff]   ;;  %v13984_v53 = vld [vmem:[#allocation8 + $0xb9c] ss:$36 sps:$4 sm:$0xff]  }
 0x276   :  { %5117 = vmatpush1.bf16.msra.mxu1 %v13922_v55  ;;  %5154 = vmatpush1.bf16.msra.mxu0 %v13925_v54  ;;  %v13987_v55 = vld [vmem:[#allocation8 + $0x10ac] ss:$36 sps:$4 sm:$0xff]   ;;  %v13982_v54 = vld [vmem:[#allocation8 + $0xb98] ss:$36 sps:$4 sm:$0xff]  }
 0x277   :  { %5118 = vmatprep.subr.bf16.mxu1 %v13930_v56  ;;  %5155 = vmatprep.subr.bf16.mxu0 %v13933_v59  ;;  %v13985_v56 = vld [vmem:[#allocation8 + $0x10a8] ss:$36 sps:$4 sm:$0xff]   ;;  %v13990_v59 = vld [vmem:[#allocation8 + $0xb54] ss:$36 sps:$4 sm:$0xff]  }
 0x27a   :  { %5119 = vmatpush1.bf16.msra.mxu1 %v13928_v14  ;;  %5156 = vmatpush1.bf16.msra.mxu0 %v13931_v60  ;;  %v13993_v14 = vld [vmem:[#allocation8 + $0x1064] ss:$36 sps:$4 sm:$0xff]   ;;  %v13988_v60 = vld [vmem:[#allocation8 + $0xb50] ss:$36 sps:$4 sm:$0xff]  }
 0x27b   :  { %5120 = vmatprep.subr.bf16.mxu1 %v13936_v61  ;;  %5157 = vmatprep.subr.bf16.mxu0 %v13939_v62  ;;  %v13991_v61 = vld [vmem:[#allocation8 + $0x1060] ss:$36 sps:$4 sm:$0xff]  }
 0x27c   :  { %v13996_v62 = vld [vmem:[#allocation8 + $0x101c] ss:$36 sps:$4 sm:$0xff]  }
 0x27e   :  { %5121 = vmatpush1.bf16.msra.mxu1 %v13934_v63  ;;  %5158 = vmatpush1.bf16.msra.mxu0 %v13937_v1  ;;  %v13999_v63 = vld [vmem:[#allocation8 + $0x140c] ss:$36 sps:$4 sm:$0xff]   ;;  %v15320_v1 = vld [vmem:[#allocation10] sm:$0xff] }
 0x27f   :  { %5122 = vmatprep.subr.bf16.mxu1 %v13942_v2  ;;  %5159 = vmatprep.subr.bf16.mxu0 %v13945_v4  ;;  %v1270_v2 = vrot.slane %v15320_v1, %v15665_v35  ;;  %v13994_v4 = vld [vmem:[#allocation8 + $0x1018] ss:$36 sps:$4 sm:$0xff]  }
 0x282   :  { %5123 = vmatpush1.bf16.msra.mxu1 %v13940_v5  ;;  %5160 = vmatpush1.bf16.msra.mxu0 %v13943_v6  ;;  %v13997_v5 = vld [vmem:[#allocation8 + $0x1408] ss:$36 sps:$4 sm:$0xff]   ;;  %v14002_v6 = vld [vmem:[#allocation8 + $0xfd4] ss:$36 sps:$4 sm:$0xff]  }
 0x283   :  { %5124 = vmatprep.subr.bf16.mxu1 %v13948_v7  ;;  %5161 = vmatprep.subr.bf16.mxu0 %v13951_v9  ;;  %v14005_v7 = vld [vmem:[#allocation8 + $0x13c4] ss:$36 sps:$4 sm:$0xff]   ;;  %v1274_v9 = vrot.slane %v15320_v1, %v15668_v38 }
 0x284   :  { %v14042_v1 = vld [vmem:[#allocation8 + $0x60] ss:$36 sps:$4 sm:$0xff]  }
 0x286   :  { %5125 = vmatpush2.bf16.msra.mxu1 %v13946_v12  ;;  %5162 = vmatpush1.bf16.msra.mxu0 %v13949_v16  ;;  %v14000_v16 = vld [vmem:[#allocation8 + $0xfd0] ss:$36 sps:$4 sm:$0xff]  }
 0x287   :  { %5126 = vmatprep.subr.bf16.mxu1 %v13954_v17  ;;  %5163 = vmatprep.subr.bf16.mxu0 %v13957_v18  ;;  %v14003_v17 = vld [vmem:[#allocation8 + $0x13c0] ss:$36 sps:$4 sm:$0xff]  }
 0x28a   :  { %5127 = vmatpush2.bf16.msra.mxu1 %v13952_v19  ;;  %5164 = vmatpush1.bf16.msra.mxu0 %v13955_v20  ;;  %v14008_v19 = vld [vmem:[#allocation8 + $0x137c] ss:$36 sps:$4 sm:$0xff]   ;;  %v14011_v20 = vld [vmem:[#allocation8 + $0x214] ss:$36 sps:$4 sm:$0xff]  }
 0x28b   :  { %5128 = vmatprep.subr.bf16.mxu1 %v13960_v21  ;;  %5165 = vmatprep.subr.bf16.mxu0 %v13963_v22 }
 0x28d   :  { %v4855_v36 = vpop.f32.mrf.mxu0 }
 0x28e   :  { %5129 = vmatpush2.bf16.msra.mxu1 %v13958_v24  ;;  %5166 = vmatpush2.bf16.msra.mxu0 %v13961_v31  ;;  %v4856_v12 = vadd.f32 %v4855_v36, %v1270_v2  ;;  %v14009_v36 = vld [vmem:[#allocation8 + $0x210] ss:$36 sps:$4 sm:$0xff]  }
 0x28f   :  { %v4857_v40 = vpop.f32.mrf.mxu0  ;;  %5130 = vmatprep.subr.bf16.mxu1 %v13966_v32  ;;  %5167 = vmatprep.subr.bf16.mxu0 %v13969_v34  ;;  %v14006_v32 = vld [vmem:[#allocation8 + $0x1378] ss:$36 sps:$4 sm:$0xff]   ;;  %v14045_v2 = vld [vmem:[#allocation8 + $0x690] ss:$36 sps:$4 sm:$0xff]  }
 0x290   :  { %v4858_v21 = vadd.f32 %v4857_v40, %v1274_v9  ;;  %v14012_v40 = vld [vmem:[#allocation8 + $0x1330] ss:$36 sps:$4 sm:$0xff]  }
 0x291   :  { %v4859_v11 = vpop.f32.mrf.mxu0  ;;  %v14056_v9 = vld [vmem:[#allocation8 + $0x454] ss:$36 sps:$4 sm:$0xff]  }
 0x292   :  { %5131 = vmatpush2.bf16.msra.mxu1 %v13964_v37  ;;  %5168 = vmatpush2.bf16.msra.mxu0 %v13967_v39  ;;  %v14014_v37 = vld [vmem:[#allocation8 + $0x1334] ss:$36 sps:$4 sm:$0xff]   ;;  %v14020_v11 = vld [vmem:[#allocation8 + $0x12ec] ss:$36 sps:$4 sm:$0xff]  }
 0x293   :  { %v4860_v49 = vpop.f32.mrf.mxu0  ;;  %5132 = vmatprep.subr.bf16.mxu1 %v13972_v27  ;;  %5169 = vmatprep.subr.bf16.mxu0 %v13975_v44  ;;  %v14015_v27 = vld [vmem:[#allocation8 + $0x1c8] ss:$36 sps:$4 sm:$0xff]  }
 0x294   :  { %v14017_v44 = vld [vmem:[#allocation8 + $0x1cc] ss:$36 sps:$4 sm:$0xff]   ;;  %v14021_v49 = vld [vmem:[#allocation8 + $0x180] ss:$36 sps:$4 sm:$0xff]  }
 0x296   :  { %5133 = vmatpush2.bf16.msra.mxu1 %v13970_v46  ;;  %5170 = vmatpush2.bf16.msra.mxu0 %v13973_v28  ;;  %v14023_v46 = vld [vmem:[#allocation8 + $0x184] ss:$36 sps:$4 sm:$0xff]  }
 0x297   :  { %5134 = vmatprep.subr.bf16.mxu1 %v13978_v50  ;;  %5171 = vmatprep.subr.bf16.mxu0 %v13981_v51  ;;  %v14018_v28 = vld [vmem:[#allocation8 + $0x12e8] ss:$36 sps:$4 sm:$0xff]   ;;  %v14029_v51 = vld [vmem:[#allocation8 + $0x13c] ss:$36 sps:$4 sm:$0xff]  }
 0x298   :  { %v14026_v50 = vld [vmem:[#allocation8 + $0x12a4] ss:$36 sps:$4 sm:$0xff]  }
 0x29a   :  { %5135 = vmatpush2.bf16.msra.mxu1 %v13976_v10  ;;  %5172 = vmatpush2.bf16.msra.mxu0 %v13979_v52  ;;  %v14024_v10 = vld [vmem:[#allocation8 + $0x12a0] ss:$36 sps:$4 sm:$0xff]   ;;  %v14027_v52 = vld [vmem:[#allocation8 + $0x138] ss:$36 sps:$4 sm:$0xff]  }
 0x29b   :  { %5136 = vmatprep.subr.bf16.mxu1 %v13984_v53  ;;  %5173 = vmatprep.subr.bf16.mxu0 %v13987_v55  ;;  %v14032_v53 = vld [vmem:[#allocation8 + $0x125c] ss:$36 sps:$4 sm:$0xff]   ;;  %v14035_v55 = vld [vmem:[#allocation8 + $0xf4] ss:$36 sps:$4 sm:$0xff]  }
 0x29e   :  { %5137 = vmatpush2.bf16.msra.mxu1 %v13982_v54  ;;  %5174 = vmatpush2.bf16.msra.mxu0 %v13985_v56  ;;  %v14030_v54 = vld [vmem:[#allocation8 + $0x1258] ss:$36 sps:$4 sm:$0xff]   ;;  %v14033_v56 = vld [vmem:[#allocation8 + $0xf0] ss:$36 sps:$4 sm:$0xff]  }
 0x29f   :  { %5138 = vmatprep.subr.bf16.mxu1 %v13990_v59  ;;  %5175 = vmatprep.subr.bf16.mxu0 %v13993_v14  ;;  %v14038_v59 = vld [vmem:[#allocation8 + $0x1214] ss:$36 sps:$4 sm:$0xff]   ;;  %v14041_v14 = vld [vmem:[#allocation8 + $0xac] ss:$36 sps:$4 sm:$0xff]  }
 0x2a2   :  { %5139 = vmatpush2.bf16.msra.mxu1 %v13988_v60  ;;  %5176 = vmatpush2.bf16.msra.mxu0 %v13991_v61  ;;  %v14036_v60 = vld [vmem:[#allocation8 + $0x1210] ss:$36 sps:$4 sm:$0xff]   ;;  %v14039_v61 = vld [vmem:[#allocation8 + $0xa8] ss:$36 sps:$4 sm:$0xff]  }
 0x2a3   :  { %5177 = vmatprep.subr.bf16.mxu0 %v13996_v62  ;;  %5190 = vmatprep.subr.bf16.mxu1 %v13999_v63  ;;  %v14044_v62 = vld [vmem:[#allocation8 + $0x64] ss:$36 sps:$4 sm:$0xff]   ;;  %v14047_v63 = vld [vmem:[#allocation8 + $0x694] ss:$36 sps:$4 sm:$0xff]  }
 0x2a5   :  { %v4896_v18 = vpop.f32.mrf.mxu1  ;;  %5141 = vmatmul.mubr.bf16.vlgmr.msra.gmra.mxu1 %v15720_v47 }
 0x2a6   :  { %v15762_v22 = vadd.f32 %v4896_v18, %v4856_v12  ;;  %5178 = vmatpush2.bf16.msra.mxu0 %v13994_v4  ;;  %5191 = vmatpush1.bf16.msra.mxu1 %v13997_v5  ;;  %v14050_v4 = vld [vmem:[#allocation8 + $0x1c] ss:$36 sps:$4 sm:$0xff]   ;;  %v14053_v5 = vld [vmem:[#allocation8 + $0x64c] ss:$36 sps:$4 sm:$0xff]   ;;  %v14059_v12 = vld [vmem:[#allocation8 + $0x604] ss:$36 sps:$4 sm:$0xff]  }
 0x2a7   :  { %v4898_v24 = vpop.f32.mrf.mxu1  ;;  %5179 = vmatprep.subr.bf16.mxu0 %v14002_v6  ;;  %5192 = vmatprep.subr.bf16.mxu1 %v14005_v7  ;;  %v14048_v6 = vld [vmem:[#allocation8 + $0x18] ss:$36 sps:$4 sm:$0xff]   ;;  %v14051_v7 = vld [vmem:[#allocation8 + $0x648] ss:$36 sps:$4 sm:$0xff]  }
 0x2a8   :  { %v15764_v31 = vadd.f32 %v4898_v24, %v4858_v21  ;;  %5222 = vmatprep.mubr.bf16.mxu1 %v15549_v0  ;;  %v14062_v18 = vld [vmem:[#allocation8 + $0x40c] ss:$36 sps:$4 sm:$0xff]   ;;  %v14063_v24 = vld [vmem:[#allocation8 + $0x5b8] ss:$36 sps:$4 sm:$0xff]  }
 0x2a9   :  { %v4900_v34 = vpop.f32.mrf.mxu1  ;;  %v14060_v21 = vld [vmem:[#allocation8 + $0x408] ss:$36 sps:$4 sm:$0xff]  }
 0x2aa   :  { %5180 = vmatpush2.bf16.msra.mxu0 %v14000_v16  ;;  %5193 = vmatpush1.bf16.msra.mxu1 %v14003_v17  ;;  %v14054_v16 = vld [vmem:[#allocation8 + $0x450] ss:$36 sps:$4 sm:$0xff]   ;;  %v14057_v17 = vld [vmem:[#allocation8 + $0x600] ss:$36 sps:$4 sm:$0xff]  }
 0x2ab   :  { %v4901_v39 = vpop.f32.mrf.mxu1  ;;  %5194 = vmatprep.subr.bf16.mxu1 %v14008_v19  ;;  %5231 = vmatprep.subr.bf16.mxu0 %v14011_v20  ;;  %v14065_v19 = vld [vmem:[#allocation8 + $0x5bc] ss:$36 sps:$4 sm:$0xff]  }
 0x2ad   :  { %5182 = vmatmul.mubr.bf16.vlgmr.msra.gmra.mxu0 %v15724_v57 }
 0x2ae   :  { %5195 = vmatpush1.bf16.msra.mxu1 %v14006_v32  ;;  %5232 = vmatpush1.bf16.msra.mxu0 %v14009_v36  ;;  %v14068_v36 = vld [vmem:[#allocation8 + $0x3c4] ss:$36 sps:$4 sm:$0xff]  }
 0x2af   :  { %5263 = vmatprep.mubr.bf16.mxu0 %v15675_v45  ;;  %5196 = vmatprep.subr.bf16.mxu1 %v14014_v37  ;;  %v14071_v37 = vld [vmem:[#allocation8 + $0x574] ss:$36 sps:$4 sm:$0xff]  }
 0x2b0   :  { %5233 = vmatprep.subr.bf16.mxu0 %v14017_v44  ;;  %v14069_v44 = vld [vmem:[#allocation8 + $0x570] ss:$36 sps:$4 sm:$0xff]  }
 0x2b2   :  { %5197 = vmatpush1.bf16.msra.mxu1 %v14012_v40  ;;  %5234 = vmatpush1.bf16.msra.mxu0 %v14015_v27  ;;  %v14066_v27 = vld [vmem:[#allocation8 + $0x3c0] ss:$36 sps:$4 sm:$0xff]  }
 0x2b3   :  { %5198 = vmatprep.subr.bf16.mxu1 %v14020_v11  ;;  %5235 = vmatprep.subr.bf16.mxu0 %v14023_v46  ;;  %v14074_v46 = vld [vmem:[#allocation8 + $0x37c] ss:$36 sps:$4 sm:$0xff]  }
 0x2b6   :  { %5199 = vmatpush1.bf16.msra.mxu1 %v14018_v28  ;;  %5236 = vmatpush1.bf16.msra.mxu0 %v14021_v49  ;;  %v14077_v28 = vld [vmem:[#allocation8 + $0x52c] ss:$36 sps:$4 sm:$0xff]  }
 0x2b7   :  { %5200 = vmatprep.subr.bf16.mxu1 %v14026_v50  ;;  %5237 = vmatprep.subr.bf16.mxu0 %v14029_v51  ;;  %v14075_v49 = vld [vmem:[#allocation8 + $0x528] ss:$36 sps:$4 sm:$0xff]   ;;  %v14080_v50 = vld [vmem:[#allocation8 + $0x334] ss:$36 sps:$4 sm:$0xff]  }
 0x2b8   :  { %v14083_v51 = vld [vmem:[#allocation8 + $0x4e4] ss:$36 sps:$4 sm:$0xff]  }
 0x2ba   :  { %5201 = vmatpush1.bf16.msra.mxu1 %v14024_v10  ;;  %5238 = vmatpush1.bf16.msra.mxu0 %v14027_v52  ;;  %v14078_v10 = vld [vmem:[#allocation8 + $0x330] ss:$36 sps:$4 sm:$0xff]  }
 0x2bb   :  { %5202 = vmatprep.subr.bf16.mxu1 %v14032_v53  ;;  %5239 = vmatprep.subr.bf16.mxu0 %v14035_v55  ;;  %v14086_v52 = vld [vmem:[#allocation8 + $0x2ec] ss:$36 sps:$4 sm:$0xff]   ;;  %v14089_v53 = vld [vmem:[#allocation8 + $0x49c] ss:$36 sps:$4 sm:$0xff]  }
 0x2bc   :  { %v14084_v55 = vld [vmem:[#allocation8 + $0x2e8] ss:$36 sps:$4 sm:$0xff]  }
 0x2be   :  { %5203 = vmatpush1.bf16.msra.mxu1 %v14030_v54  ;;  %5240 = vmatpush1.bf16.msra.mxu0 %v14033_v56  ;;  %v14087_v54 = vld [vmem:[#allocation8 + $0x498] ss:$36 sps:$4 sm:$0xff]   ;;  %v14092_v56 = vld [vmem:[#allocation8 + $0x2a4] ss:$36 sps:$4 sm:$0xff]  }
 0x2bf   :  { %5204 = vmatprep.subr.bf16.mxu1 %v14038_v59  ;;  %5241 = vmatprep.subr.bf16.mxu0 %v14041_v14  ;;  %v14095_v59 = vld [vmem:[#allocation8 + $0x8d4] ss:$36 sps:$4 sm:$0xff]   ;;  %v14090_v14 = vld [vmem:[#allocation8 + $0x2a0] ss:$36 sps:$4 sm:$0xff]  }
 0x2c2   :  { %5205 = vmatpush1.bf16.msra.mxu1 %v14036_v60  ;;  %5242 = vmatpush1.bf16.msra.mxu0 %v14039_v61  ;;  %v14093_v60 = vld [vmem:[#allocation8 + $0x8d0] ss:$36 sps:$4 sm:$0xff]   ;;  %v14098_v61 = vld [vmem:[#allocation8 + $0x25c] ss:$36 sps:$4 sm:$0xff]  }
 0x2c3   :  { %5243 = vmatprep.subr.bf16.mxu0 %v14044_v62  ;;  %5272 = vmatprep.subr.bf16.mxu1 %v14047_v63  ;;  %v14101_v62 = vld [vmem:[#allocation8 + $0x88c] ss:$36 sps:$4 sm:$0xff]   ;;  %v14096_v63 = vld [vmem:[#allocation8 + $0x258] ss:$36 sps:$4 sm:$0xff]  }
 0x2c5   :  { %5223 = vmatmul.mubr.bf16.vlgmr.msra.gmra.mxu1 %v15729_v33 }
 0x2c6   :  { %5244 = vmatpush1.bf16.msra.mxu0 %v14042_v1  ;;  %5273 = vmatpush1.bf16.msra.mxu1 %v14045_v2  ;;  %v14099_v1 = vld [vmem:[#allocation8 + $0x888] ss:$36 sps:$4 sm:$0xff]  }
 0x2c7   :  { %5304 = vmatprep.mubr.bf16.mxu1 %v15692_v8  ;;  %5245 = vmatprep.subr.bf16.mxu0 %v14050_v4  ;;  %v14104_v4 = vld [vmem:[#allocation8 + $0x844] ss:$36 sps:$4 sm:$0xff]  }
 0x2c8   :  { %5274 = vmatprep.subr.bf16.mxu1 %v14053_v5  ;;  %v14107_v5 = vld [vmem:[#allocation8 + $0xb14] ss:$36 sps:$4 sm:$0xff]  }
 0x2ca   :  { %5246 = vmatpush1.bf16.msra.mxu0 %v14048_v6  ;;  %5275 = vmatpush1.bf16.msra.mxu1 %v14051_v7 }
 0x2cb   :  { %5247 = vmatprep.subr.bf16.mxu0 %v14056_v9  ;;  %5276 = vmatprep.subr.bf16.mxu1 %v14059_v12  ;;  %v14102_v12 = vld [vmem:[#allocation8 + $0x840] ss:$36 sps:$4 sm:$0xff]  }
 0x2cd   :  { %v4937_v20 = vpop.f32.mrf.mxu0 }
 0x2ce   :  { %v4938_v32 = vadd.f32 %v4937_v20, %v15762_v22  ;;  %5248 = vmatpush2.bf16.msra.mxu0 %v14054_v16  ;;  %5277 = vmatpush1.bf16.msra.mxu1 %v14057_v17  ;;  %v14072_v22 = vld [vmem:[#allocation8 + $0x378] ss:$36 sps:$4 sm:$0xff]   ;;  %v14105_v17 = vld [vmem:[#allocation8 + $0xb10] ss:$36 sps:$4 sm:$0xff]  }
 0x2cf   :  { %v4939_v34 = vpop.f32.mrf.mxu0  ;;  %5249 = vmatprep.subr.bf16.mxu0 %v14062_v18  ;;  %5278 = vmatprep.subr.bf16.mxu1 %v14065_v19  ;;  %v14110_v18 = vld [vmem:[#allocation8 + $0x7fc] ss:$36 sps:$4 sm:$0xff]   ;;  %v14113_v19 = vld [vmem:[#allocation8 + $0xacc] ss:$36 sps:$4 sm:$0xff]  }
 0x2d0   :  { %v4940_v39 = vadd.f32 %v4939_v34, %v15764_v31  ;;  %v14081_v31 = vld [vmem:[#allocation8 + $0x4e0] ss:$36 sps:$4 sm:$0xff]  }
 0x2d1   :  { %v4941_v40 = vpop.f32.mrf.mxu0 }
 0x2d2   :  { %5250 = vmatpush2.bf16.msra.mxu0 %v14060_v21  ;;  %5279 = vmatpush1.bf16.msra.mxu1 %v14063_v24  ;;  %v14108_v21 = vld [vmem:[#allocation8 + $0x7f8] ss:$36 sps:$4 sm:$0xff]   ;;  %v14111_v24 = vld [vmem:[#allocation8 + $0xac8] ss:$36 sps:$4 sm:$0xff]  }
 0x2d3   :  { %v4942_v11 = vpop.f32.mrf.mxu0  ;;  %5251 = vmatprep.subr.bf16.mxu0 %v14068_v36  ;;  %5280 = vmatprep.subr.bf16.mxu1 %v14071_v37  ;;  %v14119_v36 = vld [vmem:[#allocation8 + $0xa84] ss:$36 sps:$4 sm:$0xff]  }
 0x2d4   :  { %v14117_v11 = vld [vmem:[#allocation8 + $0xa80] ss:$36 sps:$4 sm:$0xff]  }
 0x2d6   :  { %5252 = vmatpush2.bf16.msra.mxu0 %v14066_v27  ;;  %5281 = vmatpush1.bf16.msra.mxu1 %v14069_v44  ;;  %v14114_v44 = vld [vmem:[#allocation8 + $0x7b0] ss:$36 sps:$4 sm:$0xff]  }
 0x2d7   :  { %5253 = vmatprep.subr.bf16.mxu0 %v14074_v46  ;;  %5282 = vmatprep.subr.bf16.mxu1 %v14077_v28  ;;  %v14122_v28 = vld [vmem:[#allocation8 + $0x76c] ss:$36 sps:$4 sm:$0xff]  }
 0x2da   :  { %5254 = vmatpush2.bf16.msra.mxu0 %v14072_v22  ;;  %5283 = vmatpush1.bf16.msra.mxu1 %v14075_v49  ;;  %v14125_v22 = vld [vmem:[#allocation8 + $0xa3c] ss:$36 sps:$4 sm:$0xff]   ;;  %v14120_v49 = vld [vmem:[#allocation8 + $0x768] ss:$36 sps:$4 sm:$0xff]  }
 0x2db   :  { %5255 = vmatprep.subr.bf16.mxu0 %v14080_v50  ;;  %5284 = vmatprep.subr.bf16.mxu1 %v14083_v51  ;;  %v14123_v50 = vld [vmem:[#allocation8 + $0xa38] ss:$36 sps:$4 sm:$0xff]   ;;  %v14128_v51 = vld [vmem:[#allocation8 + $0x724] ss:$36 sps:$4 sm:$0xff]  }
 0x2de   :  { %5256 = vmatpush2.bf16.msra.mxu0 %v14078_v10  ;;  %5285 = vmatpush1.bf16.msra.mxu1 %v14081_v31  ;;  %v14131_v10 = vld [vmem:[#allocation8 + $0x9f4] ss:$36 sps:$4 sm:$0xff]   ;;  %v14126_v31 = vld [vmem:[#allocation8 + $0x720] ss:$36 sps:$4 sm:$0xff]  }
 0x2df   :  { %5257 = vmatprep.subr.bf16.mxu0 %v14086_v52  ;;  %5286 = vmatprep.subr.bf16.mxu1 %v14089_v53  ;;  %v14129_v52 = vld [vmem:[#allocation8 + $0x9f0] ss:$36 sps:$4 sm:$0xff]   ;;  %v14134_v53 = vld [vmem:[#allocation8 + $0x6dc] ss:$36 sps:$4 sm:$0xff]  }
 0x2e2   :  { %5258 = vmatpush2.bf16.msra.mxu0 %v14084_v55  ;;  %5287 = vmatpush1.bf16.msra.mxu1 %v14087_v54  ;;  %v14137_v55 = vld [vmem:[#allocation8 + $0x9ac] ss:$36 sps:$4 sm:$0xff]   ;;  %v14132_v54 = vld [vmem:[#allocation8 + $0x6d8] ss:$36 sps:$4 sm:$0xff]  }
 0x2e3   :  { %5259 = vmatprep.subr.bf16.mxu0 %v14092_v56  ;;  %5288 = vmatprep.subr.bf16.mxu1 %v14095_v59  ;;  %v14135_v56 = vld [vmem:[#allocation8 + $0x9a8] ss:$36 sps:$4 sm:$0xff]  }
 0x2e4   :  { %v14140_v59 = vld [vmem:[#allocation8 + $0x964] ss:$36 sps:$4 sm:$0xff]  }
 0x2e5   :  { %v4978_v2 = vpop.f32.mrf.mxu1 }
 0x2e6   :  { %v4979_v6 = vadd.f32 %v4978_v2, %v4938_v32  ;;  %5260 = vmatpush2.bf16.msra.mxu0 %v14090_v14  ;;  %5289 = vmatpush2.bf16.msra.mxu1 %v14093_v60  ;;  %v14116_v32 = vld [vmem:[#allocation8 + $0x7b4] ss:$36 sps:$4 sm:$0xff]   ;;  %v14138_v60 = vld [vmem:[#allocation8 + $0x960] ss:$36 sps:$4 sm:$0xff]   ;;  %v14149_v2 = vld [vmem:[#allocation8 + $0xf4c] ss:$36 sps:$4 sm:$0xff]  }
 0x2e7   :  { %v4980_v7 = vpop.f32.mrf.mxu1  ;;  %5261 = vmatprep.subr.bf16.mxu0 %v14098_v61  ;;  %5290 = vmatprep.subr.bf16.mxu1 %v14101_v62  ;;  %v14143_v14 = vld [vmem:[#allocation8 + $0xf94] ss:$36 sps:$4 sm:$0xff]   ;;  %v14146_v62 = vld [vmem:[#allocation8 + $0x91c] ss:$36 sps:$4 sm:$0xff]  }
 0x2e8   :  { %v4981_v9 = vadd.f32 %v4980_v7, %v4940_v39  ;;  %v14141_v61 = vld [vmem:[#allocation8 + $0xf90] ss:$36 sps:$4 sm:$0xff]   ;;  %v14153_v7 = vld [vmem:[#allocation8 + $0xf00] ss:$36 sps:$4 sm:$0xff]  }
 0x2e9   :  { %v4982_v16 = vpop.f32.mrf.mxu1 }
 0x2ea   :  { %5262 = vmatpush2.bf16.msra.mxu0 %v14096_v63  ;;  %5291 = vmatpush2.bf16.msra.mxu1 %v14099_v1  ;;  %v14144_v63 = vld [vmem:[#allocation8 + $0x918] ss:$36 sps:$4 sm:$0xff]   ;;  %v14147_v1 = vld [vmem:[#allocation8 + $0xf48] ss:$36 sps:$4 sm:$0xff]  }
 0x2eb   :  { %v4983_v20 = vpop.f32.mrf.mxu1  ;;  %5292 = vmatprep.subr.bf16.mxu1 %v14104_v4  ;;  %5313 = vmatprep.subr.bf16.mxu0 %v14107_v5  ;;  %v14152_v4 = vld [vmem:[#allocation8 + $0xd54] ss:$36 sps:$4 sm:$0xff]   ;;  %v14155_v5 = vld [vmem:[#allocation8 + $0xf04] ss:$36 sps:$4 sm:$0xff]  }
 0x2ec   :  { %v14156_v16 = vld [vmem:[#allocation8 + $0xd08] ss:$36 sps:$4 sm:$0xff]   ;;  %v14162_v20 = vld [vmem:[#allocation8 + $0xcc0] ss:$36 sps:$4 sm:$0xff]  }
 0x2ed   :  { %v5019_v34 = vpop.f32.mrf.mxu0  ;;  %5264 = vmatmul.mubr.bf16.vlgmr.msra.gmra.mxu0 %v15679_v48 }
 0x2ee   :  { %v15774_v37 = vadd.f32 %v5019_v34, %v4979_v6  ;;  %5293 = vmatpush2.bf16.msra.mxu1 %v14102_v12  ;;  %5314 = vmatpush1.bf16.msra.mxu0 %v14105_v17  ;;  %v14150_v6 = vld [vmem:[#allocation8 + $0xd50] ss:$36 sps:$4 sm:$0xff]   ;;  %v14161_v12 = vld [vmem:[#allocation8 + $0xebc] ss:$36 sps:$4 sm:$0xff]  }
 0x2ef   :  { %5345 = vmatprep.mubr.bf16.mxu0 %v15703_v26  ;;  %v5021_v39 = vpop.f32.mrf.mxu0  ;;  %5294 = vmatprep.subr.bf16.mxu1 %v14110_v18  ;;  %v14159_v17 = vld [vmem:[#allocation8 + $0xeb8] ss:$36 sps:$4 sm:$0xff]   ;;  %v14164_v18 = vld [vmem:[#allocation8 + $0xcc4] ss:$36 sps:$4 sm:$0xff]   ;;  %v14173_v34 = vld [vmem:[#allocation8 + $0xe2c] ss:$36 sps:$4 sm:$0xff]  }
 0x2f0   :  { %v15777_v40 = vadd.f32 %v5021_v39, %v4981_v9  ;;  %5315 = vmatprep.subr.bf16.mxu0 %v14113_v19  ;;  %v14158_v9 = vld [vmem:[#allocation8 + $0xd0c] ss:$36 sps:$4 sm:$0xff]   ;;  %v14167_v19 = vld [vmem:[#allocation8 + $0xe74] ss:$36 sps:$4 sm:$0xff]  }
 0x2f1   :  { %v5023_v27 = vpop.f32.mrf.mxu0  ;;  %v14176_v39 = vld [vmem:[#allocation8 + $0xc34] ss:$36 sps:$4 sm:$0xff]  }
 0x2f2   :  { %5295 = vmatpush2.bf16.msra.mxu1 %v14108_v21  ;;  %5316 = vmatpush1.bf16.msra.mxu0 %v14111_v24  ;;  %v14165_v21 = vld [vmem:[#allocation8 + $0xe70] ss:$36 sps:$4 sm:$0xff]   ;;  %v14170_v24 = vld [vmem:[#allocation8 + $0xc7c] ss:$36 sps:$4 sm:$0xff]   ;;  %v14179_v27 = vld [vmem:[#allocation8 + $0xde4] ss:$36 sps:$4 sm:$0xff]  }
 0x2f3   :  { %v5024_v46 = vpop.f32.mrf.mxu0  ;;  %5296 = vmatprep.subr.bf16.mxu1 %v14116_v32  ;;  %5317 = vmatprep.subr.bf16.mxu0 %v14119_v36  ;;  %v14168_v32 = vld [vmem:[#allocation8 + $0xc78] ss:$36 sps:$4 sm:$0xff]   ;;  %v14171_v36 = vld [vmem:[#allocation8 + $0xe28] ss:$36 sps:$4 sm:$0xff]  }
 0x2f4   :  { %v14182_v46 = vld [vmem:[#allocation8 + $0xbec] ss:$36 sps:$4 sm:$0xff]  }
 0x2f6   :  { %5297 = vmatpush2.bf16.msra.mxu1 %v14114_v44  ;;  %5318 = vmatpush1.bf16.msra.mxu0 %v14117_v11  ;;  %v14174_v44 = vld [vmem:[#allocation8 + $0xc30] ss:$36 sps:$4 sm:$0xff]   ;;  %v14177_v11 = vld [vmem:[#allocation8 + $0xde0] ss:$36 sps:$4 sm:$0xff]  }
 0x2f7   :  { %5298 = vmatprep.subr.bf16.mxu1 %v14122_v28  ;;  %5319 = vmatprep.subr.bf16.mxu0 %v14125_v22  ;;  %v14185_v28 = vld [vmem:[#allocation8 + $0xd9c] ss:$36 sps:$4 sm:$0xff]   ;;  %v14180_v22 = vld [vmem:[#allocation8 + $0xbe8] ss:$36 sps:$4 sm:$0xff]  }
 0x2fa   :  { %5299 = vmatpush2.bf16.msra.mxu1 %v14120_v49  ;;  %5320 = vmatpush1.bf16.msra.mxu0 %v14123_v50  ;;  %v14183_v49 = vld [vmem:[#allocation8 + $0xd98] ss:$36 sps:$4 sm:$0xff]   ;;  %v14188_v50 = vld [vmem:[#allocation8 + $0xba4] ss:$36 sps:$4 sm:$0xff]  }
 0x2fb   :  { %5300 = vmatprep.subr.bf16.mxu1 %v14128_v51  ;;  %5321 = vmatprep.subr.bf16.mxu0 %v14131_v10  ;;  %v14191_v51 = vld [vmem:[#allocation8 + $0x11d4] ss:$36 sps:$4 sm:$0xff]   ;;  %v14186_v10 = vld [vmem:[#allocation8 + $0xba0] ss:$36 sps:$4 sm:$0xff]  }
 0x2fe   :  { %5301 = vmatpush2.bf16.msra.mxu1 %v14126_v31  ;;  %5322 = vmatpush1.bf16.msra.mxu0 %v14129_v52  ;;  %v14189_v31 = vld [vmem:[#allocation8 + $0x11d0] ss:$36 sps:$4 sm:$0xff]   ;;  %v14194_v52 = vld [vmem:[#allocation8 + $0xb5c] ss:$36 sps:$4 sm:$0xff]  }
 0x2ff   :  { %5302 = vmatprep.subr.bf16.mxu1 %v14134_v53  ;;  %5323 = vmatprep.subr.bf16.mxu0 %v14137_v55  ;;  %v14197_v53 = vld [vmem:[#allocation8 + $0x118c] ss:$36 sps:$4 sm:$0xff]  }
 0x302   :  { %5303 = vmatpush2.bf16.msra.mxu1 %v14132_v54  ;;  %5324 = vmatpush1.bf16.msra.mxu0 %v14135_v56  ;;  %v14192_v54 = vld [vmem:[#allocation8 + $0xb58] ss:$36 sps:$4 sm:$0xff]   ;;  %v14195_v56 = vld [vmem:[#allocation8 + $0x1188] ss:$36 sps:$4 sm:$0xff]  }
 0x303   :  { %5325 = vmatprep.subr.bf16.mxu0 %v14140_v59  ;;  %5354 = vmatprep.subr.bf16.mxu1 %v14143_v14  ;;  %v14200_v14 = vld [vmem:[#allocation8 + $0x1144] ss:$36 sps:$4 sm:$0xff]  }
 0x305   :  { %5305 = vmatmul.mubr.bf16.vlgmr.msra.gmra.mxu1 %v15690_v3 }
 0x306   :  { %5326 = vmatpush1.bf16.msra.mxu0 %v14138_v60  ;;  %5355 = vmatpush1.bf16.msra.mxu1 %v14141_v61  ;;  %v14203_v60 = vld [vmem:[#allocation8 + $0x1414] ss:$36 sps:$4 sm:$0xff]   ;;  %v15321_v61 = vld [vmem:[#allocation10] sm:$0xff] }
 0x307   :  { %5386 = vmatprep.mubr.bf16.mxu1 %v15699_v13  ;;  %5327 = vmatprep.subr.bf16.mxu0 %v14146_v62  ;;  %v1278_v62 = vrot.slane %v15321_v61, %v15709_v15 }
 0x308   :  { %5356 = vmatprep.subr.bf16.mxu1 %v14149_v2 }
 0x30a   :  { %5328 = vmatpush1.bf16.msra.mxu0 %v14144_v63  ;;  %5357 = vmatpush1.bf16.msra.mxu1 %v14147_v1  ;;  %v14198_v63 = vld [vmem:[#allocation8 + $0x1140] ss:$36 sps:$4 sm:$0xff]   ;;  %v14201_v1 = vld [vmem:[#allocation8 + $0x1410] ss:$36 sps:$4 sm:$0xff]  }
 0x30b   :  { %5329 = vmatprep.subr.bf16.mxu0 %v14152_v4  ;;  %5358 = vmatprep.subr.bf16.mxu1 %v14155_v5  ;;  %v14206_v4 = vld [vmem:[#allocation8 + $0x10fc] ss:$36 sps:$4 sm:$0xff]   ;;  %v14209_v5 = vld [vmem:[#allocation8 + $0x13cc] ss:$36 sps:$4 sm:$0xff]  }
 0x30e   :  { %5330 = vmatpush2.bf16.msra.mxu0 %v14150_v6  ;;  %5359 = vmatpush1.bf16.msra.mxu1 %v14153_v7  ;;  %v1282_v6 = vrot.slane %v15321_v61, %v15688_v58  ;;  %v14242_v61 = vld [vmem:[#allocation8 + $0x410] ss:$36 sps:$4 sm:$0xff]  }
 0x30f   :  { %5331 = vmatprep.subr.bf16.mxu0 %v14158_v9  ;;  %5360 = vmatprep.subr.bf16.mxu1 %v14161_v12  ;;  %v14204_v12 = vld [vmem:[#allocation8 + $0x10f8] ss:$36 sps:$4 sm:$0xff]  }
 0x312   :  { %5332 = vmatpush2.bf16.msra.mxu0 %v14156_v16  ;;  %5361 = vmatpush1.bf16.msra.mxu1 %v14159_v17  ;;  %v14207_v16 = vld [vmem:[#allocation8 + $0x13c8] ss:$36 sps:$4 sm:$0xff]  }
 0x313   :  { %5333 = vmatprep.subr.bf16.mxu0 %v14164_v18  ;;  %5362 = vmatprep.subr.bf16.mxu1 %v14167_v19  ;;  %v14212_v18 = vld [vmem:[#allocation8 + $0x10b4] ss:$36 sps:$4 sm:$0xff]   ;;  %v14215_v19 = vld [vmem:[#allocation8 + $0x1384] ss:$36 sps:$4 sm:$0xff]  }
 0x316   :  { %5334 = vmatpush2.bf16.msra.mxu0 %v14162_v20  ;;  %5363 = vmatpush1.bf16.msra.mxu1 %v14165_v21 }
 0x317   :  { %5335 = vmatprep.subr.bf16.mxu0 %v14170_v24  ;;  %5364 = vmatprep.subr.bf16.mxu1 %v14173_v34 }
 0x31a   :  { %5336 = vmatpush2.bf16.msra.mxu0 %v14168_v32  ;;  %5365 = vmatpush1.bf16.msra.mxu1 %v14171_v36  ;;  %v14210_v36 = vld [vmem:[#allocation8 + $0x10b0] ss:$36 sps:$4 sm:$0xff]  }
 0x31b   :  { %5337 = vmatprep.subr.bf16.mxu0 %v14176_v39  ;;  %5366 = vmatprep.subr.bf16.mxu1 %v14179_v27  ;;  %v14213_v39 = vld [vmem:[#allocation8 + $0x1380] ss:$36 sps:$4 sm:$0xff]  }
 0x31e   :  { %5338 = vmatpush2.bf16.msra.mxu0 %v14174_v44  ;;  %5367 = vmatpush1.bf16.msra.mxu1 %v14177_v11  ;;  %v14218_v44 = vld [vmem:[#allocation8 + $0x106c] ss:$36 sps:$4 sm:$0xff]   ;;  %v14221_v11 = vld [vmem:[#allocation8 + $0x133c] ss:$36 sps:$4 sm:$0xff]  }
 0x31f   :  { %5339 = vmatprep.subr.bf16.mxu0 %v14182_v46  ;;  %5368 = vmatprep.subr.bf16.mxu1 %v14185_v28  ;;  %v14216_v46 = vld [vmem:[#allocation8 + $0x1068] ss:$36 sps:$4 sm:$0xff]   ;;  %v14219_v28 = vld [vmem:[#allocation8 + $0x1338] ss:$36 sps:$4 sm:$0xff]  }
 0x322   :  { %5340 = vmatpush2.bf16.msra.mxu0 %v14180_v22  ;;  %5369 = vmatpush1.bf16.msra.mxu1 %v14183_v49  ;;  %v14224_v22 = vld [vmem:[#allocation8 + $0x1024] ss:$36 sps:$4 sm:$0xff]   ;;  %v14227_v49 = vld [vmem:[#allocation8 + $0x12f4] ss:$36 sps:$4 sm:$0xff]  }
 0x323   :  { %5341 = vmatprep.subr.bf16.mxu0 %v14188_v50  ;;  %5370 = vmatprep.subr.bf16.mxu1 %v14191_v51  ;;  %v14222_v50 = vld [vmem:[#allocation8 + $0x1020] ss:$36 sps:$4 sm:$0xff]   ;;  %v14225_v51 = vld [vmem:[#allocation8 + $0x12f0] ss:$36 sps:$4 sm:$0xff]  }
 0x325   :  { %v5060_v55 = vpop.f32.mrf.mxu1 }
 0x326   :  { %5342 = vmatpush2.bf16.msra.mxu0 %v14186_v10  ;;  %5371 = vmatpush2.bf16.msra.mxu1 %v14189_v31  ;;  %v5061_v9 = vadd.f32 %v5060_v55, %v1278_v62  ;;  %v14230_v10 = vld [vmem:[#allocation8 + $0xfdc] ss:$36 sps:$4 sm:$0xff]   ;;  %v14233_v31 = vld [vmem:[#allocation8 + $0x12ac] ss:$36 sps:$4 sm:$0xff]   ;;  %v14236_v55 = vld [vmem:[#allocation8 + $0x1264] ss:$36 sps:$4 sm:$0xff]  }
 0x327   :  { %v5062_v59 = vpop.f32.mrf.mxu1  ;;  %5343 = vmatprep.subr.bf16.mxu0 %v14194_v52  ;;  %5372 = vmatprep.subr.bf16.mxu1 %v14197_v53  ;;  %v14228_v52 = vld [vmem:[#allocation8 + $0xfd8] ss:$36 sps:$4 sm:$0xff]   ;;  %v14231_v53 = vld [vmem:[#allocation8 + $0x12a8] ss:$36 sps:$4 sm:$0xff]   ;;  %v14243_v62 = vld [vmem:[#allocation8 + $0x1d0] ss:$36 sps:$4 sm:$0xff]  }
 0x328   :  { %v5063_v20 = vadd.f32 %v5062_v59, %v1282_v6  ;;  %v14238_v59 = vld [vmem:[#allocation8 + $0x218] ss:$36 sps:$4 sm:$0xff]   ;;  %v14249_v6 = vld [vmem:[#allocation8 + $0x890] ss:$36 sps:$4 sm:$0xff]  }
 0x329   :  { %v5064_v2 = vpop.f32.mrf.mxu1 }
 0x32a   :  { %5344 = vmatpush2.bf16.msra.mxu0 %v14192_v54  ;;  %5373 = vmatpush2.bf16.msra.mxu1 %v14195_v56  ;;  %v14237_v54 = vld [vmem:[#allocation8 + $0x458] ss:$36 sps:$4 sm:$0xff]   ;;  %v14234_v56 = vld [vmem:[#allocation8 + $0x1260] ss:$36 sps:$4 sm:$0xff]   ;;  %v14246_v2 = vld [vmem:[#allocation8 + $0x188] ss:$36 sps:$4 sm:$0xff]  }
 0x32b   :  { %v5065_v7 = vpop.f32.mrf.mxu1  ;;  %5374 = vmatprep.subr.bf16.mxu1 %v14200_v14  ;;  %5395 = vmatprep.subr.bf16.mxu0 %v14203_v60  ;;  %v14241_v14 = vld [vmem:[#allocation8 + $0x121c] ss:$36 sps:$4 sm:$0xff]  }
 0x32c   :  { %v14239_v60 = vld [vmem:[#allocation8 + $0x1218] ss:$36 sps:$4 sm:$0xff]   ;;  %v14250_v7 = vld [vmem:[#allocation8 + $0x140] ss:$36 sps:$4 sm:$0xff]  }
 0x32d   :  { %v5101_v17 = vpop.f32.mrf.mxu0  ;;  %5346 = vmatmul.mubr.bf16.vlgmr.msra.gmra.mxu0 %v15720_v47 }
 0x32e   :  { %v15784_v21 = vadd.f32 %v5101_v17, %v5061_v9  ;;  %5375 = vmatpush2.bf16.msra.mxu1 %v14198_v63  ;;  %5396 = vmatpush1.bf16.msra.mxu0 %v14201_v1  ;;  %v14244_v63 = vld [vmem:[#allocation8 + $0x3c8] ss:$36 sps:$4 sm:$0xff]   ;;  %v14245_v1 = vld [vmem:[#allocation8 + $0x8d8] ss:$36 sps:$4 sm:$0xff]   ;;  %v14251_v9 = vld [vmem:[#allocation8 + $0x650] ss:$36 sps:$4 sm:$0xff]  }
 0x32f   :  { %v5103_v24 = vpop.f32.mrf.mxu0  ;;  %5376 = vmatprep.subr.bf16.mxu1 %v14206_v4  ;;  %5397 = vmatprep.subr.bf16.mxu0 %v14209_v5  ;;  %v14247_v4 = vld [vmem:[#allocation8 + $0x698] ss:$36 sps:$4 sm:$0xff]   ;;  %v14248_v5 = vld [vmem:[#allocation8 + $0x380] ss:$36 sps:$4 sm:$0xff]   ;;  %v14255_v17 = vld [vmem:[#allocation8 + $0x608] ss:$36 sps:$4 sm:$0xff]  }
 0x330   :  { %v15786_v34 = vadd.f32 %v5103_v24, %v5063_v20  ;;  %5427 = vmatprep.mubr.bf16.mxu0 %v15549_v0  ;;  %v14258_v20 = vld [vmem:[#allocation8 + $0xb0] ss:$36 sps:$4 sm:$0xff]   ;;  %v14259_v24 = vld [vmem:[#allocation8 + $0x5c0] ss:$36 sps:$4 sm:$0xff]  }
 0x331   :  { %v5105_v32 = vpop.f32.mrf.mxu0 }
 0x332   :  { %5377 = vmatpush2.bf16.msra.mxu1 %v14204_v12  ;;  %5398 = vmatpush1.bf16.msra.mxu0 %v14207_v16  ;;  %v14253_v12 = vld [vmem:[#allocation8 + $0x848] ss:$36 sps:$4 sm:$0xff]   ;;  %v14254_v16 = vld [vmem:[#allocation8 + $0xf8] ss:$36 sps:$4 sm:$0xff]  }
 0x333   :  { %v5106_v27 = vpop.f32.mrf.mxu0  ;;  %5378 = vmatprep.subr.bf16.mxu1 %v14212_v18  ;;  %5399 = vmatprep.subr.bf16.mxu0 %v14215_v19  ;;  %v14256_v18 = vld [vmem:[#allocation8 + $0x2f0] ss:$36 sps:$4 sm:$0xff]   ;;  %v14257_v19 = vld [vmem:[#allocation8 + $0x800] ss:$36 sps:$4 sm:$0xff]   ;;  %v14260_v32 = vld [vmem:[#allocation8 + $0x2a8] ss:$36 sps:$4 sm:$0xff]  }
 0x334   :  { %v14264_v27 = vld [vmem:[#allocation8 + $0x260] ss:$36 sps:$4 sm:$0xff]  }
 0x336   :  { %5379 = vmatpush2.bf16.msra.mxu1 %v14210_v36  ;;  %5400 = vmatpush1.bf16.msra.mxu0 %v14213_v39  ;;  %v14262_v36 = vld [vmem:[#allocation8 + $0x68] ss:$36 sps:$4 sm:$0xff]   ;;  %v14263_v39 = vld [vmem:[#allocation8 + $0x578] ss:$36 sps:$4 sm:$0xff]  }
 0x337   :  { %5380 = vmatprep.subr.bf16.mxu1 %v14218_v44  ;;  %5401 = vmatprep.subr.bf16.mxu0 %v14221_v11  ;;  %v14265_v44 = vld [vmem:[#allocation8 + $0x770] ss:$36 sps:$4 sm:$0xff]   ;;  %v14266_v11 = vld [vmem:[#allocation8 + $0x20] ss:$36 sps:$4 sm:$0xff]  }
 0x33a   :  { %5381 = vmatpush2.bf16.msra.mxu1 %v14216_v46  ;;  %5402 = vmatpush1.bf16.msra.mxu0 %v14219_v28  ;;  %v14267_v46 = vld [vmem:[#allocation8 + $0x530] ss:$36 sps:$4 sm:$0xff]   ;;  %v14268_v28 = vld [vmem:[#allocation8 + $0x728] ss:$36 sps:$4 sm:$0xff]  }
 0x33b   :  { %5382 = vmatprep.subr.bf16.mxu1 %v14224_v22  ;;  %5403 = vmatprep.subr.bf16.mxu0 %v14227_v49  ;;  %v14269_v22 = vld [vmem:[#allocation8 + $0xd58] ss:$36 sps:$4 sm:$0xff]   ;;  %v14270_v49 = vld [vmem:[#allocation8 + $0x4e8] ss:$36 sps:$4 sm:$0xff]  }
 0x33e   :  { %5383 = vmatpush2.bf16.msra.mxu1 %v14222_v50  ;;  %5404 = vmatpush1.bf16.msra.mxu0 %v14225_v51  ;;  %v14271_v50 = vld [vmem:[#allocation8 + $0xb18] ss:$36 sps:$4 sm:$0xff]   ;;  %v14272_v51 = vld [vmem:[#allocation8 + $0x6e0] ss:$36 sps:$4 sm:$0xff]  }
 0x33f   :  { %5384 = vmatprep.subr.bf16.mxu1 %v14230_v10  ;;  %5405 = vmatprep.subr.bf16.mxu0 %v14233_v31  ;;  %v14273_v10 = vld [vmem:[#allocation8 + $0xd10] ss:$36 sps:$4 sm:$0xff]  }
 0x342   :  { %5385 = vmatpush2.bf16.msra.mxu1 %v14228_v52  ;;  %5406 = vmatpush1.bf16.msra.mxu0 %v14231_v53  ;;  %v14274_v53 = vld [vmem:[#allocation8 + $0x4a0] ss:$36 sps:$4 sm:$0xff]  }
 0x343   :  { %5407 = vmatprep.subr.bf16.mxu0 %v14236_v55  ;;  %12974 = vmatprep.subr.bf16.mxu1 %v14237_v54  ;;  %v14275_v55 = vld [vmem:[#allocation8 + $0xad0] ss:$36 sps:$4 sm:$0xff]  }
 0x345   :  { %5387 = vmatmul.mubr.bf16.vlgmr.msra.gmra.mxu1 %v15724_v57 }
 0x346   :  { %5408 = vmatpush1.bf16.msra.mxu0 %v14234_v56  ;;  %12975 = vmatpush3.bf16.msra.mxu1 %v14238_v59  ;;  %v14276_v56 = vld [vmem:[#allocation8 + $0xcc8] ss:$36 sps:$4 sm:$0xff]   ;;  %v14277_v59 = vld [vmem:[#allocation8 + $0x11d8] ss:$36 sps:$4 sm:$0xff]  }
 0x347   :  { %5468 = vmatprep.mubr.bf16.mxu1 %v15675_v45  ;;  %5409 = vmatprep.subr.bf16.mxu0 %v14241_v14  ;;  %v14252_v45 = vld [vmem:[#allocation8 + $0x338] ss:$36 sps:$4 sm:$0xff]  }
 0x348   :  { %12976 = vmatprep.subr.bf16.mxu1 %v14242_v61  ;;  %v14279_v61 = vld [vmem:[#allocation8 + $0xf98] ss:$36 sps:$4 sm:$0xff]  }
 0x34a   :  { %5410 = vmatpush1.bf16.msra.mxu0 %v14239_v60  ;;  %12977 = vmatpush3.bf16.msra.mxu1 %v14243_v62  ;;  %v14278_v60 = vld [vmem:[#allocation8 + $0xa88] ss:$36 sps:$4 sm:$0xff]  }
 0x34b   :  { %12978 = vmatprep.subr.bf16.mxu1 %v14244_v63  ;;  %12996 = vmatprep.subr.bf16.mxu0 %v14245_v1  ;;  %v14280_v63 = vld [vmem:[#allocation8 + $0xc80] ss:$36 sps:$4 sm:$0xff]  }
 0x34c   :  { %v14282_v1 = vld [vmem:[#allocation8 + $0xa40] ss:$36 sps:$4 sm:$0xff]  }
 0x34d   :  { %5428 = vmatmul.mubr.bf16.vlgmr.msra.gmra.mxu0 %v15729_v33 }
 0x34e   :  { %12979 = vmatpush3.bf16.msra.mxu1 %v14246_v2  ;;  %12997 = vmatpush3.bf16.msra.mxu0 %v14247_v4  ;;  %v14283_v2 = vld [vmem:[#allocation8 + $0xf50] ss:$36 sps:$4 sm:$0xff]   ;;  %v14284_v4 = vld [vmem:[#allocation8 + $0xc38] ss:$36 sps:$4 sm:$0xff]  }
 0x34f   :  { %5508 = vmatprep.mubr.bf16.mxu0 %v15692_v8  ;;  %12980 = vmatprep.subr.bf16.mxu1 %v14248_v5  ;;  %v14261_v8 = vld [vmem:[#allocation8 + $0x7b8] ss:$36 sps:$4 sm:$0xff]   ;;  %v14285_v5 = vld [vmem:[#allocation8 + $0x1148] ss:$36 sps:$4 sm:$0xff]  }
 0x350   :  { %12998 = vmatprep.subr.bf16.mxu0 %v14249_v6 }
 0x352   :  { %12981 = vmatpush3.bf16.msra.mxu1 %v14250_v7  ;;  %12999 = vmatpush3.bf16.msra.mxu0 %v14251_v9 }
 0x353   :  { %12982 = vmatprep.subr.bf16.mxu1 %v14252_v45  ;;  %13000 = vmatprep.subr.bf16.mxu0 %v14253_v12  ;;  %v14286_v45 = vld [vmem:[#allocation8 + $0x9f8] ss:$36 sps:$4 sm:$0xff]   ;;  %v14287_v12 = vld [vmem:[#allocation8 + $0xf08] ss:$36 sps:$4 sm:$0xff]  }
 0x356   :  { %12983 = vmatpush3.bf16.msra.mxu1 %v14254_v16  ;;  %13001 = vmatpush3.bf16.msra.mxu0 %v14255_v17  ;;  %v14289_v17 = vld [vmem:[#allocation8 + $0x1100] ss:$36 sps:$4 sm:$0xff]  }
 0x357   :  { %12984 = vmatprep.subr.bf16.mxu1 %v14256_v18  ;;  %13002 = vmatprep.subr.bf16.mxu0 %v14257_v19  ;;  %v14290_v18 = vld [vmem:[#allocation8 + $0x9b0] ss:$36 sps:$4 sm:$0xff]   ;;  %v14291_v19 = vld [vmem:[#allocation8 + $0xec0] ss:$36 sps:$4 sm:$0xff]  }
 0x35a   :  { %12985 = vmatpush3.bf16.msra.mxu1 %v14258_v20  ;;  %13003 = vmatpush3.bf16.msra.mxu0 %v14259_v24  ;;  %v14293_v20 = vld [vmem:[#allocation8 + $0x10b8] ss:$36 sps:$4 sm:$0xff]   ;;  %v14294_v24 = vld [vmem:[#allocation8 + $0x968] ss:$36 sps:$4 sm:$0xff]  }
 0x35b   :  { %12986 = vmatprep.subr.bf16.mxu1 %v14260_v32  ;;  %13004 = vmatprep.subr.bf16.mxu0 %v14261_v8  ;;  %v14295_v32 = vld [vmem:[#allocation8 + $0xe78] ss:$36 sps:$4 sm:$0xff]   ;;  %v14296_v8 = vld [vmem:[#allocation8 + $0xb60] ss:$36 sps:$4 sm:$0xff]  }
 0x35e   :  { %12987 = vmatpush3.bf16.msra.mxu1 %v14262_v36  ;;  %13005 = vmatpush3.bf16.msra.mxu0 %v14263_v39  ;;  %v14297_v36 = vld [vmem:[#allocation8 + $0x1070] ss:$36 sps:$4 sm:$0xff]   ;;  %v14298_v39 = vld [vmem:[#allocation8 + $0x920] ss:$36 sps:$4 sm:$0xff]  }
 0x35f   :  { %12988 = vmatprep.subr.bf16.mxu1 %v14264_v27  ;;  %13006 = vmatprep.subr.bf16.mxu0 %v14265_v44  ;;  %v14299_v27 = vld [vmem:[#allocation8 + $0xe30] ss:$36 sps:$4 sm:$0xff]   ;;  %v14300_v44 = vld [vmem:[#allocation8 + $0x1028] ss:$36 sps:$4 sm:$0xff]  }
 0x362   :  { %12989 = vmatpush3.bf16.msra.mxu1 %v14266_v11  ;;  %13007 = vmatpush3.bf16.msra.mxu0 %v14267_v46  ;;  %v14301_v11 = vld [vmem:[#allocation8 + $0xde8] ss:$36 sps:$4 sm:$0xff]   ;;  %v14302_v46 = vld [vmem:[#allocation8 + $0x1418] ss:$36 sps:$4 sm:$0xff]  }
 0x363   :  { %13008 = vmatprep.subr.bf16.mxu0 %v14268_v28  ;;  %13018 = vmatprep.subr.bf16.mxu1 %v14269_v22  ;;  %v14303_v28 = vld [vmem:[#allocation8 + $0xfe0] ss:$36 sps:$4 sm:$0xff]  }
 0x364   :  { %v14304_v22 = vld [vmem:[#allocation8 + $0xda0] ss:$36 sps:$4 sm:$0xff]  }
 0x365   :  { %v5142_v31 = vpop.f32.mrf.mxu1  ;;  %5469 = vmatmul.mubr.bf16.vlgmr.msra.gmra.mxu1 %v15679_v48  ;;  %v14281_v48 = vld [vmem:[#allocation8 + $0x1190] ss:$36 sps:$4 sm:$0xff]  }
 0x366   :  { %v5143_v52 = vadd.f32 %v5142_v31, %v15784_v21  ;;  %13009 = vmatpush3.bf16.msra.mxu0 %v14270_v49  ;;  %13019 = vmatpush3.bf16.msra.mxu1 %v14271_v50  ;;  %v14305_v50 = vld [vmem:[#allocation8 + $0x13d0] ss:$36 sps:$4 sm:$0xff]  }
 0x367   :  { %5548 = vmatprep.mubr.bf16.mxu1 %v15703_v26  ;;  %v5144_v54 = vpop.f32.mrf.mxu1  ;;  %13010 = vmatprep.subr.bf16.mxu0 %v14272_v51  ;;  %v14308_v51 = vld [vmem:[#allocation11 + $0x1fc] ss:$36 sps:$4 sm:$0xff]  }
 0x368   :  { %v5145_v14 = vadd.f32 %v5144_v54, %v15786_v34  ;;  %13020 = vmatprep.subr.bf16.mxu1 %v14273_v10  ;;  %v14306_v54 = vld [vmem:[#allocation11 + $0x1f8] ss:$36 sps:$4 sm:$0xff]  }
 0x369   :  { %v5146_v62 = vpop.f32.mrf.mxu1 }
 0x36a   :  { %13011 = vmatpush3.bf16.msra.mxu0 %v14274_v53  ;;  %13021 = vmatpush3.bf16.msra.mxu1 %v14275_v55  ;;  %v5637_v53 = vmax.f32 %v15755_v42, 0.0  ;;  %v14316_v42 = vld [vmem:[#allocation11 + $0x16c] ss:$36 sps:$4 sm:$0xff]  }
 0x36b   :  { %v5147_v21 = vpop.f32.mrf.mxu1  ;;  %13022 = vmatprep.subr.bf16.mxu1 %v14276_v56  ;;  %13040 = vmatprep.subr.bf16.mxu0 %v14277_v59  ;;  %v14310_v59 = vld [vmem:[#allocation11 + $0x1b0] ss:$36 sps:$4 sm:$0xff]   ;;  %v14314_v62 = vld [vmem:[#allocation11 + $0x168] ss:$36 sps:$4 sm:$0xff]  }
 0x36c   :  { %v14321_v21 = vld [vmem:[#allocation8 + $0x12b0] ss:$36 sps:$4 sm:$0xff]  }
 0x36d   :  { %v5183_v26 = vpop.f32.mrf.mxu0  ;;  %5509 = vmatmul.mubr.bf16.vlgmr.msra.gmra.mxu0 %v15690_v3  ;;  %v14288_v3 = vld [vmem:[#allocation8 + $0xbf0] ss:$36 sps:$4 sm:$0xff]  }
 0x36e   :  { %v5184_v6 = vadd.f32 %v5183_v26, %v5143_v52  ;;  %13023 = vmatpush3.bf16.msra.mxu1 %v14278_v60  ;;  %13041 = vmatpush3.bf16.msra.mxu0 %v14279_v61  ;;  %v15810_v60 = vpack.c.bf16 %v5637_v53, %v5637_v53  ;;  %v14313_v61 = vld [vmem:[#allocation8 + $0x1340] ss:$36 sps:$4 sm:$0xff]   ;;  %v14325_v26 = vld [vmem:[#allocation8 + $0x1268] ss:$36 sps:$4 sm:$0xff]  }
 0x36f   :  { %5588 = vmatprep.mubr.bf16.mxu0 %v15699_v13  ;;  %v5185_v34 = vpop.f32.mrf.mxu0  ;;  %13024 = vmatprep.subr.bf16.mxu1 %v14280_v63  ;;  %v14292_v13 = vld [vmem:[#allocation8 + $0xba8] ss:$36 sps:$4 sm:$0xff]   ;;  %v14317_v63 = vld [vmem:[#allocation8 + $0x12f8] ss:$36 sps:$4 sm:$0xff]  }
 0x370   :  { %v5186_v7 = vadd.f32 %v5185_v34, %v5145_v14  ;;  %13042 = vmatprep.subr.bf16.mxu0 %v14281_v48  ;;  %v14312_v14 = vld [vmem:[#allocation11 + $0x1b4] ss:$36 sps:$4 sm:$0xff]   ;;  %v14320_v48 = vld [vmem:[#allocation11 + $0x124] ss:$36 sps:$4 sm:$0xff]   ;;  %v14332_v34 = vld [vmem:[#allocation11 + $0x4c] ss:$36 sps:$4 sm:$0xff]  }
 0x371   :  { %v5187_v9 = vpop.f32.mrf.mxu0  ;;  %v14363_v53 = vld [vmem:[#allocation11 + $0x510] ss:$36 sps:$4 sm:$0xff]  }
 0x372   :  { %13025 = vmatpush3.bf16.msra.mxu1 %v14282_v1  ;;  %13043 = vmatpush3.bf16.msra.mxu0 %v14283_v2  ;;  %v14324_v1 = vld [vmem:[#allocation11 + $0xdc] ss:$36 sps:$4 sm:$0xff]   ;;  %v5639_v9 = vmax.f32 %v15777_v40, 0.0 }
 0x373   :  { %v5188_v16 = vpop.f32.mrf.mxu0  ;;  %13026 = vmatprep.subr.bf16.mxu1 %v14284_v4  ;;  %13044 = vmatprep.subr.bf16.mxu0 %v14285_v5  ;;  %v14322_v2 = vld [vmem:[#allocation11 + $0xd8] ss:$36 sps:$4 sm:$0xff]   ;;  %v14326_v5 = vld [vmem:[#allocation11 + $0x90] ss:$36 sps:$4 sm:$0xff]  }
 0x374   :  { %v14328_v4 = vld [vmem:[#allocation11 + $0x94] ss:$36 sps:$4 sm:$0xff]   ;;  %v14338_v16 = vld [vmem:[#allocation11 + $0x4] ss:$36 sps:$4 sm:$0xff]   ;;  %v14344_v40 = vld [vmem:[#allocation11 + $0x43c] ss:$36 sps:$4 sm:$0xff]  }
 0x376   :  { %13027 = vmatpush3.bf16.msra.mxu1 %v14286_v45  ;;  %13045 = vmatpush3.bf16.msra.mxu0 %v14287_v12  ;;  %v14330_v45 = vld [vmem:[#allocation11 + $0x48] ss:$36 sps:$4 sm:$0xff]   ;;  %v14333_v12 = vld [vmem:[#allocation11 + $0x678] ss:$36 sps:$4 sm:$0xff]  }
 0x377   :  { %13028 = vmatprep.subr.bf16.mxu1 %v14288_v3  ;;  %13046 = vmatprep.subr.bf16.mxu0 %v14289_v17  ;;  %v14341_v3 = vld [vmem:[#allocation11 + $0x634] ss:$36 sps:$4 sm:$0xff]   ;;  %v15820_v17 = vpack.c.bf16 %v5639_v9, %v5639_v9  ;;  %v14384_v9 = vld [vmem:[#allocation11 + $0x240] ss:$36 sps:$4 sm:$0xff]  }
 0x37a   :  { %13029 = vmatpush3.bf16.msra.mxu1 %v14290_v18  ;;  %13047 = vmatpush3.bf16.msra.mxu0 %v14291_v19  ;;  %v14336_v18 = vld [vmem:[#allocation11] ss:$36 sps:$4 sm:$0xff]   ;;  %v14339_v19 = vld [vmem:[#allocation11 + $0x630] ss:$36 sps:$4 sm:$0xff]  }
 0x37b   :  { %13030 = vmatprep.subr.bf16.mxu1 %v14292_v13  ;;  %13048 = vmatprep.subr.bf16.mxu0 %v14293_v20  ;;  %v14347_v13 = vld [vmem:[#allocation11 + $0x5ec] ss:$36 sps:$4 sm:$0xff]   ;;  %v14342_v20 = vld [vmem:[#allocation11 + $0x438] ss:$36 sps:$4 sm:$0xff]  }
 0x37e   :  { %13031 = vmatpush3.bf16.msra.mxu1 %v14294_v24  ;;  %13049 = vmatpush3.bf16.msra.mxu0 %v14295_v32  ;;  %v14345_v24 = vld [vmem:[#allocation11 + $0x5e8] ss:$36 sps:$4 sm:$0xff]   ;;  %v14350_v32 = vld [vmem:[#allocation11 + $0x3f4] ss:$36 sps:$4 sm:$0xff]  }
 0x37f   :  { %13032 = vmatprep.subr.bf16.mxu1 %v14296_v8  ;;  %13050 = vmatprep.subr.bf16.mxu0 %v14297_v36  ;;  %v14353_v8 = vld [vmem:[#allocation11 + $0x5a4] ss:$36 sps:$4 sm:$0xff]  }
 0x382   :  { %13033 = vmatpush3.bf16.msra.mxu1 %v14298_v39  ;;  %13051 = vmatpush3.bf16.msra.mxu0 %v14299_v27  ;;  %v14351_v39 = vld [vmem:[#allocation11 + $0x5a0] ss:$36 sps:$4 sm:$0xff]  }
 0x383   :  { %13052 = vmatprep.subr.bf16.mxu0 %v14300_v44  ;;  %13273 = vmatprep.subr.bf16.mxu1 %v15550_v25  ;;  %v14356_v44 = vld [vmem:[#allocation11 + $0x3ac] ss:$36 sps:$4 sm:$0xff]  }
 0x385   :  { %v5224_v49 = vpop.f32.mrf.mxu1  ;;  %5549 = vmatmul.mubr.bf16.vlgmr.msra.gmra.mxu1 %v15720_v47  ;;  %v14309_v47 = vld [vmem:[#allocation8 + $0x1388] ss:$36 sps:$4 sm:$0xff]  }
 0x386   :  { %v15801_v10 = vadd.f32 %v5224_v49, %v5184_v6  ;;  %13053 = vmatpush3.bf16.msra.mxu0 %v14301_v11  ;;  %13274 = vmatpush3.bf16.msra.mxu1 %v14302_v46  ;;  %v14329_v6 = vld [vmem:[#allocation8 + $0x1220] ss:$36 sps:$4 sm:$0xff]  }
 0x387   :  { %v5226_v31 = vpop.f32.mrf.mxu1  ;;  %13054 = vmatprep.subr.bf16.mxu0 %v14303_v28  ;;  %13275 = vmatprep.subr.bf16.mxu1 %v15550_v25  ;;  %v14359_v11 = vld [vmem:[#allocation11 + $0x55c] ss:$36 sps:$4 sm:$0xff]   ;;  %v14354_v28 = vld [vmem:[#allocation11 + $0x3a8] ss:$36 sps:$4 sm:$0xff]  }
 0x388   :  { %v15804_v52 = vadd.f32 %v5226_v31, %v5186_v7  ;;  %13289 = vmatprep.mubr.msk.bf16.mxu1 %vm15551_vm1, %v15550_v25  ;;  %v14335_v7 = vld [vmem:[#allocation11 + $0x67c] ss:$36 sps:$4 sm:$0xff]  }
 0x389   :  { %v5228_v55 = vpop.f32.mrf.mxu1  ;;  %v14360_v31 = vld [vmem:[#allocation11 + $0x360] ss:$36 sps:$4 sm:$0xff]  }
 0x38a   :  { %13055 = vmatpush3.bf16.msra.mxu0 %v14304_v22  ;;  %13276 = vmatpush3.bf16.msra.mxu1 %v14305_v50  ;;  %v14357_v22 = vld [vmem:[#allocation11 + $0x558] ss:$36 sps:$4 sm:$0xff]   ;;  %v14362_v50 = vld [vmem:[#allocation11 + $0x364] ss:$36 sps:$4 sm:$0xff]  }
 0x38b   :  { %v5229_v56 = vpop.f32.mrf.mxu1  ;;  %13277 = vmatprep.subr.bf16.mxu1 %v15550_v25  ;;  %9735 = vmatprep.subr.bf16.mxu0 %v14308_v51  ;;  %v14365_v51 = vld [vmem:[#allocation11 + $0x514] ss:$36 sps:$4 sm:$0xff]   ;;  %v14368_v55 = vld [vmem:[#allocation11 + $0x31c] ss:$36 sps:$4 sm:$0xff]  }
 0x38c   :  { %v14369_v56 = vld [vmem:[#allocation11 + $0x4c8] ss:$36 sps:$4 sm:$0xff]  }
 0x38d   :  { %5589 = vmatmul.mubr.bf16.vlgmr.msra.gmra.mxu0 %v15724_v57  ;;  %v14318_v57 = vld [vmem:[#allocation11 + $0x120] ss:$36 sps:$4 sm:$0xff]  }
 0x38e   :  { %13278 = vmatpush3.bf16.msra.mxu1 %v14309_v47  ;;  %9736 = vmatpush1.bf16.msra.mxu0 %v14306_v54  ;;  %v14371_v54 = vld [vmem:[#allocation11 + $0x4cc] ss:$36 sps:$4 sm:$0xff]   ;;  %v14366_v47 = vld [vmem:[#allocation11 + $0x318] ss:$36 sps:$4 sm:$0xff]  }
 0x38f   :  { %9767 = vmatprep.mubr.bf16.mxu0 %v15810_v60  ;;  %13279 = vmatprep.subr.bf16.mxu1 %v15550_v25 }
 0x390   :  { %9737 = vmatprep.subr.bf16.mxu0 %v14312_v14  ;;  %v14377_v14 = vld [vmem:[#allocation11 + $0x484] ss:$36 sps:$4 sm:$0xff]  }
 0x392   :  { %13280 = vmatpush3.bf16.msra.mxu1 %v14313_v61  ;;  %9738 = vmatpush1.bf16.msra.mxu0 %v14310_v59  ;;  %v14374_v59 = vld [vmem:[#allocation11 + $0x2d4] ss:$36 sps:$4 sm:$0xff]  }
 0x393   :  { %13281 = vmatprep.subr.bf16.mxu1 %v15550_v25  ;;  %9739 = vmatprep.subr.bf16.mxu0 %v14316_v42  ;;  %v14372_v61 = vld [vmem:[#allocation11 + $0x2d0] ss:$36 sps:$4 sm:$0xff]   ;;  %v14375_v42 = vld [vmem:[#allocation11 + $0x480] ss:$36 sps:$4 sm:$0xff]  }
 0x396   :  { %13282 = vmatpush3.bf16.msra.mxu1 %v14317_v63  ;;  %9740 = vmatpush1.bf16.msra.mxu0 %v14314_v62  ;;  %v14380_v62 = vld [vmem:[#allocation11 + $0x28c] ss:$36 sps:$4 sm:$0xff]   ;;  %v14383_v63 = vld [vmem:[#allocation11 + $0x8bc] ss:$36 sps:$4 sm:$0xff]  }
 0x397   :  { %13283 = vmatprep.subr.bf16.mxu1 %v15550_v25  ;;  %9741 = vmatprep.subr.bf16.mxu0 %v14320_v48  ;;  %v15322_v48 = vld [vmem:[#allocation10] sm:$0xff] }
 0x39a   :  { %13284 = vmatpush3.bf16.msra.mxu1 %v14321_v21  ;;  %9742 = vmatpush1.bf16.msra.mxu0 %v14318_v57  ;;  %v1286_v57 = vrot.slane %v15322_v48, %v15714_v23  ;;  %v1290_v21 = vrot.slane %v15322_v48, %v15673_v43 }
 0x39b   :  { %13285 = vmatprep.subr.bf16.mxu1 %v15550_v25  ;;  %9743 = vmatprep.subr.bf16.mxu0 %v14324_v1  ;;  %v14378_v1 = vld [vmem:[#allocation11 + $0x288] ss:$36 sps:$4 sm:$0xff]  }
 0x39e   :  { %13286 = vmatpush3.bf16.msra.mxu1 %v14325_v26  ;;  %9744 = vmatpush1.bf16.msra.mxu0 %v14322_v2  ;;  %v14381_v2 = vld [vmem:[#allocation11 + $0x8b8] ss:$36 sps:$4 sm:$0xff]   ;;  %v14386_v26 = vld [vmem:[#allocation11 + $0x244] ss:$36 sps:$4 sm:$0xff]  }
 0x39f   :  { %13287 = vmatprep.subr.bf16.mxu1 %v15550_v25  ;;  %9745 = vmatprep.subr.bf16.mxu0 %v14328_v4  ;;  %v14389_v4 = vld [vmem:[#allocation11 + $0x874] ss:$36 sps:$4 sm:$0xff]  }
 0x3a2   :  { %13288 = vmatpush3.bf16.msra.mxu1 %v14329_v6  ;;  %9746 = vmatpush1.bf16.msra.mxu0 %v14326_v5 }
 0x3a3   :  { %9747 = vmatprep.subr.bf16.mxu0 %v14332_v34  ;;  %9776 = vmatprep.subr.bf16.mxu1 %v14335_v7 }
 0x3a5   :  { %13290 = vmatmul.mubr.bf16.vlgmr.msra.gmra.mxu1 %v15729_v33  ;;  %v14348_v33 = vld [vmem:[#allocation11 + $0x3f0] ss:$36 sps:$4 sm:$0xff]  }
 0x3a6   :  { %9748 = vmatpush1.bf16.msra.mxu0 %v14330_v45  ;;  %9777 = vmatpush1.bf16.msra.mxu1 %v14333_v12  ;;  %v14387_v45 = vld [vmem:[#allocation11 + $0x870] ss:$36 sps:$4 sm:$0xff]   ;;  %v5636_v12 = vmax.f32 %v15752_v41, 0.0  ;;  %v14398_v41 = vld [vmem:[#allocation11 + $0x7e4] ss:$36 sps:$4 sm:$0xff]  }
 0x3a7   :  { %9808 = vmatprep.mubr.bf16.mxu1 %v15820_v17  ;;  %9749 = vmatprep.subr.bf16.mxu0 %v14338_v16 }
 0x3a8   :  { %9778 = vmatprep.subr.bf16.mxu1 %v14341_v3  ;;  %v14392_v3 = vld [vmem:[#allocation11 + $0x82c] ss:$36 sps:$4 sm:$0xff]  }
 0x3aa   :  { %9750 = vmatpush1.bf16.msra.mxu0 %v14336_v18  ;;  %9779 = vmatpush1.bf16.msra.mxu1 %v14339_v19  ;;  %v14395_v18 = vld [vmem:[#allocation11 + $0xafc] ss:$36 sps:$4 sm:$0xff]  }
 0x3ab   :  { %9751 = vmatprep.subr.bf16.mxu0 %v14344_v40  ;;  %9780 = vmatprep.subr.bf16.mxu1 %v14347_v13  ;;  %v5641_v40 = vmax.f32 %v15804_v52, 0.0  ;;  %v14399_v52 = vld [vmem:[#allocation11 + $0xab0] ss:$36 sps:$4 sm:$0xff]  }
 0x3ad   :  { %v5265_v36 = vpop.f32.mrf.mxu0 }
 0x3ae   :  { %9752 = vmatpush2.bf16.msra.mxu0 %v14342_v20  ;;  %9781 = vmatpush1.bf16.msra.mxu1 %v14345_v24  ;;  %v5266_v5 = vadd.f32 %v5265_v36, %v1286_v57  ;;  %v14390_v20 = vld [vmem:[#allocation11 + $0x828] ss:$36 sps:$4 sm:$0xff]   ;;  %v14393_v24 = vld [vmem:[#allocation11 + $0xaf8] ss:$36 sps:$4 sm:$0xff]  }
 0x3af   :  { %v5267_v27 = vpop.f32.mrf.mxu0  ;;  %9753 = vmatprep.subr.bf16.mxu0 %v14350_v32  ;;  %9782 = vmatprep.subr.bf16.mxu1 %v14353_v8  ;;  %v15832_v32 = vpack.c.bf16 %v5636_v12, %v5636_v12  ;;  %v14401_v36 = vld [vmem:[#allocation11 + $0xab4] ss:$36 sps:$4 sm:$0xff]   ;;  %v14434_v57 = vld [vmem:[#allocation11 + $0x904] ss:$36 sps:$4 sm:$0xff]  }
 0x3b0   :  { %v5268_v34 = vadd.f32 %v5267_v27, %v1290_v21  ;;  %v14404_v27 = vld [vmem:[#allocation11 + $0x79c] ss:$36 sps:$4 sm:$0xff]   ;;  %v14437_v21 = vld [vmem:[#allocation11 + $0xf34] ss:$36 sps:$4 sm:$0xff]  }
 0x3b1   :  { %v5269_v46 = vpop.f32.mrf.mxu0  ;;  %v14447_v12 = vld [vmem:[#allocation11 + $0xea0] ss:$36 sps:$4 sm:$0xff]  }
 0x3b2   :  { %9754 = vmatpush2.bf16.msra.mxu0 %v14348_v33  ;;  %9783 = vmatpush1.bf16.msra.mxu1 %v14351_v39  ;;  %v15834_v33 = vpack.c.bf16 %v5641_v40, %v5641_v40  ;;  %v14396_v39 = vld [vmem:[#allocation11 + $0x7e0] ss:$36 sps:$4 sm:$0xff]   ;;  %v14405_v46 = vld [vmem:[#allocation11 + $0xa68] ss:$36 sps:$4 sm:$0xff]  }
 0x3b3   :  { %v5270_v49 = vpop.f32.mrf.mxu0  ;;  %9755 = vmatprep.subr.bf16.mxu0 %v14356_v44  ;;  %9784 = vmatprep.subr.bf16.mxu1 %v14359_v11  ;;  %v14407_v44 = vld [vmem:[#allocation11 + $0xa6c] ss:$36 sps:$4 sm:$0xff]   ;;  %v14402_v11 = vld [vmem:[#allocation11 + $0x798] ss:$36 sps:$4 sm:$0xff]  }
 0x3b4   :  { %v14408_v49 = vld [vmem:[#allocation11 + $0x750] ss:$36 sps:$4 sm:$0xff]  }
 0x3b6   :  { %9756 = vmatpush2.bf16.msra.mxu0 %v14354_v28  ;;  %9785 = vmatpush1.bf16.msra.mxu1 %v14357_v22  ;;  %v14410_v28 = vld [vmem:[#allocation11 + $0x754] ss:$36 sps:$4 sm:$0xff]   ;;  %v14413_v22 = vld [vmem:[#allocation11 + $0xa24] ss:$36 sps:$4 sm:$0xff]  }
 0x3b7   :  { %9757 = vmatprep.subr.bf16.mxu0 %v14362_v50  ;;  %9786 = vmatprep.subr.bf16.mxu1 %v14365_v51  ;;  %v14411_v50 = vld [vmem:[#allocation11 + $0xa20] ss:$36 sps:$4 sm:$0xff]   ;;  %v14416_v51 = vld [vmem:[#allocation11 + $0x70c] ss:$36 sps:$4 sm:$0xff]  }
 0x3ba   :  { %9758 = vmatpush2.bf16.msra.mxu0 %v14360_v31  ;;  %9787 = vmatpush1.bf16.msra.mxu1 %v14363_v53  ;;  %v14419_v31 = vld [vmem:[#allocation11 + $0x9dc] ss:$36 sps:$4 sm:$0xff]   ;;  %v14414_v53 = vld [vmem:[#allocation11 + $0x708] ss:$36 sps:$4 sm:$0xff]  }
 0x3bb   :  { %9759 = vmatprep.subr.bf16.mxu0 %v14368_v55  ;;  %9788 = vmatprep.subr.bf16.mxu1 %v14371_v54  ;;  %v14417_v55 = vld [vmem:[#allocation11 + $0x9d8] ss:$36 sps:$4 sm:$0xff]   ;;  %v14422_v54 = vld [vmem:[#allocation11 + $0x6c4] ss:$36 sps:$4 sm:$0xff]  }
 0x3be   :  { %9760 = vmatpush2.bf16.msra.mxu0 %v14366_v47  ;;  %9789 = vmatpush1.bf16.msra.mxu1 %v14369_v56  ;;  %v14425_v47 = vld [vmem:[#allocation11 + $0x994] ss:$36 sps:$4 sm:$0xff]   ;;  %v14420_v56 = vld [vmem:[#allocation11 + $0x6c0] ss:$36 sps:$4 sm:$0xff]  }
 0x3bf   :  { %9761 = vmatprep.subr.bf16.mxu0 %v14374_v59  ;;  %9790 = vmatprep.subr.bf16.mxu1 %v14377_v14  ;;  %v14423_v59 = vld [vmem:[#allocation11 + $0x990] ss:$36 sps:$4 sm:$0xff]   ;;  %v5638_v14 = vmax.f32 %v15774_v37, 0.0 }
 0x3c0   :  { %v14435_v37 = vld [vmem:[#allocation11 + $0xf30] ss:$36 sps:$4 sm:$0xff]  }
 0x3c1   :  { %v15839_v48 = vpack.c.bf16 %v5638_v14, %v5638_v14  ;;  %v5640_v14 = vmax.f32 %v15801_v10, 0.0 }
 0x3c2   :  { %9762 = vmatpush2.bf16.msra.mxu0 %v14372_v61  ;;  %9791 = vmatpush1.bf16.msra.mxu1 %v14375_v42  ;;  %v14428_v61 = vld [vmem:[#allocation11 + $0x94c] ss:$36 sps:$4 sm:$0xff]   ;;  %v14431_v42 = vld [vmem:[#allocation11 + $0xf7c] ss:$36 sps:$4 sm:$0xff]  }
 0x3c3   :  { %9763 = vmatprep.subr.bf16.mxu0 %v14380_v62  ;;  %9792 = vmatprep.subr.bf16.mxu1 %v14383_v63  ;;  %v14426_v62 = vld [vmem:[#allocation11 + $0x948] ss:$36 sps:$4 sm:$0xff]   ;;  %v14429_v63 = vld [vmem:[#allocation11 + $0xf78] ss:$36 sps:$4 sm:$0xff]  }
 0x3c5   :  { %v5306_v6 = vpop.f32.mrf.mxu1 }
 0x3c6   :  { %v15826_v7 = vadd.f32 %v5306_v6, %v5266_v5  ;;  %9764 = vmatpush2.bf16.msra.mxu0 %v14378_v1  ;;  %9793 = vmatpush2.bf16.msra.mxu1 %v14381_v2  ;;  %v14432_v1 = vld [vmem:[#allocation11 + $0x900] ss:$36 sps:$4 sm:$0xff]   ;;  %v14441_v5 = vld [vmem:[#allocation11 + $0xee8] ss:$36 sps:$4 sm:$0xff]   ;;  %v14446_v6 = vld [vmem:[#allocation11 + $0xcf4] ss:$36 sps:$4 sm:$0xff]  }
 0x3c7   :  { %v5308_v16 = vpop.f32.mrf.mxu1  ;;  %9765 = vmatprep.subr.bf16.mxu0 %v14386_v26  ;;  %9794 = vmatprep.subr.bf16.mxu1 %v14389_v4  ;;  %v14440_v2 = vld [vmem:[#allocation11 + $0xd3c] ss:$36 sps:$4 sm:$0xff]   ;;  %v14443_v26 = vld [vmem:[#allocation11 + $0xeec] ss:$36 sps:$4 sm:$0xff]  }
 0x3c8   :  { %v15829_v19 = vadd.f32 %v5308_v16, %v5268_v34  ;;  %v14438_v4 = vld [vmem:[#allocation11 + $0xd38] ss:$36 sps:$4 sm:$0xff]   ;;  %v14449_v34 = vld [vmem:[#allocation11 + $0xea4] ss:$36 sps:$4 sm:$0xff]  }
 0x3c9   :  { %v5310_v13 = vpop.f32.mrf.mxu1 }
 0x3ca   :  { %9766 = vmatpush2.bf16.msra.mxu0 %v14384_v9  ;;  %9795 = vmatpush2.bf16.msra.mxu1 %v14387_v45  ;;  %v14444_v45 = vld [vmem:[#allocation11 + $0xcf0] ss:$36 sps:$4 sm:$0xff]   ;;  %v14450_v13 = vld [vmem:[#allocation11 + $0xca8] ss:$36 sps:$4 sm:$0xff]  }
 0x3cb   :  { %v5311_v8 = vpop.f32.mrf.mxu1  ;;  %9796 = vmatprep.subr.bf16.mxu1 %v14392_v3  ;;  %9817 = vmatprep.subr.bf16.mxu0 %v14395_v18  ;;  %v14452_v3 = vld [vmem:[#allocation11 + $0xcac] ss:$36 sps:$4 sm:$0xff]   ;;  %v14455_v18 = vld [vmem:[#allocation11 + $0xe5c] ss:$36 sps:$4 sm:$0xff]  }
 0x3cc   :  { %v14458_v8 = vld [vmem:[#allocation11 + $0xc64] ss:$36 sps:$4 sm:$0xff]  }
 0x3cd   :  { %9768 = vmatmul.mubr.bf16.vlgmr.msra.gmra.mxu0 %v15832_v32 }
 0x3ce   :  { %9797 = vmatpush2.bf16.msra.mxu1 %v14390_v20  ;;  %9818 = vmatpush1.bf16.msra.mxu0 %v14393_v24  ;;  %v14453_v20 = vld [vmem:[#allocation11 + $0xe58] ss:$36 sps:$4 sm:$0xff]  }
 0x3cf   :  { %9849 = vmatprep.mubr.bf16.mxu0 %v15834_v33  ;;  %9798 = vmatprep.subr.bf16.mxu1 %v14398_v41  ;;  %v14461_v41 = vld [vmem:[#allocation11 + $0xe14] ss:$36 sps:$4 sm:$0xff]  }
 0x3d0   :  { %9819 = vmatprep.subr.bf16.mxu0 %v14401_v36  ;;  %v14456_v36 = vld [vmem:[#allocation11 + $0xc60] ss:$36 sps:$4 sm:$0xff]  }
 0x3d2   :  { %9799 = vmatpush2.bf16.msra.mxu1 %v14396_v39  ;;  %9820 = vmatpush1.bf16.msra.mxu0 %v14399_v52  ;;  %v14459_v39 = vld [vmem:[#allocation11 + $0xe10] ss:$36 sps:$4 sm:$0xff]   ;;  %v14464_v52 = vld [vmem:[#allocation11 + $0xc1c] ss:$36 sps:$4 sm:$0xff]  }
 0x3d3   :  { %9800 = vmatprep.subr.bf16.mxu1 %v14404_v27  ;;  %9821 = vmatprep.subr.bf16.mxu0 %v14407_v44  ;;  %v14467_v27 = vld [vmem:[#allocation11 + $0xdcc] ss:$36 sps:$4 sm:$0xff]   ;;  %v14462_v44 = vld [vmem:[#allocation11 + $0xc18] ss:$36 sps:$4 sm:$0xff]  }
 0x3d6   :  { %9801 = vmatpush2.bf16.msra.mxu1 %v14402_v11  ;;  %9822 = vmatpush1.bf16.msra.mxu0 %v14405_v46  ;;  %v14465_v11 = vld [vmem:[#allocation11 + $0xdc8] ss:$36 sps:$4 sm:$0xff]   ;;  %v14470_v46 = vld [vmem:[#allocation11 + $0xbd4] ss:$36 sps:$4 sm:$0xff]  }
 0x3d7   :  { %9802 = vmatprep.subr.bf16.mxu1 %v14410_v28  ;;  %9823 = vmatprep.subr.bf16.mxu0 %v14413_v22  ;;  %v14473_v28 = vld [vmem:[#allocation11 + $0xd84] ss:$36 sps:$4 sm:$0xff]   ;;  %v14468_v22 = vld [vmem:[#allocation11 + $0xbd0] ss:$36 sps:$4 sm:$0xff]  }
 0x3da   :  { %9803 = vmatpush2.bf16.msra.mxu1 %v14408_v49  ;;  %9824 = vmatpush1.bf16.msra.mxu0 %v14411_v50  ;;  %v14471_v49 = vld [vmem:[#allocation11 + $0xd80] ss:$36 sps:$4 sm:$0xff]   ;;  %v14476_v50 = vld [vmem:[#allocation11 + $0xb8c] ss:$36 sps:$4 sm:$0xff]  }
 0x3db   :  { %9804 = vmatprep.subr.bf16.mxu1 %v14416_v51  ;;  %9825 = vmatprep.subr.bf16.mxu0 %v14419_v31  ;;  %v14479_v51 = vld [vmem:[#allocation11 + $0x11bc] ss:$36 sps:$4 sm:$0xff]   ;;  %v14474_v31 = vld [vmem:[#allocation11 + $0xb88] ss:$36 sps:$4 sm:$0xff]  }
 0x3de   :  { %9805 = vmatpush2.bf16.msra.mxu1 %v14414_v53  ;;  %9826 = vmatpush1.bf16.msra.mxu0 %v14417_v55  ;;  %v14477_v53 = vld [vmem:[#allocation11 + $0x11b8] ss:$36 sps:$4 sm:$0xff]   ;;  %v14482_v55 = vld [vmem:[#allocation11 + $0xb44] ss:$36 sps:$4 sm:$0xff]  }
 0x3df   :  { %9806 = vmatprep.subr.bf16.mxu1 %v14422_v54  ;;  %9827 = vmatprep.subr.bf16.mxu0 %v14425_v47  ;;  %v14485_v54 = vld [vmem:[#allocation11 + $0x1174] ss:$36 sps:$4 sm:$0xff]  }
 0x3e2   :  { %9807 = vmatpush2.bf16.msra.mxu1 %v14420_v56  ;;  %9828 = vmatpush1.bf16.msra.mxu0 %v14423_v59  ;;  %v14480_v56 = vld [vmem:[#allocation11 + $0xb40] ss:$36 sps:$4 sm:$0xff]   ;;  %v14483_v59 = vld [vmem:[#allocation11 + $0x1170] ss:$36 sps:$4 sm:$0xff]  }
 0x3e3   :  { %9829 = vmatprep.subr.bf16.mxu0 %v14428_v61  ;;  %9858 = vmatprep.subr.bf16.mxu1 %v14431_v42  ;;  %v14488_v42 = vld [vmem:[#allocation11 + $0x112c] ss:$36 sps:$4 sm:$0xff]  }
 0x3e5   :  { %9809 = vmatmul.mubr.bf16.vlgmr.msra.gmra.mxu1 %v15839_v48 }
 0x3e6   :  { %9830 = vmatpush1.bf16.msra.mxu0 %v14426_v62  ;;  %9859 = vmatpush1.bf16.msra.mxu1 %v14429_v63  ;;  %v14536_v62 = vld [vmem:[#allocation11 + $0x13fc] ss:$36 sps:$4 sm:$0xff]  }
 0x3e7   :  { %9831 = vmatprep.subr.bf16.mxu0 %v14434_v57  ;;  %9860 = vmatprep.subr.bf16.mxu1 %v14437_v21  ;;  %v14486_v57 = vld [vmem:[#allocation11 + $0x1128] ss:$36 sps:$4 sm:$0xff]   ;;  %v14534_v21 = vld [vmem:[#allocation11 + $0x13f8] ss:$36 sps:$4 sm:$0xff]  }
 0x3ea   :  { %9832 = vmatpush1.bf16.msra.mxu0 %v14432_v1  ;;  %9861 = vmatpush1.bf16.msra.mxu1 %v14435_v37  ;;  %v15847_v1 = vpack.c.bf16 %v5640_v14, %v5640_v14 }
 0x3eb   :  { %9833 = vmatprep.subr.bf16.mxu0 %v14440_v2  ;;  %9862 = vmatprep.subr.bf16.mxu1 %v14443_v26  ;;  %v14491_v2 = vld [vmem:[#allocation11 + $0x10e4] ss:$36 sps:$4 sm:$0xff]   ;;  %v14542_v26 = vld [vmem:[#allocation11 + $0x13b4] ss:$36 sps:$4 sm:$0xff]  }
 0x3ed   :  { %v15842_v9 = vpop.f32.mrf.mxu0 }
 0x3ee   :  { %9834 = vmatpush2.bf16.msra.mxu0 %v14438_v4  ;;  %9863 = vmatpush1.bf16.msra.mxu1 %v14441_v5 }
 0x3ef   :  { %v15844_v16 = vpop.f32.mrf.mxu0  ;;  %9835 = vmatprep.subr.bf16.mxu0 %v14446_v6  ;;  %9864 = vmatprep.subr.bf16.mxu1 %v14449_v34  ;;  %v14489_v6 = vld [vmem:[#allocation11 + $0x10e0] ss:$36 sps:$4 sm:$0xff]   ;;  %v14540_v34 = vld [vmem:[#allocation11 + $0x13b0] ss:$36 sps:$4 sm:$0xff]  }
 0x3f0   :  { %v5350_v10 = vadd.f32 %v15844_v16, %v15829_v19  ;;  %v14492_v19 = vld [vmem:[#allocation11 + $0x1098] ss:$36 sps:$4 sm:$0xff]  }
 0x3f1   :  { %v5351_v40 = vpop.f32.mrf.mxu0 }
 0x3f2   :  { %9836 = vmatpush2.bf16.msra.mxu0 %v14444_v45  ;;  %9865 = vmatpush1.bf16.msra.mxu1 %v14447_v12  ;;  %v14494_v12 = vld [vmem:[#allocation11 + $0x109c] ss:$36 sps:$4 sm:$0xff]  }
 0x3f3   :  { %v5352_v24 = vpop.f32.mrf.mxu0  ;;  %9837 = vmatprep.subr.bf16.mxu0 %v14452_v3  ;;  %9866 = vmatprep.subr.bf16.mxu1 %v14455_v18  ;;  %v14548_v3 = vld [vmem:[#allocation11 + $0x136c] ss:$36 sps:$4 sm:$0xff]  }
 0x3f4   :  { %v14546_v24 = vld [vmem:[#allocation11 + $0x1368] ss:$36 sps:$4 sm:$0xff]  }
 0x3f6   :  { %9838 = vmatpush2.bf16.msra.mxu0 %v14450_v13  ;;  %9867 = vmatpush1.bf16.msra.mxu1 %v14453_v20  ;;  %v14497_v20 = vld [vmem:[#allocation11 + $0x1054] ss:$36 sps:$4 sm:$0xff]  }
 0x3f7   :  { %9839 = vmatprep.subr.bf16.mxu0 %v14458_v8  ;;  %9868 = vmatprep.subr.bf16.mxu1 %v14461_v41  ;;  %v14554_v41 = vld [vmem:[#allocation11 + $0x1324] ss:$36 sps:$4 sm:$0xff]  }
 0x3fa   :  { %9840 = vmatpush2.bf16.msra.mxu0 %v14456_v36  ;;  %9869 = vmatpush1.bf16.msra.mxu1 %v14459_v39  ;;  %v14495_v36 = vld [vmem:[#allocation11 + $0x1050] ss:$36 sps:$4 sm:$0xff]   ;;  %v5348_v39 = vadd.f32 %v15842_v9, %v15826_v7  ;;  %v14506_v7 = vld [vmem:[#allocation11 + $0x204] ss:$36 sps:$4 sm:$0xff]  }
 0x3fb   :  { %9841 = vmatprep.subr.bf16.mxu0 %v14464_v52  ;;  %9870 = vmatprep.subr.bf16.mxu1 %v14467_v27  ;;  %v14500_v52 = vld [vmem:[#allocation11 + $0x100c] ss:$36 sps:$4 sm:$0xff]   ;;  %v14552_v27 = vld [vmem:[#allocation11 + $0x1320] ss:$36 sps:$4 sm:$0xff]  }
 0x3fc   :  { %v14564_v9 = vld [vmem:[#allocation11 + $0x1290] ss:$36 sps:$4 sm:$0xff]  }
 0x3fe   :  { %9842 = vmatpush2.bf16.msra.mxu0 %v14462_v44  ;;  %9871 = vmatpush1.bf16.msra.mxu1 %v14465_v11  ;;  %v14560_v44 = vld [vmem:[#allocation11 + $0x12dc] ss:$36 sps:$4 sm:$0xff]  }
 0x3ff   :  { %9843 = vmatprep.subr.bf16.mxu0 %v14470_v46  ;;  %9872 = vmatprep.subr.bf16.mxu1 %v14473_v28  ;;  %v14498_v46 = vld [vmem:[#allocation11 + $0x1008] ss:$36 sps:$4 sm:$0xff]  }
 0x402   :  { %9844 = vmatpush2.bf16.msra.mxu0 %v14468_v22  ;;  %9873 = vmatpush1.bf16.msra.mxu1 %v14471_v49  ;;  %v14503_v22 = vld [vmem:[#allocation11 + $0xfc4] ss:$36 sps:$4 sm:$0xff]   ;;  %v14558_v49 = vld [vmem:[#allocation11 + $0x12d8] ss:$36 sps:$4 sm:$0xff]  }
 0x403   :  { %9845 = vmatprep.subr.bf16.mxu0 %v14476_v50  ;;  %9874 = vmatprep.subr.bf16.mxu1 %v14479_v51  ;;  %v14566_v50 = vld [vmem:[#allocation11 + $0x1294] ss:$36 sps:$4 sm:$0xff]   ;;  %v14501_v51 = vld [vmem:[#allocation11 + $0xfc0] ss:$36 sps:$4 sm:$0xff]  }
 0x405   :  { %v5388_v47 = vpop.f32.mrf.mxu1 }
 0x406   :  { %9846 = vmatpush2.bf16.msra.mxu0 %v14474_v31  ;;  %9875 = vmatpush2.bf16.msra.mxu1 %v14477_v53  ;;  %v5389_v11 = vadd.f32 %v5388_v47, %v5348_v39  ;;  %v14572_v53 = vld [vmem:[#allocation11 + $0x124c] ss:$36 sps:$4 sm:$0xff]   ;;  %v14509_v47 = vld [vmem:[#allocation11 + $0x1bc] ss:$36 sps:$4 sm:$0xff]  }
 0x407   :  { %v5390_v61 = vpop.f32.mrf.mxu1  ;;  %9847 = vmatprep.subr.bf16.mxu0 %v14482_v55  ;;  %9876 = vmatprep.subr.bf16.mxu1 %v14485_v54  ;;  %v14504_v55 = vld [vmem:[#allocation11 + $0x200] ss:$36 sps:$4 sm:$0xff]   ;;  %v14531_v39 = vld [vmem:[#allocation11 + $0x3f8] ss:$36 sps:$4 sm:$0xff]  }
 0x408   :  { %v5391_v5 = vadd.f32 %v5390_v61, %v5350_v10  ;;  %v14507_v61 = vld [vmem:[#allocation11 + $0x1b8] ss:$36 sps:$4 sm:$0xff]  }
 0x409   :  { %v5392_v63 = vpop.f32.mrf.mxu1 }
 0x40a   :  { %9848 = vmatpush2.bf16.msra.mxu0 %v14480_v56  ;;  %9877 = vmatpush2.bf16.msra.mxu1 %v14483_v59  ;;  %v14570_v56 = vld [vmem:[#allocation11 + $0x1248] ss:$36 sps:$4 sm:$0xff]   ;;  %v14576_v63 = vld [vmem:[#allocation11 + $0x1200] ss:$36 sps:$4 sm:$0xff]  }
 0x40b   :  { %v5393_v37 = vpop.f32.mrf.mxu1  ;;  %9878 = vmatprep.subr.bf16.mxu1 %v14488_v42  ;;  %9899 = vmatprep.subr.bf16.mxu0 %v14536_v62  ;;  %v14578_v59 = vld [vmem:[#allocation11 + $0x1204] ss:$36 sps:$4 sm:$0xff]   ;;  %v14512_v62 = vld [vmem:[#allocation11 + $0x174] ss:$36 sps:$4 sm:$0xff]  }
 0x40c   :  { %v14510_v37 = vld [vmem:[#allocation11 + $0x170] ss:$36 sps:$4 sm:$0xff]  }
 0x40d   :  { %v5429_v4 = vpop.f32.mrf.mxu0  ;;  %9850 = vmatmul.mubr.bf16.vlgmr.msra.gmra.mxu0 %v15847_v1 }
 0x40e   :  { %9879 = vmatpush2.bf16.msra.mxu1 %v14486_v57  ;;  %9900 = vmatpush1.bf16.msra.mxu0 %v14534_v21  ;;  %v5430_v28 = vadd.f32 %v5429_v4, %v5389_v11  ;;  %v14584_v57 = vld [vmem:[#allocation11 + $0x684] ss:$36 sps:$4 sm:$0xff]   ;;  %v14537_v11 = vld [vmem:[#allocation11 + $0x3b0] ss:$36 sps:$4 sm:$0xff]  }
 0x40f   :  { %v5431_v45 = vpop.f32.mrf.mxu0  ;;  %9880 = vmatprep.subr.bf16.mxu1 %v14491_v2  ;;  %9901 = vmatprep.subr.bf16.mxu0 %v14542_v26  ;;  %v14515_v26 = vld [vmem:[#allocation11 + $0x12c] ss:$36 sps:$4 sm:$0xff]  }
 0x410   :  { %v5432_v18 = vadd.f32 %v5431_v45, %v5391_v5  ;;  %9931 = vmatprep.mubr.bf16.mxu0 %v15549_v0  ;;  %v5642_v31 = vmax.f32 %v5430_v28, 0.0  ;;  %v14513_v4 = vld [vmem:[#allocation11 + $0x128] ss:$36 sps:$4 sm:$0xff]   ;;  %v14516_v45 = vld [vmem:[#allocation11 + $0xe0] ss:$36 sps:$4 sm:$0xff]  }
 0x411   :  { %v5433_v40 = vpop.f32.mrf.mxu0  ;;  %v14545_v28 = vld [vmem:[#allocation11 + $0x36c] ss:$36 sps:$4 sm:$0xff]  }
 0x412   :  { %v5643_v13 = vmax.f32 %v5432_v18, 0.0  ;;  %9881 = vmatpush2.bf16.msra.mxu1 %v14489_v6  ;;  %9902 = vmatpush1.bf16.msra.mxu0 %v14540_v34  ;;  %v15858_v54 = vpack.c.bf16 %v5642_v31, %v5642_v31  ;;  %v14518_v6 = vld [vmem:[#allocation11 + $0xe4] ss:$36 sps:$4 sm:$0xff]   ;;  %v14519_v18 = vld [vmem:[#allocation11 + $0x98] ss:$36 sps:$4 sm:$0xff]  }
 0x413   :  { %v5434_v16 = vpop.f32.mrf.mxu0  ;;  %9882 = vmatprep.subr.bf16.mxu1 %v14494_v12  ;;  %9903 = vmatprep.subr.bf16.mxu0 %v14548_v3  ;;  %v14521_v3 = vld [vmem:[#allocation11 + $0x9c] ss:$36 sps:$4 sm:$0xff]   ;;  %v14524_v40 = vld [vmem:[#allocation11 + $0x54] ss:$36 sps:$4 sm:$0xff]  }
 0x414   :  { %v15853_v8 = vpack.c.bf16 %v5643_v13, %v5643_v13  ;;  %v14522_v13 = vld [vmem:[#allocation11 + $0x50] ss:$36 sps:$4 sm:$0xff]   ;;  %v14525_v16 = vld [vmem:[#allocation11 + $0x8] ss:$36 sps:$4 sm:$0xff]  }
 0x416   :  { %9883 = vmatpush2.bf16.msra.mxu1 %v14492_v19  ;;  %9890 = vmatprep.mubr.bf16.mxu1 %v15853_v8  ;;  %v14527_v19 = vld [vmem:[#allocation11 + $0xc] ss:$36 sps:$4 sm:$0xff]  }
 0x417   :  { %9884 = vmatprep.subr.bf16.mxu1 %v14497_v20  ;;  %9904 = vmatpush1.bf16.msra.mxu0 %v14546_v24  ;;  %v14530_v20 = vld [vmem:[#allocation11 + $0x444] ss:$36 sps:$4 sm:$0xff]  }
 0x418   :  { %9905 = vmatprep.subr.bf16.mxu0 %v14554_v41  ;;  %v14528_v24 = vld [vmem:[#allocation11 + $0x440] ss:$36 sps:$4 sm:$0xff]  }
 0x419   :  { %v14533_v41 = vld [vmem:[#allocation11 + $0x3fc] ss:$36 sps:$4 sm:$0xff]  }
 0x41a   :  { %9885 = vmatpush2.bf16.msra.mxu1 %v14495_v36 }
 0x41b   :  { %9886 = vmatprep.subr.bf16.mxu1 %v14500_v52  ;;  %9906 = vmatpush1.bf16.msra.mxu0 %v14552_v27  ;;  %v14539_v27 = vld [vmem:[#allocation11 + $0x3b4] ss:$36 sps:$4 sm:$0xff]  }
 0x41c   :  { %9907 = vmatprep.subr.bf16.mxu0 %v14560_v44 }
 0x41e   :  { %9887 = vmatpush2.bf16.msra.mxu1 %v14498_v46 }
 0x41f   :  { %9888 = vmatprep.subr.bf16.mxu1 %v14503_v22  ;;  %9908 = vmatpush1.bf16.msra.mxu0 %v14558_v49  ;;  %v14543_v49 = vld [vmem:[#allocation11 + $0x368] ss:$36 sps:$4 sm:$0xff]  }
 0x420   :  { %9909 = vmatprep.subr.bf16.mxu0 %v14566_v50 }
 0x422   :  { %9889 = vmatpush2.bf16.msra.mxu1 %v14501_v51  ;;  %v14551_v51 = vld [vmem:[#allocation11 + $0x324] ss:$36 sps:$4 sm:$0xff]  }
 0x423   :  { %9940 = vmatprep.subr.bf16.mxu1 %v14506_v7  ;;  %9910 = vmatpush1.bf16.msra.mxu0 %v14564_v9  ;;  %v14549_v7 = vld [vmem:[#allocation11 + $0x320] ss:$36 sps:$4 sm:$0xff]  }
 0x424   :  { %9911 = vmatprep.subr.bf16.mxu0 %v14572_v53  ;;  %v14557_v53 = vld [vmem:[#allocation11 + $0x2dc] ss:$36 sps:$4 sm:$0xff]  }
 0x425   :  { %v15860_v14 = vpop.f32.mrf.mxu1  ;;  %9891 = vmatmul.mubr.bf16.vlgmr.msra.gmra.mxu1 %v15858_v54 }
 0x426   :  { %9941 = vmatpush1.bf16.msra.mxu1 %v14504_v55  ;;  %9972 = vmatprep.mubr.bf16.mxu1 %v15810_v60  ;;  %v14555_v55 = vld [vmem:[#allocation11 + $0x2d8] ss:$36 sps:$4 sm:$0xff]  }
 0x427   :  { %v15864_v42 = vpop.f32.mrf.mxu1  ;;  %9942 = vmatprep.subr.bf16.mxu1 %v14509_v47  ;;  %9912 = vmatpush1.bf16.msra.mxu0 %v14570_v56  ;;  %v14563_v47 = vld [vmem:[#allocation11 + $0x294] ss:$36 sps:$4 sm:$0xff]  }
 0x428   :  { %9913 = vmatprep.subr.bf16.mxu0 %v14578_v59  ;;  %v12992_v56 = vadd.f32 %v15864_v42, %v15860_v14  ;;  %v14561_v59 = vld [vmem:[#allocation11 + $0x290] ss:$36 sps:$4 sm:$0xff]  }
 0x429   :  { %v12993_v21 = vpop.f32.mrf.mxu1 }
 0x42a   :  { %9943 = vmatpush1.bf16.msra.mxu1 %v14507_v61  ;;  %v11600_v61 = vld [vmem:[#allocation10 + $0x8] ss:$0 sm:$0xff] }
 0x42b   :  { %v12994_v2 = vpop.f32.mrf.mxu1  ;;  %9944 = vmatprep.subr.bf16.mxu1 %v14512_v62  ;;  %9914 = vmatpush1.bf16.msra.mxu0 %v14576_v63  ;;  %v14569_v62 = vld [vmem:[#allocation11 + $0x24c] ss:$36 sps:$4 sm:$0xff]  }
 0x42c   :  { %9981 = vmatprep.subr.bf16.mxu0 %v14584_v57  ;;  %v5471_v57 = vadd.f32 %v12992_v56, %v11600_v61  ;;  %v14575_v2 = vld [vmem:[#allocation11 + $0xb04] ss:$36 sps:$4 sm:$0xff]   ;;  %v14620_v56 = vld [vmem:[#allocation11 + $0x4d4] ss:$36 sps:$4 sm:$0xff]  }
 0x42d   :  { %v13012_v10 = vpop.f32.mrf.mxu0  ;;  %v14618_v61 = vld [vmem:[#allocation11 + $0x4d0] ss:$36 sps:$4 sm:$0xff]  }
 0x42e   :  { %9945 = vmatpush1.bf16.msra.mxu1 %v14510_v37  ;;  %v14567_v37 = vld [vmem:[#allocation11 + $0x248] ss:$36 sps:$4 sm:$0xff]  }
 0x42f   :  { %v13013_v5 = vpop.f32.mrf.mxu0  ;;  %9946 = vmatprep.subr.bf16.mxu1 %v14515_v26 }
 0x430   :  { %v13014_v63 = vadd.f32 %v13013_v5, %v13012_v10  ;;  %v14579_v10 = vld [vmem:[#allocation11 + $0xab8] ss:$36 sps:$4 sm:$0xff]  }
 0x431   :  { %v13015_v34 = vpop.f32.mrf.mxu0 }
 0x432   :  { %9947 = vmatpush1.bf16.msra.mxu1 %v14513_v4  ;;  %v5511_v26 = vadd.f32 %v13014_v63, %v5471_v57  ;;  %v14573_v34 = vld [vmem:[#allocation11 + $0xb00] ss:$36 sps:$4 sm:$0xff]   ;;  %v14626_v63 = vld [vmem:[#allocation11 + $0x48c] ss:$36 sps:$4 sm:$0xff]  }
 0x433   :  { %v13016_v12 = vpop.f32.mrf.mxu0  ;;  %9948 = vmatprep.subr.bf16.mxu1 %v14518_v6  ;;  %v14629_v57 = vld [vmem:[#allocation11 + $0xcfc] ss:$36 sps:$4 sm:$0xff]  }
 0x436   :  { %9949 = vmatpush1.bf16.msra.mxu1 %v14516_v45  ;;  %v14581_v45 = vld [vmem:[#allocation11 + $0xabc] ss:$36 sps:$4 sm:$0xff]  }
 0x437   :  { %9950 = vmatprep.subr.bf16.mxu1 %v14521_v3  ;;  %v14587_v3 = vld [vmem:[#allocation11 + $0xa74] ss:$36 sps:$4 sm:$0xff]  }
 0x43a   :  { %9951 = vmatpush1.bf16.msra.mxu1 %v14519_v18 }
 0x43b   :  { %9952 = vmatprep.subr.bf16.mxu1 %v14524_v40 }
 0x43e   :  { %9953 = vmatpush1.bf16.msra.mxu1 %v14522_v13  ;;  %v14582_v13 = vld [vmem:[#allocation11 + $0x680] ss:$36 sps:$4 sm:$0xff]  }
 0x43f   :  { %9954 = vmatprep.subr.bf16.mxu1 %v14527_v19 }
 0x442   :  { %9955 = vmatpush1.bf16.msra.mxu1 %v14525_v16  ;;  %v14585_v16 = vld [vmem:[#allocation11 + $0xa70] ss:$36 sps:$4 sm:$0xff]  }
 0x443   :  { %9956 = vmatprep.subr.bf16.mxu1 %v14530_v20  ;;  %v14590_v20 = vld [vmem:[#allocation11 + $0x63c] ss:$36 sps:$4 sm:$0xff]  }
 0x445   :  { %v13034_v36 = vpop.f32.mrf.mxu1 }
 0x446   :  { %9957 = vmatpush2.bf16.msra.mxu1 %v14528_v24 }
 0x447   :  { %v13035_v52 = vpop.f32.mrf.mxu1  ;;  %9958 = vmatprep.subr.bf16.mxu1 %v14533_v41  ;;  %v14593_v41 = vld [vmem:[#allocation11 + $0xa2c] ss:$36 sps:$4 sm:$0xff]  }
 0x448   :  { %v13036_v21 = vadd.f32 %v13035_v52, %v13034_v36  ;;  %v14588_v36 = vld [vmem:[#allocation11 + $0x638] ss:$36 sps:$4 sm:$0xff]  }
 0x449   :  { %v13037_v44 = vpop.f32.mrf.mxu1  ;;  %v14596_v52 = vld [vmem:[#allocation11 + $0x5f4] ss:$36 sps:$4 sm:$0xff]  }
 0x44a   :  { %9959 = vmatpush2.bf16.msra.mxu1 %v14531_v39  ;;  %v5551_v6 = vadd.f32 %v13036_v21, %v5511_v26  ;;  %v14591_v39 = vld [vmem:[#allocation11 + $0xa28] ss:$36 sps:$4 sm:$0xff]   ;;  %v14594_v44 = vld [vmem:[#allocation11 + $0x5f0] ss:$36 sps:$4 sm:$0xff]  }
 0x44b   :  { %v13038_v46 = vpop.f32.mrf.mxu1  ;;  %9960 = vmatprep.subr.bf16.mxu1 %v14539_v27  ;;  %v14599_v27 = vld [vmem:[#allocation11 + $0x9e4] ss:$36 sps:$4 sm:$0xff]   ;;  %v14635_v26 = vld [vmem:[#allocation11 + $0xcb4] ss:$36 sps:$4 sm:$0xff]  }
 0x44c   :  { %v14602_v46 = vld [vmem:[#allocation11 + $0x5ac] ss:$36 sps:$4 sm:$0xff]  }
 0x44d   :  { %v13056_v22 = vpop.f32.mrf.mxu0  ;;  %v14624_v21 = vld [vmem:[#allocation11 + $0x488] ss:$36 sps:$4 sm:$0xff]  }
 0x44e   :  { %9961 = vmatpush2.bf16.msra.mxu1 %v14537_v11  ;;  %v14597_v11 = vld [vmem:[#allocation11 + $0x9e0] ss:$36 sps:$4 sm:$0xff]  }
 0x44f   :  { %v13057_v50 = vpop.f32.mrf.mxu0  ;;  %9962 = vmatprep.subr.bf16.mxu1 %v14545_v28  ;;  %v14605_v28 = vld [vmem:[#allocation11 + $0x99c] ss:$36 sps:$4 sm:$0xff]  }
 0x450   :  { %v13058_v4 = vadd.f32 %v13057_v50, %v13056_v22  ;;  %v14600_v22 = vld [vmem:[#allocation11 + $0x5a8] ss:$36 sps:$4 sm:$0xff]  }
 0x451   :  { %v13059_v31 = vpop.f32.mrf.mxu0  ;;  %v14608_v50 = vld [vmem:[#allocation11 + $0x564] ss:$36 sps:$4 sm:$0xff]  }
 0x452   :  { %9963 = vmatpush2.bf16.msra.mxu1 %v14543_v49  ;;  %v5591_v14 = vadd.f32 %v13058_v4, %v5551_v6  ;;  %v14603_v49 = vld [vmem:[#allocation11 + $0x998] ss:$36 sps:$4 sm:$0xff]   ;;  %v14606_v31 = vld [vmem:[#allocation11 + $0x560] ss:$36 sps:$4 sm:$0xff]   ;;  %v14633_v6 = vld [vmem:[#allocation11 + $0xcb0] ss:$36 sps:$4 sm:$0xff]  }
 0x453   :  { %v13060_v9 = vpop.f32.mrf.mxu0  ;;  %9964 = vmatprep.subr.bf16.mxu1 %v14551_v51  ;;  %v14611_v51 = vld [vmem:[#allocation11 + $0x954] ss:$36 sps:$4 sm:$0xff]   ;;  %v14630_v4 = vld [vmem:[#allocation11 + $0x8c0] ss:$36 sps:$4 sm:$0xff]  }
 0x454   :  { %v14614_v9 = vld [vmem:[#allocation11 + $0x51c] ss:$36 sps:$4 sm:$0xff]  }
 0x456   :  { %9965 = vmatpush2.bf16.msra.mxu1 %v14549_v7  ;;  %v14609_v7 = vld [vmem:[#allocation11 + $0x950] ss:$36 sps:$4 sm:$0xff]  }
 0x457   :  { %9966 = vmatprep.subr.bf16.mxu1 %v14557_v53  ;;  %v14617_v53 = vld [vmem:[#allocation11 + $0x90c] ss:$36 sps:$4 sm:$0xff]  }
 0x45a   :  { %9967 = vmatpush2.bf16.msra.mxu1 %v14555_v55  ;;  %v14612_v55 = vld [vmem:[#allocation11 + $0x518] ss:$36 sps:$4 sm:$0xff]  }
 0x45b   :  { %9968 = vmatprep.subr.bf16.mxu1 %v14563_v47  ;;  %v14615_v47 = vld [vmem:[#allocation11 + $0x908] ss:$36 sps:$4 sm:$0xff]  }
 0x45e   :  { %9969 = vmatpush2.bf16.msra.mxu1 %v14561_v59  ;;  %v14623_v59 = vld [vmem:[#allocation11 + $0xd44] ss:$36 sps:$4 sm:$0xff]  }
 0x45f   :  { %9970 = vmatprep.subr.bf16.mxu1 %v14569_v62  ;;  %v14621_v62 = vld [vmem:[#allocation11 + $0xd40] ss:$36 sps:$4 sm:$0xff]  }
 0x462   :  { %9971 = vmatpush2.bf16.msra.mxu1 %v14567_v37  ;;  %v14627_v37 = vld [vmem:[#allocation11 + $0xcf8] ss:$36 sps:$4 sm:$0xff]  }
 0x463   :  { %10022 = vmatprep.subr.bf16.mxu1 %v14575_v2  ;;  %v14632_v2 = vld [vmem:[#allocation11 + $0x8c4] ss:$36 sps:$4 sm:$0xff]  }
 0x465   :  { %v5630_v42 = vpop.f32.mrf.mxu1  ;;  %9973 = vmatmul.mubr.bf16.vlgmr.msra.gmra.mxu1 %v15832_v32 }
 0x466   :  { %v5631_v12 = vadd.f32 %v5630_v42, %v5591_v14  ;;  %10023 = vmatpush1.bf16.msra.mxu1 %v14573_v34  ;;  %10054 = vmatprep.mubr.bf16.mxu1 %v15834_v33  ;;  %v14638_v34 = vld [vmem:[#allocation11 + $0x87c] ss:$36 sps:$4 sm:$0xff]  }
 0x467   :  { %v13291_v5 = vpop.f32.mrf.mxu1  ;;  %10024 = vmatprep.subr.bf16.mxu1 %v14581_v45  ;;  %v14641_v45 = vld [vmem:[#allocation11 + $0xc6c] ss:$36 sps:$4 sm:$0xff]   ;;  %v14636_v42 = vld [vmem:[#allocation11 + $0x878] ss:$36 sps:$4 sm:$0xff]  }
 0x468   :  { %v5644_v18 = vmax.f32 %v5631_v12, 0.0  ;;  %v14639_v12 = vld [vmem:[#allocation11 + $0xc68] ss:$36 sps:$4 sm:$0xff]  }
 0x469   :  { %v5633_v40 = vpop.f32.mrf.mxu1 }
 0x46a   :  { %v15870_v19 = vpack.c.bf16 %v5644_v18, %v5644_v18  ;;  %10025 = vmatpush1.bf16.msra.mxu1 %v14579_v10  ;;  %v14644_v10 = vld [vmem:[#allocation11 + $0x834] ss:$36 sps:$4 sm:$0xff]  }
 0x46b   :  { %v13292_v24 = vpop.f32.mrf.mxu1  ;;  %10026 = vmatprep.subr.bf16.mxu1 %v14587_v3  ;;  %v14647_v3 = vld [vmem:[#allocation11 + $0xc24] ss:$36 sps:$4 sm:$0xff]   ;;  %v14642_v40 = vld [vmem:[#allocation11 + $0x830] ss:$36 sps:$4 sm:$0xff]  }
 0x46c   :  { %9932 = vmatmul.mubr.bf16.vlgmr.msra.gmra.mxu0 %v15870_v19  ;;  %v14653_v24 = vld [vmem:[#allocation11 + $0xbdc] ss:$36 sps:$4 sm:$0xff]  }
 0x46d   :  { %9982 = vmatpush1.bf16.msra.mxu0 %v14582_v13  ;;  %10013 = vmatprep.mubr.bf16.mxu0 %v15820_v17  ;;  %v14645_v13 = vld [vmem:[#allocation11 + $0xc20] ss:$36 sps:$4 sm:$0xff]  }
 0x46e   :  { %10027 = vmatpush1.bf16.msra.mxu1 %v14585_v16  ;;  %9983 = vmatprep.subr.bf16.mxu0 %v14590_v20  ;;  %v14650_v16 = vld [vmem:[#allocation11 + $0x7ec] ss:$36 sps:$4 sm:$0xff]  }
 0x46f   :  { %10028 = vmatprep.subr.bf16.mxu1 %v14593_v41  ;;  %v14648_v41 = vld [vmem:[#allocation11 + $0x7e8] ss:$36 sps:$4 sm:$0xff]  }
 0x471   :  { %9984 = vmatpush1.bf16.msra.mxu0 %v14588_v36  ;;  %v14651_v36 = vld [vmem:[#allocation11 + $0xbd8] ss:$36 sps:$4 sm:$0xff]  }
 0x472   :  { %10029 = vmatpush1.bf16.msra.mxu1 %v14591_v39  ;;  %9985 = vmatprep.subr.bf16.mxu0 %v14596_v52  ;;  %v14656_v39 = vld [vmem:[#allocation11 + $0x7a4] ss:$36 sps:$4 sm:$0xff]   ;;  %v14659_v52 = vld [vmem:[#allocation11 + $0xb94] ss:$36 sps:$4 sm:$0xff]  }
 0x473   :  { %10030 = vmatprep.subr.bf16.mxu1 %v14599_v27  ;;  %v14654_v27 = vld [vmem:[#allocation11 + $0x7a0] ss:$36 sps:$4 sm:$0xff]  }
 0x475   :  { %9986 = vmatpush1.bf16.msra.mxu0 %v14594_v44  ;;  %v14657_v44 = vld [vmem:[#allocation11 + $0xb90] ss:$36 sps:$4 sm:$0xff]  }
 0x476   :  { %10031 = vmatpush1.bf16.msra.mxu1 %v14597_v11  ;;  %9987 = vmatprep.subr.bf16.mxu0 %v14602_v46  ;;  %v14662_v11 = vld [vmem:[#allocation11 + $0x75c] ss:$36 sps:$4 sm:$0xff]   ;;  %v14665_v46 = vld [vmem:[#allocation11 + $0xb4c] ss:$36 sps:$4 sm:$0xff]  }
 0x477   :  { %10032 = vmatprep.subr.bf16.mxu1 %v14605_v28  ;;  %v15874_v28 = vld [vmem:[#allocation13] sm:$0xff] }
 0x479   :  { %9988 = vmatpush1.bf16.msra.mxu0 %v14600_v22  ;;  %v14660_v22 = vld [vmem:[#allocation11 + $0x758] ss:$36 sps:$4 sm:$0xff]  }
 0x47a   :  { %10033 = vmatpush1.bf16.msra.mxu1 %v14603_v49  ;;  %9989 = vmatprep.subr.bf16.mxu0 %v14608_v50  ;;  %v14663_v49 = vld [vmem:[#allocation11 + $0xb48] ss:$36 sps:$4 sm:$0xff]   ;;  %v14668_v50 = vld [vmem:[#allocation11 + $0x714] ss:$36 sps:$4 sm:$0xff]  }
 0x47b   :  { %10034 = vmatprep.subr.bf16.mxu1 %v14611_v51  ;;  %v14671_v51 = vld [vmem:[#allocation11 + $0x1404] ss:$36 sps:$4 sm:$0xff]  }
 0x47d   :  { %9990 = vmatpush1.bf16.msra.mxu0 %v14606_v31  ;;  %v6381_v31 = vrot.slane %v15874_v28, %v15655_v29  ;;  %v14675_v29 = vld [vmem:[#allocation11 + $0x13b8] ss:$36 sps:$4 sm:$0xff]  }
 0x47e   :  { %10035 = vmatpush1.bf16.msra.mxu1 %v14609_v7  ;;  %9991 = vmatprep.subr.bf16.mxu0 %v14614_v9  ;;  %v14666_v7 = vld [vmem:[#allocation11 + $0x710] ss:$36 sps:$4 sm:$0xff]   ;;  %v6385_v9 = vrot.slane %v15874_v28, %v15658_v30 }
 0x47f   :  { %10036 = vmatprep.subr.bf16.mxu1 %v14617_v53  ;;  %v14669_v53 = vld [vmem:[#allocation11 + $0x1400] ss:$36 sps:$4 sm:$0xff]  }
 0x481   :  { %9992 = vmatpush1.bf16.msra.mxu0 %v14612_v55  ;;  %v14674_v55 = vld [vmem:[#allocation11 + $0x6cc] ss:$36 sps:$4 sm:$0xff]  }
 0x482   :  { %10037 = vmatpush1.bf16.msra.mxu1 %v14615_v47  ;;  %9993 = vmatprep.subr.bf16.mxu0 %v14620_v56  ;;  %v14677_v47 = vld [vmem:[#allocation11 + $0x13bc] ss:$36 sps:$4 sm:$0xff]  }
 0x483   :  { %10038 = vmatprep.subr.bf16.mxu1 %v14623_v59 }
 0x485   :  { %9994 = vmatpush1.bf16.msra.mxu0 %v14618_v61  ;;  %v14672_v61 = vld [vmem:[#allocation11 + $0x6c8] ss:$36 sps:$4 sm:$0xff]  }
 0x486   :  { %10039 = vmatpush2.bf16.msra.mxu1 %v14621_v62  ;;  %9995 = vmatprep.subr.bf16.mxu0 %v14626_v63 }
 0x487   :  { %10040 = vmatprep.subr.bf16.mxu1 %v14629_v57  ;;  %v14680_v57 = vld [vmem:[#allocation11 + $0xf84] ss:$36 sps:$4 sm:$0xff]  }
 0x489   :  { %9996 = vmatpush1.bf16.msra.mxu0 %v14624_v21  ;;  %v14683_v21 = vld [vmem:[#allocation11 + $0x1374] ss:$36 sps:$4 sm:$0xff]  }
 0x48a   :  { %10041 = vmatpush2.bf16.msra.mxu1 %v14627_v37  ;;  %9997 = vmatprep.subr.bf16.mxu0 %v14632_v2 }
 0x48b   :  { %10042 = vmatprep.subr.bf16.mxu1 %v14635_v26  ;;  %v14678_v26 = vld [vmem:[#allocation11 + $0xf80] ss:$36 sps:$4 sm:$0xff]  }
 0x48d   :  { %9998 = vmatpush2.bf16.msra.mxu0 %v14630_v4  ;;  %v9769_v14 = vpop.f32.mrf.mxu0  ;;  %v14681_v4 = vld [vmem:[#allocation11 + $0x1370] ss:$36 sps:$4 sm:$0xff]  }
 0x48e   :  { %10043 = vmatpush2.bf16.msra.mxu1 %v14633_v6  ;;  %9999 = vmatprep.subr.bf16.mxu0 %v14638_v34  ;;  %v9770_v56 = vadd.f32 %v9769_v14, %v6381_v31  ;;  %v14686_v6 = vld [vmem:[#allocation11 + $0xf3c] ss:$36 sps:$4 sm:$0xff]   ;;  %v14720_v31 = vld [vmem:[#allocation11 + $0xd88] ss:$36 sps:$4 sm:$0xff]  }
 0x48f   :  { %v9771_v5 = vpop.f32.mrf.mxu0  ;;  %10044 = vmatprep.subr.bf16.mxu1 %v14641_v45  ;;  %v14689_v45 = vld [vmem:[#allocation11 + $0x132c] ss:$36 sps:$4 sm:$0xff]   ;;  %v14684_v14 = vld [vmem:[#allocation11 + $0xf38] ss:$36 sps:$4 sm:$0xff]  }
 0x490   :  { %v9772_v62 = vadd.f32 %v9771_v5, %v6385_v9  ;;  %v14690_v5 = vld [vmem:[#allocation11 + $0xef0] ss:$36 sps:$4 sm:$0xff]   ;;  %v14728_v9 = vld [vmem:[#allocation11 + $0x11c4] ss:$36 sps:$4 sm:$0xff]  }
 0x491   :  { %10000 = vmatpush2.bf16.msra.mxu0 %v14636_v42  ;;  %v9773_v18 = vpop.f32.mrf.mxu0  ;;  %v14687_v42 = vld [vmem:[#allocation11 + $0x1328] ss:$36 sps:$4 sm:$0xff]  }
 0x492   :  { %10045 = vmatpush2.bf16.msra.mxu1 %v14639_v12  ;;  %10001 = vmatprep.subr.bf16.mxu0 %v14644_v10  ;;  %v14692_v12 = vld [vmem:[#allocation11 + $0xef4] ss:$36 sps:$4 sm:$0xff]   ;;  %v14695_v10 = vld [vmem:[#allocation11 + $0x12e4] ss:$36 sps:$4 sm:$0xff]   ;;  %v14698_v18 = vld [vmem:[#allocation11 + $0xeac] ss:$36 sps:$4 sm:$0xff]  }
 0x493   :  { %v9774_v20 = vpop.f32.mrf.mxu0  ;;  %10046 = vmatprep.subr.bf16.mxu1 %v14647_v3  ;;  %v14693_v3 = vld [vmem:[#allocation11 + $0x12e0] ss:$36 sps:$4 sm:$0xff]  }
 0x494   :  { %v14704_v20 = vld [vmem:[#allocation11 + $0xe64] ss:$36 sps:$4 sm:$0xff]  }
 0x495   :  { %10002 = vmatpush2.bf16.msra.mxu0 %v14642_v40  ;;  %v14701_v40 = vld [vmem:[#allocation11 + $0x129c] ss:$36 sps:$4 sm:$0xff]  }
 0x496   :  { %10047 = vmatpush2.bf16.msra.mxu1 %v14645_v13  ;;  %10003 = vmatprep.subr.bf16.mxu0 %v14650_v16  ;;  %v14696_v13 = vld [vmem:[#allocation11 + $0xea8] ss:$36 sps:$4 sm:$0xff]   ;;  %v14699_v16 = vld [vmem:[#allocation11 + $0x1298] ss:$36 sps:$4 sm:$0xff]  }
 0x497   :  { %10048 = vmatprep.subr.bf16.mxu1 %v14653_v24  ;;  %v14707_v24 = vld [vmem:[#allocation11 + $0x1254] ss:$36 sps:$4 sm:$0xff]  }
 0x499   :  { %10004 = vmatpush2.bf16.msra.mxu0 %v14648_v41  ;;  %v14702_v41 = vld [vmem:[#allocation11 + $0xe60] ss:$36 sps:$4 sm:$0xff]  }
 0x49a   :  { %10049 = vmatpush2.bf16.msra.mxu1 %v14651_v36  ;;  %10005 = vmatprep.subr.bf16.mxu0 %v14656_v39  ;;  %v14705_v36 = vld [vmem:[#allocation11 + $0x1250] ss:$36 sps:$4 sm:$0xff]   ;;  %v14710_v39 = vld [vmem:[#allocation11 + $0xe1c] ss:$36 sps:$4 sm:$0xff]  }
 0x49b   :  { %10050 = vmatprep.subr.bf16.mxu1 %v14659_v52  ;;  %v14713_v52 = vld [vmem:[#allocation11 + $0x120c] ss:$36 sps:$4 sm:$0xff]  }
 0x49d   :  { %10006 = vmatpush2.bf16.msra.mxu0 %v14654_v27  ;;  %v14708_v27 = vld [vmem:[#allocation11 + $0xe18] ss:$36 sps:$4 sm:$0xff]  }
 0x49e   :  { %10051 = vmatpush2.bf16.msra.mxu1 %v14657_v44  ;;  %10007 = vmatprep.subr.bf16.mxu0 %v14662_v11  ;;  %v14711_v44 = vld [vmem:[#allocation11 + $0x1208] ss:$36 sps:$4 sm:$0xff]   ;;  %v14716_v11 = vld [vmem:[#allocation11 + $0xdd4] ss:$36 sps:$4 sm:$0xff]  }
 0x49f   :  { %10052 = vmatprep.subr.bf16.mxu1 %v14665_v46  ;;  %v14719_v46 = vld [vmem:[#allocation11 + $0x68c] ss:$36 sps:$4 sm:$0xff]  }
 0x4a1   :  { %10008 = vmatpush2.bf16.msra.mxu0 %v14660_v22  ;;  %v14714_v22 = vld [vmem:[#allocation11 + $0xdd0] ss:$36 sps:$4 sm:$0xff]  }
 0x4a2   :  { %10053 = vmatpush2.bf16.msra.mxu1 %v14663_v49  ;;  %10009 = vmatprep.subr.bf16.mxu0 %v14668_v50  ;;  %v14717_v49 = vld [vmem:[#allocation11 + $0x688] ss:$36 sps:$4 sm:$0xff]  }
 0x4a3   :  { %10104 = vmatprep.subr.bf16.mxu1 %v14671_v51  ;;  %v14722_v50 = vld [vmem:[#allocation11 + $0xd8c] ss:$36 sps:$4 sm:$0xff]   ;;  %v14725_v51 = vld [vmem:[#allocation11 + $0x644] ss:$36 sps:$4 sm:$0xff]  }
 0x4a5   :  { %10010 = vmatpush2.bf16.msra.mxu0 %v14666_v7  ;;  %v9810_v59 = vpop.f32.mrf.mxu1  ;;  %10055 = vmatmul.mubr.bf16.vlgmr.msra.gmra.mxu1 %v15847_v1  ;;  %v14723_v7 = vld [vmem:[#allocation11 + $0x640] ss:$36 sps:$4 sm:$0xff]  }
 0x4a6   :  { %v15881_v63 = vadd.f32 %v9810_v59, %v9770_v56  ;;  %10105 = vmatpush1.bf16.msra.mxu1 %v14669_v53  ;;  %10011 = vmatprep.subr.bf16.mxu0 %v14674_v55  ;;  %v14731_v53 = vld [vmem:[#allocation11 + $0x5fc] ss:$36 sps:$4 sm:$0xff]   ;;  %v14737_v59 = vld [vmem:[#allocation11 + $0x5b4] ss:$36 sps:$4 sm:$0xff]  }
 0x4a7   :  { %v9812_v30 = vpop.f32.mrf.mxu1  ;;  %10106 = vmatprep.subr.bf16.mxu1 %v14677_v47  ;;  %10136 = vmatprep.mubr.bf16.mxu1 %v15549_v0  ;;  %v14726_v55 = vld [vmem:[#allocation11 + $0x11c0] ss:$36 sps:$4 sm:$0xff]   ;;  %v14729_v47 = vld [vmem:[#allocation11 + $0x5f8] ss:$36 sps:$4 sm:$0xff]  }
 0x4a8   :  { %v15884_v37 = vadd.f32 %v9812_v30, %v9772_v62  ;;  %v14734_v56 = vld [vmem:[#allocation11 + $0x117c] ss:$36 sps:$4 sm:$0xff]   ;;  %v14740_v30 = vld [vmem:[#allocation11 + $0x1134] ss:$36 sps:$4 sm:$0xff]  }
 0x4a9   :  { %10012 = vmatpush2.bf16.msra.mxu0 %v14672_v61  ;;  %v9814_v2 = vpop.f32.mrf.mxu1  ;;  %v14732_v62 = vld [vmem:[#allocation11 + $0x1178] ss:$36 sps:$4 sm:$0xff]  }
 0x4aa   :  { %10107 = vmatpush1.bf16.msra.mxu1 %v14675_v29  ;;  %10063 = vmatprep.subr.bf16.mxu0 %v14680_v57  ;;  %v14735_v57 = vld [vmem:[#allocation11 + $0x5b0] ss:$36 sps:$4 sm:$0xff]  }
 0x4ab   :  { %v9815_v34 = vpop.f32.mrf.mxu1  ;;  %10108 = vmatprep.subr.bf16.mxu1 %v14683_v21  ;;  %v14743_v2 = vld [vmem:[#allocation11 + $0x56c] ss:$36 sps:$4 sm:$0xff]  }
 0x4ac   :  { %10014 = vmatmul.mubr.bf16.vlgmr.msra.gmra.mxu0 %v15839_v48  ;;  %v14741_v34 = vld [vmem:[#allocation11 + $0x568] ss:$36 sps:$4 sm:$0xff]  }
 0x4ad   :  { %10064 = vmatpush1.bf16.msra.mxu0 %v14678_v26  ;;  %10095 = vmatprep.mubr.bf16.mxu0 %v15853_v8 }
 0x4ae   :  { %10109 = vmatpush1.bf16.msra.mxu1 %v14681_v4  ;;  %10065 = vmatprep.subr.bf16.mxu0 %v14686_v6  ;;  %v14738_v6 = vld [vmem:[#allocation11 + $0x1130] ss:$36 sps:$4 sm:$0xff]  }
 0x4af   :  { %10110 = vmatprep.subr.bf16.mxu1 %v14689_v45  ;;  %v14746_v45 = vld [vmem:[#allocation11 + $0x10ec] ss:$36 sps:$4 sm:$0xff]  }
 0x4b1   :  { %10066 = vmatpush1.bf16.msra.mxu0 %v14684_v14 }
 0x4b2   :  { %10111 = vmatpush1.bf16.msra.mxu1 %v14687_v42  ;;  %10067 = vmatprep.subr.bf16.mxu0 %v14692_v12  ;;  %v14749_v42 = vld [vmem:[#allocation11 + $0x524] ss:$36 sps:$4 sm:$0xff]  }
 0x4b3   :  { %10112 = vmatprep.subr.bf16.mxu1 %v14695_v10  ;;  %v14747_v12 = vld [vmem:[#allocation11 + $0x520] ss:$36 sps:$4 sm:$0xff]  }
 0x4b4   :  { %v14752_v10 = vld [vmem:[#allocation11 + $0x10a4] ss:$36 sps:$4 sm:$0xff]  }
 0x4b5   :  { %10068 = vmatpush1.bf16.msra.mxu0 %v14690_v5  ;;  %v14755_v5 = vld [vmem:[#allocation11 + $0x4dc] ss:$36 sps:$4 sm:$0xff]  }
 0x4b6   :  { %10113 = vmatpush1.bf16.msra.mxu1 %v14693_v3  ;;  %10069 = vmatprep.subr.bf16.mxu0 %v14698_v18  ;;  %v14753_v3 = vld [vmem:[#allocation11 + $0x4d8] ss:$36 sps:$4 sm:$0xff]  }
 0x4b7   :  { %10114 = vmatprep.subr.bf16.mxu1 %v14701_v40  ;;  %v14758_v18 = vld [vmem:[#allocation11 + $0x105c] ss:$36 sps:$4 sm:$0xff]   ;;  %v14761_v40 = vld [vmem:[#allocation11 + $0x494] ss:$36 sps:$4 sm:$0xff]  }
 0x4b9   :  { %10070 = vmatpush1.bf16.msra.mxu0 %v14696_v13  ;;  %v14756_v13 = vld [vmem:[#allocation11 + $0x1058] ss:$36 sps:$4 sm:$0xff]  }
 0x4ba   :  { %10115 = vmatpush1.bf16.msra.mxu1 %v14699_v16  ;;  %10071 = vmatprep.subr.bf16.mxu0 %v14704_v20  ;;  %v14759_v16 = vld [vmem:[#allocation11 + $0x490] ss:$36 sps:$4 sm:$0xff]  }
 0x4bb   :  { %10116 = vmatprep.subr.bf16.mxu1 %v14707_v24  ;;  %v14764_v20 = vld [vmem:[#allocation11 + $0x1014] ss:$36 sps:$4 sm:$0xff]   ;;  %v14767_v24 = vld [vmem:[#allocation11 + $0x8cc] ss:$36 sps:$4 sm:$0xff]  }
 0x4bd   :  { %10072 = vmatpush1.bf16.msra.mxu0 %v14702_v41  ;;  %v14762_v41 = vld [vmem:[#allocation11 + $0x1010] ss:$36 sps:$4 sm:$0xff]  }
 0x4be   :  { %10117 = vmatpush1.bf16.msra.mxu1 %v14705_v36  ;;  %10073 = vmatprep.subr.bf16.mxu0 %v14710_v39  ;;  %v14765_v36 = vld [vmem:[#allocation11 + $0x8c8] ss:$36 sps:$4 sm:$0xff]  }
 0x4bf   :  { %10118 = vmatprep.subr.bf16.mxu1 %v14713_v52  ;;  %v14770_v39 = vld [vmem:[#allocation11 + $0xfcc] ss:$36 sps:$4 sm:$0xff]   ;;  %v14773_v52 = vld [vmem:[#allocation11 + $0x884] ss:$36 sps:$4 sm:$0xff]  }
 0x4c1   :  { %10074 = vmatpush1.bf16.msra.mxu0 %v14708_v27 }
 0x4c2   :  { %10119 = vmatpush1.bf16.msra.mxu1 %v14711_v44  ;;  %10075 = vmatprep.subr.bf16.mxu0 %v14716_v11  ;;  %v14768_v44 = vld [vmem:[#allocation11 + $0xfc8] ss:$36 sps:$4 sm:$0xff]  }
 0x4c3   :  { %10186 = vmatprep.subr.bf16.mxu1 %v14719_v46  ;;  %v14771_v46 = vld [vmem:[#allocation11 + $0x880] ss:$36 sps:$4 sm:$0xff]  }
 0x4c5   :  { %10076 = vmatpush1.bf16.msra.mxu0 %v14714_v22  ;;  %10137 = vmatmul.mubr.bf16.vlgmr.msra.gmra.mxu1 %v15870_v19  ;;  %v14776_v22 = vld [vmem:[#allocation11 + $0x20c] ss:$36 sps:$4 sm:$0xff]  }
 0x4c6   :  { %10187 = vmatpush1.bf16.msra.mxu1 %v14717_v49  ;;  %10218 = vmatprep.mubr.bf16.mxu1 %v15820_v17 }
 0x4c7   :  { %10077 = vmatprep.subr.bf16.mxu0 %v14722_v50  ;;  %10188 = vmatprep.subr.bf16.mxu1 %v14725_v51  ;;  %v14779_v50 = vld [vmem:[#allocation11 + $0x83c] ss:$36 sps:$4 sm:$0xff]  }
 0x4c9   :  { %10078 = vmatpush1.bf16.msra.mxu0 %v14720_v31 }
 0x4ca   :  { %10189 = vmatpush1.bf16.msra.mxu1 %v14723_v7  ;;  %10079 = vmatprep.subr.bf16.mxu0 %v14728_v9  ;;  %v14774_v7 = vld [vmem:[#allocation11 + $0x208] ss:$36 sps:$4 sm:$0xff]   ;;  %v14777_v9 = vld [vmem:[#allocation11 + $0x838] ss:$36 sps:$4 sm:$0xff]  }
 0x4cb   :  { %10190 = vmatprep.subr.bf16.mxu1 %v14731_v53  ;;  %v14782_v53 = vld [vmem:[#allocation11 + $0x1c4] ss:$36 sps:$4 sm:$0xff]  }
 0x4cd   :  { %10080 = vmatpush2.bf16.msra.mxu0 %v14726_v55  ;;  %v9851_v61 = vpop.f32.mrf.mxu0 }
 0x4ce   :  { %v9852_v29 = vadd.f32 %v9851_v61, %v15881_v63  ;;  %10191 = vmatpush1.bf16.msra.mxu1 %v14729_v47  ;;  %10081 = vmatprep.subr.bf16.mxu0 %v14734_v56  ;;  %v14744_v63 = vld [vmem:[#allocation11 + $0x10e8] ss:$36 sps:$4 sm:$0xff]   ;;  %v14785_v47 = vld [vmem:[#allocation11 + $0x7f4] ss:$36 sps:$4 sm:$0xff]   ;;  %v14780_v56 = vld [vmem:[#allocation11 + $0x1c0] ss:$36 sps:$4 sm:$0xff]  }
 0x4cf   :  { %v9853_v21 = vpop.f32.mrf.mxu0  ;;  %10192 = vmatprep.subr.bf16.mxu1 %v14737_v59  ;;  %v14783_v59 = vld [vmem:[#allocation11 + $0x7f0] ss:$36 sps:$4 sm:$0xff]   ;;  %v14788_v61 = vld [vmem:[#allocation11 + $0x17c] ss:$36 sps:$4 sm:$0xff]  }
 0x4d0   :  { %v9854_v26 = vadd.f32 %v9853_v21, %v15884_v37  ;;  %v14750_v37 = vld [vmem:[#allocation11 + $0x10a0] ss:$36 sps:$4 sm:$0xff]  }
 0x4d1   :  { %10082 = vmatpush2.bf16.msra.mxu0 %v14732_v62  ;;  %v9855_v4 = vpop.f32.mrf.mxu0  ;;  %v14791_v62 = vld [vmem:[#allocation11 + $0x7ac] ss:$36 sps:$4 sm:$0xff]   ;;  %v14797_v21 = vld [vmem:[#allocation11 + $0x764] ss:$36 sps:$4 sm:$0xff]  }
 0x4d2   :  { %10193 = vmatpush1.bf16.msra.mxu1 %v14735_v57  ;;  %10083 = vmatprep.subr.bf16.mxu0 %v14740_v30  ;;  %v14789_v57 = vld [vmem:[#allocation11 + $0x7a8] ss:$36 sps:$4 sm:$0xff]   ;;  %v14794_v30 = vld [vmem:[#allocation11 + $0x134] ss:$36 sps:$4 sm:$0xff]  }
 0x4d3   :  { %v9856_v14 = vpop.f32.mrf.mxu0  ;;  %10194 = vmatprep.subr.bf16.mxu1 %v14743_v2  ;;  %v14792_v2 = vld [vmem:[#allocation11 + $0x130] ss:$36 sps:$4 sm:$0xff]  }
 0x4d4   :  { %v14800_v4 = vld [vmem:[#allocation11 + $0xec] ss:$36 sps:$4 sm:$0xff]   ;;  %v14806_v14 = vld [vmem:[#allocation11 + $0xa4] ss:$36 sps:$4 sm:$0xff]  }
 0x4d5   :  { %10084 = vmatpush2.bf16.msra.mxu0 %v14738_v6  ;;  %v14803_v6 = vld [vmem:[#allocation11 + $0x71c] ss:$36 sps:$4 sm:$0xff]  }
 0x4d6   :  { %10195 = vmatpush1.bf16.msra.mxu1 %v14741_v34  ;;  %10085 = vmatprep.subr.bf16.mxu0 %v14746_v45  ;;  %v14798_v34 = vld [vmem:[#allocation11 + $0xe8] ss:$36 sps:$4 sm:$0xff]   ;;  %v14801_v45 = vld [vmem:[#allocation11 + $0x718] ss:$36 sps:$4 sm:$0xff]  }
 0x4d7   :  { %10196 = vmatprep.subr.bf16.mxu1 %v14749_v42  ;;  %v14809_v42 = vld [vmem:[#allocation11 + $0x6d4] ss:$36 sps:$4 sm:$0xff]  }
 0x4d9   :  { %10086 = vmatpush2.bf16.msra.mxu0 %v14744_v63  ;;  %v14804_v63 = vld [vmem:[#allocation11 + $0xa0] ss:$36 sps:$4 sm:$0xff]  }
 0x4da   :  { %10197 = vmatpush1.bf16.msra.mxu1 %v14747_v12  ;;  %10087 = vmatprep.subr.bf16.mxu0 %v14752_v10  ;;  %v14807_v12 = vld [vmem:[#allocation11 + $0x6d0] ss:$36 sps:$4 sm:$0xff]   ;;  %v14812_v10 = vld [vmem:[#allocation11 + $0x5c] ss:$36 sps:$4 sm:$0xff]  }
 0x4db   :  { %10198 = vmatprep.subr.bf16.mxu1 %v14755_v5  ;;  %v14815_v5 = vld [vmem:[#allocation11 + $0xf8c] ss:$36 sps:$4 sm:$0xff]  }
 0x4dd   :  { %10088 = vmatpush2.bf16.msra.mxu0 %v14750_v37  ;;  %v14810_v37 = vld [vmem:[#allocation11 + $0x58] ss:$36 sps:$4 sm:$0xff]  }
 0x4de   :  { %10199 = vmatpush1.bf16.msra.mxu1 %v14753_v3  ;;  %10089 = vmatprep.subr.bf16.mxu0 %v14758_v18  ;;  %v14813_v3 = vld [vmem:[#allocation11 + $0xf88] ss:$36 sps:$4 sm:$0xff]   ;;  %v14818_v18 = vld [vmem:[#allocation11 + $0x14] ss:$36 sps:$4 sm:$0xff]  }
 0x4df   :  { %10200 = vmatprep.subr.bf16.mxu1 %v14761_v40  ;;  %v14821_v40 = vld [vmem:[#allocation11 + $0xf44] ss:$36 sps:$4 sm:$0xff]  }
 0x4e1   :  { %10090 = vmatpush2.bf16.msra.mxu0 %v14756_v13  ;;  %v14816_v13 = vld [vmem:[#allocation11 + $0x10] ss:$36 sps:$4 sm:$0xff]  }
 0x4e2   :  { %10201 = vmatpush1.bf16.msra.mxu1 %v14759_v16  ;;  %10091 = vmatprep.subr.bf16.mxu0 %v14764_v20  ;;  %v14819_v16 = vld [vmem:[#allocation11 + $0xf40] ss:$36 sps:$4 sm:$0xff]   ;;  %v14824_v20 = vld [vmem:[#allocation11 + $0x44c] ss:$36 sps:$4 sm:$0xff]  }
 0x4e3   :  { %10202 = vmatprep.subr.bf16.mxu1 %v14767_v24  ;;  %v14827_v24 = vld [vmem:[#allocation11 + $0xefc] ss:$36 sps:$4 sm:$0xff]  }
 0x4e5   :  { %10092 = vmatpush2.bf16.msra.mxu0 %v14762_v41  ;;  %v9892_v27 = vpop.f32.mrf.mxu1  ;;  %v14822_v41 = vld [vmem:[#allocation11 + $0x448] ss:$36 sps:$4 sm:$0xff]  }
 0x4e6   :  { %v15892_v11 = vadd.f32 %v9892_v27, %v9852_v29  ;;  %10203 = vmatpush2.bf16.msra.mxu1 %v14765_v36  ;;  %10093 = vmatprep.subr.bf16.mxu0 %v14770_v39  ;;  %v14786_v29 = vld [vmem:[#allocation11 + $0x178] ss:$36 sps:$4 sm:$0xff]   ;;  %v14830_v39 = vld [vmem:[#allocation11 + $0x404] ss:$36 sps:$4 sm:$0xff]  }
 0x4e7   :  { %v9894_v49 = vpop.f32.mrf.mxu1  ;;  %10204 = vmatprep.subr.bf16.mxu1 %v14773_v52  ;;  %v14825_v36 = vld [vmem:[#allocation11 + $0xef8] ss:$36 sps:$4 sm:$0xff]   ;;  %v14828_v27 = vld [vmem:[#allocation11 + $0x400] ss:$36 sps:$4 sm:$0xff]  }
 0x4e8   :  { %v15894_v51 = vadd.f32 %v9894_v49, %v9854_v26  ;;  %v14795_v26 = vld [vmem:[#allocation11 + $0x760] ss:$36 sps:$4 sm:$0xff]   ;;  %v14833_v52 = vld [vmem:[#allocation11 + $0xeb4] ss:$36 sps:$4 sm:$0xff]  }
 0x4e9   :  { %10094 = vmatpush2.bf16.msra.mxu0 %v14768_v44  ;;  %v9896_v31 = vpop.f32.mrf.mxu1  ;;  %v14831_v44 = vld [vmem:[#allocation11 + $0xeb0] ss:$36 sps:$4 sm:$0xff]   ;;  %v14834_v49 = vld [vmem:[#allocation11 + $0x3b8] ss:$36 sps:$4 sm:$0xff]  }
 0x4ea   :  { %10205 = vmatpush2.bf16.msra.mxu1 %v14771_v46  ;;  %10145 = vmatprep.subr.bf16.mxu0 %v14776_v22  ;;  %v14836_v46 = vld [vmem:[#allocation11 + $0x3bc] ss:$36 sps:$4 sm:$0xff]   ;;  %v14839_v22 = vld [vmem:[#allocation11 + $0xe6c] ss:$36 sps:$4 sm:$0xff]   ;;  %v14842_v31 = vld [vmem:[#allocation11 + $0x374] ss:$36 sps:$4 sm:$0xff]  }
 0x4eb   :  { %v9897_v55 = vpop.f32.mrf.mxu1  ;;  %10206 = vmatprep.subr.bf16.mxu1 %v14779_v50  ;;  %v14837_v50 = vld [vmem:[#allocation11 + $0xe68] ss:$36 sps:$4 sm:$0xff]  }
 0x4ec   :  { %10096 = vmatmul.mubr.bf16.vlgmr.msra.gmra.mxu0 %v15858_v54  ;;  %v14848_v55 = vld [vmem:[#allocation11 + $0x32c] ss:$36 sps:$4 sm:$0xff]  }
 0x4ed   :  { %10146 = vmatpush1.bf16.msra.mxu0 %v14774_v7  ;;  %10177 = vmatprep.mubr.bf16.mxu0 %v15810_v60  ;;  %v14845_v7 = vld [vmem:[#allocation11 + $0xe24] ss:$36 sps:$4 sm:$0xff]  }
 0x4ee   :  { %10207 = vmatpush2.bf16.msra.mxu1 %v14777_v9  ;;  %10147 = vmatprep.subr.bf16.mxu0 %v14782_v53  ;;  %v14840_v9 = vld [vmem:[#allocation11 + $0x370] ss:$36 sps:$4 sm:$0xff]   ;;  %v14843_v53 = vld [vmem:[#allocation11 + $0xe20] ss:$36 sps:$4 sm:$0xff]  }
 0x4ef   :  { %10208 = vmatprep.subr.bf16.mxu1 %v14785_v47  ;;  %v14851_v47 = vld [vmem:[#allocation11 + $0xddc] ss:$36 sps:$4 sm:$0xff]  }
 0x4f1   :  { %10148 = vmatpush1.bf16.msra.mxu0 %v14780_v56  ;;  %v14846_v56 = vld [vmem:[#allocation11 + $0x328] ss:$36 sps:$4 sm:$0xff]  }
 0x4f2   :  { %10209 = vmatpush2.bf16.msra.mxu1 %v14783_v59  ;;  %10149 = vmatprep.subr.bf16.mxu0 %v14788_v61  ;;  %v14849_v59 = vld [vmem:[#allocation11 + $0xdd8] ss:$36 sps:$4 sm:$0xff]   ;;  %v14854_v61 = vld [vmem:[#allocation11 + $0x2e4] ss:$36 sps:$4 sm:$0xff]  }
 0x4f3   :  { %10210 = vmatprep.subr.bf16.mxu1 %v14791_v62  ;;  %v14857_v62 = vld [vmem:[#allocation11 + $0xd94] ss:$36 sps:$4 sm:$0xff]  }
 0x4f5   :  { %10150 = vmatpush1.bf16.msra.mxu0 %v14786_v29  ;;  %v14852_v29 = vld [vmem:[#allocation11 + $0x2e0] ss:$36 sps:$4 sm:$0xff]  }
 0x4f6   :  { %10211 = vmatpush2.bf16.msra.mxu1 %v14789_v57  ;;  %10151 = vmatprep.subr.bf16.mxu0 %v14794_v30  ;;  %v14855_v57 = vld [vmem:[#allocation11 + $0xd90] ss:$36 sps:$4 sm:$0xff]   ;;  %v14860_v30 = vld [vmem:[#allocation11 + $0x29c] ss:$36 sps:$4 sm:$0xff]  }
 0x4f7   :  { %10212 = vmatprep.subr.bf16.mxu1 %v14797_v21  ;;  %v14863_v21 = vld [vmem:[#allocation11 + $0x11cc] ss:$36 sps:$4 sm:$0xff]  }
 0x4f9   :  { %10152 = vmatpush1.bf16.msra.mxu0 %v14792_v2  ;;  %v14858_v2 = vld [vmem:[#allocation11 + $0x298] ss:$36 sps:$4 sm:$0xff]  }
 0x4fa   :  { %10213 = vmatpush2.bf16.msra.mxu1 %v14795_v26  ;;  %10153 = vmatprep.subr.bf16.mxu0 %v14800_v4  ;;  %v14861_v26 = vld [vmem:[#allocation11 + $0x11c8] ss:$36 sps:$4 sm:$0xff]   ;;  %v14866_v4 = vld [vmem:[#allocation11 + $0x254] ss:$36 sps:$4 sm:$0xff]  }
 0x4fb   :  { %10214 = vmatprep.subr.bf16.mxu1 %v14803_v6  ;;  %v14869_v6 = vld [vmem:[#allocation11 + $0x1184] ss:$36 sps:$4 sm:$0xff]  }
 0x4fd   :  { %10154 = vmatpush1.bf16.msra.mxu0 %v14798_v34 }
 0x4fe   :  { %10215 = vmatpush2.bf16.msra.mxu1 %v14801_v45  ;;  %10155 = vmatprep.subr.bf16.mxu0 %v14806_v14  ;;  %v14864_v45 = vld [vmem:[#allocation11 + $0x250] ss:$36 sps:$4 sm:$0xff]   ;;  %v14867_v14 = vld [vmem:[#allocation11 + $0x1180] ss:$36 sps:$4 sm:$0xff]  }
 0x4ff   :  { %10216 = vmatprep.subr.bf16.mxu1 %v14809_v42  ;;  %v14872_v42 = vld [vmem:[#allocation11 + $0xb0c] ss:$36 sps:$4 sm:$0xff]  }
 0x501   :  { %10156 = vmatpush1.bf16.msra.mxu0 %v14804_v63 }
 0x502   :  { %10217 = vmatpush2.bf16.msra.mxu1 %v14807_v12  ;;  %10157 = vmatprep.subr.bf16.mxu0 %v14812_v10  ;;  %v14875_v12 = vld [vmem:[#allocation11 + $0x113c] ss:$36 sps:$4 sm:$0xff]  }
 0x503   :  { %10268 = vmatprep.subr.bf16.mxu1 %v14815_v5  ;;  %v14870_v5 = vld [vmem:[#allocation11 + $0xb08] ss:$36 sps:$4 sm:$0xff]  }
 0x505   :  { %10158 = vmatpush1.bf16.msra.mxu0 %v14810_v37  ;;  %10219 = vmatmul.mubr.bf16.vlgmr.msra.gmra.mxu1 %v15839_v48  ;;  %v14873_v37 = vld [vmem:[#allocation11 + $0x1138] ss:$36 sps:$4 sm:$0xff]  }
 0x506   :  { %10269 = vmatpush1.bf16.msra.mxu1 %v14813_v3  ;;  %10300 = vmatprep.mubr.bf16.mxu1 %v15853_v8  ;;  %v14878_v3 = vld [vmem:[#allocation11 + $0xac4] ss:$36 sps:$4 sm:$0xff]  }
 0x507   :  { %10159 = vmatprep.subr.bf16.mxu0 %v14818_v18  ;;  %10270 = vmatprep.subr.bf16.mxu1 %v14821_v40  ;;  %v14881_v40 = vld [vmem:[#allocation11 + $0x10f4] ss:$36 sps:$4 sm:$0xff]  }
 0x509   :  { %10160 = vmatpush1.bf16.msra.mxu0 %v14816_v13 }
 0x50a   :  { %10271 = vmatpush1.bf16.msra.mxu1 %v14819_v16  ;;  %10161 = vmatprep.subr.bf16.mxu0 %v14824_v20  ;;  %v14876_v20 = vld [vmem:[#allocation11 + $0xac0] ss:$36 sps:$4 sm:$0xff]  }
 0x50b   :  { %10272 = vmatprep.subr.bf16.mxu1 %v14827_v24 }
 0x50d   :  { %10162 = vmatpush2.bf16.msra.mxu0 %v14822_v41  ;;  %v14879_v41 = vld [vmem:[#allocation11 + $0x10f0] ss:$36 sps:$4 sm:$0xff]  }
 0x50e   :  { %10273 = vmatpush1.bf16.msra.mxu1 %v14825_v36  ;;  %10163 = vmatprep.subr.bf16.mxu0 %v14830_v39  ;;  %v14884_v36 = vld [vmem:[#allocation11 + $0xa7c] ss:$36 sps:$4 sm:$0xff]  }
 0x50f   :  { %10274 = vmatprep.subr.bf16.mxu1 %v14833_v52  ;;  %v14887_v52 = vld [vmem:[#allocation11 + $0x10ac] ss:$36 sps:$4 sm:$0xff]  }
 0x511   :  { %10164 = vmatpush2.bf16.msra.mxu0 %v14828_v27 }
 0x512   :  { %10275 = vmatpush1.bf16.msra.mxu1 %v14831_v44  ;;  %10165 = vmatprep.subr.bf16.mxu0 %v14836_v46  ;;  %v14882_v44 = vld [vmem:[#allocation11 + $0xa78] ss:$36 sps:$4 sm:$0xff]  }
 0x513   :  { %10276 = vmatprep.subr.bf16.mxu1 %v14839_v22  ;;  %v14890_v22 = vld [vmem:[#allocation11 + $0xa34] ss:$36 sps:$4 sm:$0xff]  }
 0x515   :  { %10166 = vmatpush2.bf16.msra.mxu0 %v14834_v49  ;;  %v14893_v49 = vld [vmem:[#allocation11 + $0x1064] ss:$36 sps:$4 sm:$0xff]  }
 0x516   :  { %10277 = vmatpush1.bf16.msra.mxu1 %v14837_v50  ;;  %10167 = vmatprep.subr.bf16.mxu0 %v14842_v31  ;;  %v14888_v50 = vld [vmem:[#allocation11 + $0xa30] ss:$36 sps:$4 sm:$0xff]   ;;  %v14891_v31 = vld [vmem:[#allocation11 + $0x1060] ss:$36 sps:$4 sm:$0xff]  }
 0x517   :  { %10278 = vmatprep.subr.bf16.mxu1 %v14845_v7  ;;  %v14896_v7 = vld [vmem:[#allocation11 + $0x9ec] ss:$36 sps:$4 sm:$0xff]  }
 0x519   :  { %10168 = vmatpush2.bf16.msra.mxu0 %v14840_v9  ;;  %v14894_v9 = vld [vmem:[#allocation11 + $0x9e8] ss:$36 sps:$4 sm:$0xff]  }
 0x51a   :  { %10279 = vmatpush1.bf16.msra.mxu1 %v14843_v53  ;;  %10169 = vmatprep.subr.bf16.mxu0 %v14848_v55  ;;  %v14897_v53 = vld [vmem:[#allocation11 + $0x1018] ss:$36 sps:$4 sm:$0xff]   ;;  %v14902_v55 = vld [vmem:[#allocation11 + $0x9a4] ss:$36 sps:$4 sm:$0xff]  }
 0x51b   :  { %10280 = vmatprep.subr.bf16.mxu1 %v14851_v47  ;;  %v14905_v47 = vld [vmem:[#allocation11 + $0xfd4] ss:$36 sps:$4 sm:$0xff]  }
 0x51d   :  { %10170 = vmatpush2.bf16.msra.mxu0 %v14846_v56  ;;  %v14900_v56 = vld [vmem:[#allocation11 + $0x9a0] ss:$36 sps:$4 sm:$0xff]  }
 0x51e   :  { %10281 = vmatpush1.bf16.msra.mxu1 %v14849_v59  ;;  %10171 = vmatprep.subr.bf16.mxu0 %v14854_v61  ;;  %v14903_v59 = vld [vmem:[#allocation11 + $0xfd0] ss:$36 sps:$4 sm:$0xff]   ;;  %v14908_v61 = vld [vmem:[#allocation11 + $0x95c] ss:$36 sps:$4 sm:$0xff]  }
 0x51f   :  { %10282 = vmatprep.subr.bf16.mxu1 %v14857_v62  ;;  %v14911_v62 = vld [vmem:[#allocation11 + $0x214] ss:$36 sps:$4 sm:$0xff]  }
 0x521   :  { %10172 = vmatpush2.bf16.msra.mxu0 %v14852_v29  ;;  %v14906_v29 = vld [vmem:[#allocation11 + $0x958] ss:$36 sps:$4 sm:$0xff]  }
 0x522   :  { %10283 = vmatpush1.bf16.msra.mxu1 %v14855_v57  ;;  %10173 = vmatprep.subr.bf16.mxu0 %v14860_v30  ;;  %v14909_v57 = vld [vmem:[#allocation11 + $0x210] ss:$36 sps:$4 sm:$0xff]  }
 0x523   :  { %10284 = vmatprep.subr.bf16.mxu1 %v14863_v21  ;;  %v14914_v30 = vld [vmem:[#allocation11 + $0x914] ss:$36 sps:$4 sm:$0xff]   ;;  %v14917_v21 = vld [vmem:[#allocation11 + $0x1cc] ss:$36 sps:$4 sm:$0xff]  }
 0x525   :  { %10174 = vmatpush2.bf16.msra.mxu0 %v14858_v2  ;;  %v15900_v34 = vpop.f32.mrf.mxu1  ;;  %v14912_v2 = vld [vmem:[#allocation11 + $0x910] ss:$36 sps:$4 sm:$0xff]  }
 0x526   :  { %10285 = vmatpush2.bf16.msra.mxu1 %v14861_v26  ;;  %10175 = vmatprep.subr.bf16.mxu0 %v14866_v4  ;;  %v14915_v26 = vld [vmem:[#allocation11 + $0x1c8] ss:$36 sps:$4 sm:$0xff]  }
 0x527   :  { %v15902_v63 = vpop.f32.mrf.mxu1  ;;  %10286 = vmatprep.subr.bf16.mxu1 %v14869_v6  ;;  %v14920_v4 = vld [vmem:[#allocation11 + $0xd4c] ss:$36 sps:$4 sm:$0xff]   ;;  %v14923_v6 = vld [vmem:[#allocation11 + $0x184] ss:$36 sps:$4 sm:$0xff]  }
 0x529   :  { %10176 = vmatpush2.bf16.msra.mxu0 %v14864_v45  ;;  %v9978_v10 = vpop.f32.mrf.mxu1  ;;  %v14918_v45 = vld [vmem:[#allocation11 + $0xd48] ss:$36 sps:$4 sm:$0xff]  }
 0x52a   :  { %10287 = vmatpush2.bf16.msra.mxu1 %v14867_v14  ;;  %10227 = vmatprep.subr.bf16.mxu0 %v14872_v42  ;;  %v14921_v14 = vld [vmem:[#allocation11 + $0x180] ss:$36 sps:$4 sm:$0xff]  }
 0x52b   :  { %v9979_v18 = vpop.f32.mrf.mxu1  ;;  %10288 = vmatprep.subr.bf16.mxu1 %v14875_v12  ;;  %v14926_v42 = vld [vmem:[#allocation11 + $0xd04] ss:$36 sps:$4 sm:$0xff]   ;;  %v14929_v12 = vld [vmem:[#allocation11 + $0x13c] ss:$36 sps:$4 sm:$0xff]  }
 0x52c   :  { %10178 = vmatmul.mubr.bf16.vlgmr.msra.gmra.mxu0 %v15832_v32  ;;  %v9933_v13 = vpop.f32.mrf.mxu0  ;;  %v14924_v10 = vld [vmem:[#allocation11 + $0xd00] ss:$36 sps:$4 sm:$0xff]   ;;  %v14930_v18 = vld [vmem:[#allocation11 + $0xcb8] ss:$36 sps:$4 sm:$0xff]  }
 0x52d   :  { %v15906_v16 = vadd.f32 %v9933_v13, %v15892_v11  ;;  %10228 = vmatpush1.bf16.msra.mxu0 %v14870_v5  ;;  %10259 = vmatprep.mubr.bf16.mxu0 %v15834_v33  ;;  %v14885_v11 = vld [vmem:[#allocation11 + $0x10a8] ss:$36 sps:$4 sm:$0xff]   ;;  %v14927_v5 = vld [vmem:[#allocation11 + $0x138] ss:$36 sps:$4 sm:$0xff]  }
 0x52e   :  { %v9935_v24 = vpop.f32.mrf.mxu0  ;;  %10289 = vmatpush2.bf16.msra.mxu1 %v14873_v37  ;;  %10229 = vmatprep.subr.bf16.mxu0 %v14878_v3  ;;  %v14932_v37 = vld [vmem:[#allocation11 + $0xcbc] ss:$36 sps:$4 sm:$0xff]   ;;  %v14935_v3 = vld [vmem:[#allocation11 + $0xf4] ss:$36 sps:$4 sm:$0xff]  }
 0x52f   :  { %v15910_v39 = vadd.f32 %v9935_v24, %v15894_v51  ;;  %10290 = vmatprep.subr.bf16.mxu1 %v14881_v40  ;;  %v14899_v51 = vld [vmem:[#allocation11 + $0x101c] ss:$36 sps:$4 sm:$0xff]   ;;  %v14933_v40 = vld [vmem:[#allocation11 + $0xf0] ss:$36 sps:$4 sm:$0xff]  }
 0x530   :  { %v9937_v27 = vpop.f32.mrf.mxu0  ;;  %v14938_v13 = vld [vmem:[#allocation11 + $0xc74] ss:$36 sps:$4 sm:$0xff]  }
 0x531   :  { %10230 = vmatpush1.bf16.msra.mxu0 %v14876_v20  ;;  %v14941_v20 = vld [vmem:[#allocation11 + $0xac] ss:$36 sps:$4 sm:$0xff]  }
 0x532   :  { %v9938_v46 = vpop.f32.mrf.mxu0  ;;  %10291 = vmatpush2.bf16.msra.mxu1 %v14879_v41  ;;  %10231 = vmatprep.subr.bf16.mxu0 %v14884_v36  ;;  %v14936_v24 = vld [vmem:[#allocation11 + $0xc70] ss:$36 sps:$4 sm:$0xff]   ;;  %v14939_v41 = vld [vmem:[#allocation11 + $0xa8] ss:$36 sps:$4 sm:$0xff]  }
 0x533   :  { %10292 = vmatprep.subr.bf16.mxu1 %v14887_v52  ;;  %v14944_v36 = vld [vmem:[#allocation11 + $0xc2c] ss:$36 sps:$4 sm:$0xff]   ;;  %v14947_v52 = vld [vmem:[#allocation11 + $0x64] ss:$36 sps:$4 sm:$0xff]  }
 0x534   :  { %v14942_v27 = vld [vmem:[#allocation11 + $0xc28] ss:$36 sps:$4 sm:$0xff]  }
 0x535   :  { %10232 = vmatpush1.bf16.msra.mxu0 %v14882_v44  ;;  %v14945_v44 = vld [vmem:[#allocation11 + $0x60] ss:$36 sps:$4 sm:$0xff]  }
 0x536   :  { %10293 = vmatpush2.bf16.msra.mxu1 %v14885_v11  ;;  %10233 = vmatprep.subr.bf16.mxu0 %v14890_v22  ;;  %v14950_v46 = vld [vmem:[#allocation11 + $0xbe4] ss:$36 sps:$4 sm:$0xff]   ;;  %v14953_v11 = vld [vmem:[#allocation11 + $0x1c] ss:$36 sps:$4 sm:$0xff]  }
 0x537   :  { %10294 = vmatprep.subr.bf16.mxu1 %v14893_v49  ;;  %v14948_v22 = vld [vmem:[#allocation11 + $0xbe0] ss:$36 sps:$4 sm:$0xff]   ;;  %v14951_v49 = vld [vmem:[#allocation11 + $0x18] ss:$36 sps:$4 sm:$0xff]  }
 0x539   :  { %10234 = vmatpush1.bf16.msra.mxu0 %v14888_v50  ;;  %v14956_v50 = vld [vmem:[#allocation11 + $0xb9c] ss:$36 sps:$4 sm:$0xff]  }
 0x53a   :  { %10295 = vmatpush2.bf16.msra.mxu1 %v14891_v31  ;;  %10235 = vmatprep.subr.bf16.mxu0 %v14896_v7  ;;  %v14959_v31 = vld [vmem:[#allocation11 + $0x454] ss:$36 sps:$4 sm:$0xff]  }
 0x53b   :  { %10296 = vmatprep.subr.bf16.mxu1 %v14899_v51  ;;  %v14954_v7 = vld [vmem:[#allocation11 + $0xb98] ss:$36 sps:$4 sm:$0xff]   ;;  %v14957_v51 = vld [vmem:[#allocation11 + $0x450] ss:$36 sps:$4 sm:$0xff]  }
 0x53d   :  { %10236 = vmatpush1.bf16.msra.mxu0 %v14894_v9  ;;  %v14962_v9 = vld [vmem:[#allocation11 + $0xb54] ss:$36 sps:$4 sm:$0xff]  }
 0x53e   :  { %10297 = vmatpush2.bf16.msra.mxu1 %v14897_v53  ;;  %10237 = vmatprep.subr.bf16.mxu0 %v14902_v55  ;;  %v14965_v53 = vld [vmem:[#allocation11 + $0x40c] ss:$36 sps:$4 sm:$0xff]  }
 0x53f   :  { %10298 = vmatprep.subr.bf16.mxu1 %v14905_v47  ;;  %v14960_v47 = vld [vmem:[#allocation11 + $0xb50] ss:$36 sps:$4 sm:$0xff]  }
 0x541   :  { %10238 = vmatpush1.bf16.msra.mxu0 %v14900_v56  ;;  %v14963_v56 = vld [vmem:[#allocation11 + $0x408] ss:$36 sps:$4 sm:$0xff]  }
 0x542   :  { %10299 = vmatpush2.bf16.msra.mxu1 %v14903_v59  ;;  %10239 = vmatprep.subr.bf16.mxu0 %v14908_v61  ;;  %v14968_v59 = vld [vmem:[#allocation11 + $0x140c] ss:$36 sps:$4 sm:$0xff]   ;;  %v6389_v61 = vrot.slane %v15874_v28, %v15665_v35 }
 0x543   :  { %10350 = vmatprep.subr.bf16.mxu1 %v14911_v62 }
 0x545   :  { %10240 = vmatpush1.bf16.msra.mxu0 %v14906_v29  ;;  %10301 = vmatmul.mubr.bf16.vlgmr.msra.gmra.mxu1 %v15858_v54  ;;  %v14971_v29 = vld [vmem:[#allocation11 + $0x3c4] ss:$36 sps:$4 sm:$0xff]  }
 0x546   :  { %10351 = vmatpush1.bf16.msra.mxu1 %v14909_v57  ;;  %10382 = vmatprep.mubr.bf16.mxu1 %v15810_v60  ;;  %v6393_v57 = vrot.slane %v15874_v28, %v15668_v38  ;;  %v14972_v38 = vld [vmem:[#allocation11 + $0x13c0] ss:$36 sps:$4 sm:$0xff]  }
 0x547   :  { %10241 = vmatprep.subr.bf16.mxu0 %v14914_v30  ;;  %10352 = vmatprep.subr.bf16.mxu1 %v14917_v21  ;;  %v14966_v21 = vld [vmem:[#allocation11 + $0x1408] ss:$36 sps:$4 sm:$0xff]  }
 0x548   :  { %v9977_v35 = vadd.f32 %v15902_v63, %v6393_v57 }
 0x549   :  { %10242 = vmatpush1.bf16.msra.mxu0 %v14912_v2  ;;  %v14969_v2 = vld [vmem:[#allocation11 + $0x3c0] ss:$36 sps:$4 sm:$0xff]  }
 0x54a   :  { %10353 = vmatpush1.bf16.msra.mxu1 %v14915_v26  ;;  %10243 = vmatprep.subr.bf16.mxu0 %v14920_v4  ;;  %v14974_v26 = vld [vmem:[#allocation11 + $0x13c4] ss:$36 sps:$4 sm:$0xff]   ;;  %v9975_v4 = vadd.f32 %v15900_v34, %v6389_v61  ;;  %v14983_v34 = vld [vmem:[#allocation11 + $0x334] ss:$36 sps:$4 sm:$0xff]  }
 0x54b   :  { %10354 = vmatprep.subr.bf16.mxu1 %v14923_v6  ;;  %v15016_v61 = vld [vmem:[#allocation11 + $0x694] ss:$36 sps:$4 sm:$0xff]  }
 0x54d   :  { %10244 = vmatpush2.bf16.msra.mxu0 %v14918_v45  ;;  %v14977_v45 = vld [vmem:[#allocation11 + $0x37c] ss:$36 sps:$4 sm:$0xff]  }
 0x54e   :  { %10355 = vmatpush1.bf16.msra.mxu1 %v14921_v14  ;;  %10245 = vmatprep.subr.bf16.mxu0 %v14926_v42 }
 0x54f   :  { %10356 = vmatprep.subr.bf16.mxu1 %v14929_v12  ;;  %v14975_v12 = vld [vmem:[#allocation11 + $0x378] ss:$36 sps:$4 sm:$0xff]  }
 0x551   :  { %10246 = vmatpush2.bf16.msra.mxu0 %v14924_v10  ;;  %v14980_v10 = vld [vmem:[#allocation11 + $0x137c] ss:$36 sps:$4 sm:$0xff]  }
 0x552   :  { %10357 = vmatpush1.bf16.msra.mxu1 %v14927_v5  ;;  %10247 = vmatprep.subr.bf16.mxu0 %v14932_v37 }
 0x553   :  { %10358 = vmatprep.subr.bf16.mxu1 %v14935_v3 }
 0x555   :  { %10248 = vmatpush2.bf16.msra.mxu0 %v14930_v18  ;;  %v14978_v18 = vld [vmem:[#allocation11 + $0x1378] ss:$36 sps:$4 sm:$0xff]  }
 0x556   :  { %10359 = vmatpush1.bf16.msra.mxu1 %v14933_v40  ;;  %10249 = vmatprep.subr.bf16.mxu0 %v14938_v13  ;;  %v14981_v13 = vld [vmem:[#allocation11 + $0x330] ss:$36 sps:$4 sm:$0xff]  }
 0x557   :  { %10360 = vmatprep.subr.bf16.mxu1 %v14941_v20  ;;  %v14986_v20 = vld [vmem:[#allocation11 + $0x1334] ss:$36 sps:$4 sm:$0xff]  }
 0x559   :  { %10250 = vmatpush2.bf16.msra.mxu0 %v14936_v24  ;;  %v14989_v24 = vld [vmem:[#allocation11 + $0x2ec] ss:$36 sps:$4 sm:$0xff]  }
 0x55a   :  { %10361 = vmatpush1.bf16.msra.mxu1 %v14939_v41  ;;  %10251 = vmatprep.subr.bf16.mxu0 %v14944_v36  ;;  %v14984_v41 = vld [vmem:[#allocation11 + $0x1330] ss:$36 sps:$4 sm:$0xff]   ;;  %v14987_v36 = vld [vmem:[#allocation11 + $0x2e8] ss:$36 sps:$4 sm:$0xff]  }
 0x55b   :  { %10362 = vmatprep.subr.bf16.mxu1 %v14947_v52  ;;  %v14992_v52 = vld [vmem:[#allocation11 + $0x12ec] ss:$36 sps:$4 sm:$0xff]  }
 0x55d   :  { %10252 = vmatpush2.bf16.msra.mxu0 %v14942_v27  ;;  %v14995_v27 = vld [vmem:[#allocation11 + $0x2a4] ss:$36 sps:$4 sm:$0xff]  }
 0x55e   :  { %10363 = vmatpush1.bf16.msra.mxu1 %v14945_v44  ;;  %10253 = vmatprep.subr.bf16.mxu0 %v14950_v46  ;;  %v14990_v44 = vld [vmem:[#allocation11 + $0x12e8] ss:$36 sps:$4 sm:$0xff]   ;;  %v14993_v46 = vld [vmem:[#allocation11 + $0x2a0] ss:$36 sps:$4 sm:$0xff]  }
 0x55f   :  { %10364 = vmatprep.subr.bf16.mxu1 %v14953_v11  ;;  %v14998_v11 = vld [vmem:[#allocation11 + $0x12a4] ss:$36 sps:$4 sm:$0xff]  }
 0x561   :  { %10254 = vmatpush2.bf16.msra.mxu0 %v14948_v22  ;;  %v15001_v22 = vld [vmem:[#allocation11 + $0x25c] ss:$36 sps:$4 sm:$0xff]  }
 0x562   :  { %10365 = vmatpush1.bf16.msra.mxu1 %v14951_v49  ;;  %10255 = vmatprep.subr.bf16.mxu0 %v14956_v50  ;;  %v14996_v49 = vld [vmem:[#allocation11 + $0x12a0] ss:$36 sps:$4 sm:$0xff]   ;;  %v14999_v50 = vld [vmem:[#allocation11 + $0x258] ss:$36 sps:$4 sm:$0xff]  }
 0x563   :  { %10366 = vmatprep.subr.bf16.mxu1 %v14959_v31  ;;  %v15004_v31 = vld [vmem:[#allocation11 + $0x125c] ss:$36 sps:$4 sm:$0xff]  }
 0x565   :  { %10256 = vmatpush2.bf16.msra.mxu0 %v14954_v7  ;;  %v10056_v55 = vpop.f32.mrf.mxu1  ;;  %v15007_v7 = vld [vmem:[#allocation11 + $0xb14] ss:$36 sps:$4 sm:$0xff]  }
 0x566   :  { %10367 = vmatpush2.bf16.msra.mxu1 %v14957_v51  ;;  %10257 = vmatprep.subr.bf16.mxu0 %v14962_v9  ;;  %v15002_v51 = vld [vmem:[#allocation11 + $0x1258] ss:$36 sps:$4 sm:$0xff]   ;;  %v15005_v9 = vld [vmem:[#allocation11 + $0xb10] ss:$36 sps:$4 sm:$0xff]  }
 0x567   :  { %v10058_v62 = vpop.f32.mrf.mxu1  ;;  %10368 = vmatprep.subr.bf16.mxu1 %v14965_v53  ;;  %v15010_v53 = vld [vmem:[#allocation11 + $0x1214] ss:$36 sps:$4 sm:$0xff]  }
 0x569   :  { %10258 = vmatpush2.bf16.msra.mxu0 %v14960_v47  ;;  %v10060_v30 = vpop.f32.mrf.mxu1 }
 0x56a   :  { %10369 = vmatpush2.bf16.msra.mxu1 %v14963_v56  ;;  %10309 = vmatprep.subr.bf16.mxu0 %v14968_v59  ;;  %v15008_v56 = vld [vmem:[#allocation11 + $0x1210] ss:$36 sps:$4 sm:$0xff]   ;;  %v15011_v59 = vld [vmem:[#allocation11 + $0xac8] ss:$36 sps:$4 sm:$0xff]  }
 0x56b   :  { %v10061_v6 = vpop.f32.mrf.mxu1  ;;  %10370 = vmatprep.subr.bf16.mxu1 %v14971_v29  ;;  %v15019_v29 = vld [vmem:[#allocation11 + $0xa84] ss:$36 sps:$4 sm:$0xff]   ;;  %v15014_v30 = vld [vmem:[#allocation11 + $0x690] ss:$36 sps:$4 sm:$0xff]  }
 0x56c   :  { %v10015_v14 = vpop.f32.mrf.mxu0  ;;  %10260 = vmatmul.mubr.bf16.vlgmr.msra.gmra.mxu0 %v15847_v1  ;;  %v15020_v6 = vld [vmem:[#allocation11 + $0x648] ss:$36 sps:$4 sm:$0xff]  }
 0x56d   :  { %v10016_v42 = vadd.f32 %v10015_v14, %v9975_v4  ;;  %10310 = vmatpush1.bf16.msra.mxu0 %v14966_v21  ;;  %10341 = vmatprep.mubr.bf16.mxu0 %v15549_v0  ;;  %v15017_v21 = vld [vmem:[#allocation11 + $0xa80] ss:$36 sps:$4 sm:$0xff]  }
 0x56e   :  { %v10017_v28 = vpop.f32.mrf.mxu0  ;;  %10371 = vmatpush2.bf16.msra.mxu1 %v14969_v2  ;;  %10311 = vmatprep.subr.bf16.mxu0 %v14974_v26  ;;  %v15022_v2 = vld [vmem:[#allocation11 + $0x64c] ss:$36 sps:$4 sm:$0xff]   ;;  %v15025_v4 = vld [vmem:[#allocation11 + $0xa3c] ss:$36 sps:$4 sm:$0xff]   ;;  %v15028_v14 = vld [vmem:[#allocation11 + $0x604] ss:$36 sps:$4 sm:$0xff]  }
 0x56f   :  { %v10018_v5 = vadd.f32 %v10017_v28, %v9977_v35  ;;  %10372 = vmatprep.subr.bf16.mxu1 %v14977_v45  ;;  %v15922_v37 = vadd.f32 %v10056_v55, %v10016_v42  ;;  %v15013_v55 = vld [vmem:[#allocation11 + $0xacc] ss:$36 sps:$4 sm:$0xff]   ;;  %v15023_v45 = vld [vmem:[#allocation11 + $0xa38] ss:$36 sps:$4 sm:$0xff]   ;;  %v15026_v42 = vld [vmem:[#allocation11 + $0x600] ss:$36 sps:$4 sm:$0xff]  }
 0x570   :  { %v10019_v3 = vpop.f32.mrf.mxu0  ;;  %v15031_v35 = vld [vmem:[#allocation11 + $0x9f4] ss:$36 sps:$4 sm:$0xff]   ;;  %v15034_v28 = vld [vmem:[#allocation11 + $0x5bc] ss:$36 sps:$4 sm:$0xff]  }
 0x571   :  { %10312 = vmatpush1.bf16.msra.mxu0 %v14972_v38  ;;  %v15924_v40 = vadd.f32 %v10058_v62, %v10018_v5  ;;  %v15029_v38 = vld [vmem:[#allocation11 + $0x9f0] ss:$36 sps:$4 sm:$0xff]   ;;  %v15035_v5 = vld [vmem:[#allocation11 + $0x9a8] ss:$36 sps:$4 sm:$0xff]  }
 0x572   :  { %v10020_v63 = vpop.f32.mrf.mxu0  ;;  %10373 = vmatpush2.bf16.msra.mxu1 %v14975_v12  ;;  %10313 = vmatprep.subr.bf16.mxu0 %v14980_v10  ;;  %v15037_v12 = vld [vmem:[#allocation11 + $0x9ac] ss:$36 sps:$4 sm:$0xff]   ;;  %v15032_v10 = vld [vmem:[#allocation11 + $0x5b8] ss:$36 sps:$4 sm:$0xff]   ;;  %v15043_v3 = vld [vmem:[#allocation11 + $0x964] ss:$36 sps:$4 sm:$0xff]  }
 0x573   :  { %10374 = vmatprep.subr.bf16.mxu1 %v14983_v34  ;;  %v15040_v34 = vld [vmem:[#allocation11 + $0x574] ss:$36 sps:$4 sm:$0xff]   ;;  %v15041_v63 = vld [vmem:[#allocation11 + $0x960] ss:$36 sps:$4 sm:$0xff]  }
 0x575   :  { %10314 = vmatpush1.bf16.msra.mxu0 %v14978_v18  ;;  %v15038_v18 = vld [vmem:[#allocation11 + $0x570] ss:$36 sps:$4 sm:$0xff]  }
 0x576   :  { %10375 = vmatpush2.bf16.msra.mxu1 %v14981_v13  ;;  %10315 = vmatprep.subr.bf16.mxu0 %v14986_v20  ;;  %v15046_v13 = vld [vmem:[#allocation11 + $0x52c] ss:$36 sps:$4 sm:$0xff]   ;;  %v15049_v20 = vld [vmem:[#allocation11 + $0x91c] ss:$36 sps:$4 sm:$0xff]  }
 0x577   :  { %10376 = vmatprep.subr.bf16.mxu1 %v14989_v24  ;;  %v15044_v24 = vld [vmem:[#allocation11 + $0x528] ss:$36 sps:$4 sm:$0xff]  }
 0x579   :  { %10316 = vmatpush1.bf16.msra.mxu0 %v14984_v41  ;;  %v15047_v41 = vld [vmem:[#allocation11 + $0x918] ss:$36 sps:$4 sm:$0xff]  }
 0x57a   :  { %10377 = vmatpush2.bf16.msra.mxu1 %v14987_v36  ;;  %10317 = vmatprep.subr.bf16.mxu0 %v14992_v52  ;;  %v15052_v36 = vld [vmem:[#allocation11 + $0x4e4] ss:$36 sps:$4 sm:$0xff]   ;;  %v15055_v52 = vld [vmem:[#allocation11 + $0xd54] ss:$36 sps:$4 sm:$0xff]  }
 0x57b   :  { %10378 = vmatprep.subr.bf16.mxu1 %v14995_v27  ;;  %v15050_v27 = vld [vmem:[#allocation11 + $0x4e0] ss:$36 sps:$4 sm:$0xff]  }
 0x57d   :  { %10318 = vmatpush1.bf16.msra.mxu0 %v14990_v44  ;;  %v15053_v44 = vld [vmem:[#allocation11 + $0xd50] ss:$36 sps:$4 sm:$0xff]  }
 0x57e   :  { %10379 = vmatpush2.bf16.msra.mxu1 %v14993_v46  ;;  %10319 = vmatprep.subr.bf16.mxu0 %v14998_v11  ;;  %v15058_v46 = vld [vmem:[#allocation11 + $0x49c] ss:$36 sps:$4 sm:$0xff]   ;;  %v15061_v11 = vld [vmem:[#allocation11 + $0xd0c] ss:$36 sps:$4 sm:$0xff]  }
 0x57f   :  { %10380 = vmatprep.subr.bf16.mxu1 %v15001_v22  ;;  %v15056_v22 = vld [vmem:[#allocation11 + $0x498] ss:$36 sps:$4 sm:$0xff]  }
 0x581   :  { %10320 = vmatpush1.bf16.msra.mxu0 %v14996_v49  ;;  %v15059_v49 = vld [vmem:[#allocation11 + $0xd08] ss:$36 sps:$4 sm:$0xff]  }
 0x582   :  { %10381 = vmatpush2.bf16.msra.mxu1 %v14999_v50  ;;  %10321 = vmatprep.subr.bf16.mxu0 %v15004_v31  ;;  %v15064_v50 = vld [vmem:[#allocation11 + $0x8d4] ss:$36 sps:$4 sm:$0xff]   ;;  %v15067_v31 = vld [vmem:[#allocation11 + $0xcc4] ss:$36 sps:$4 sm:$0xff]  }
 0x583   :  { %10432 = vmatprep.subr.bf16.mxu1 %v15007_v7  ;;  %v15062_v7 = vld [vmem:[#allocation11 + $0x8d0] ss:$36 sps:$4 sm:$0xff]  }
 0x585   :  { %10322 = vmatpush1.bf16.msra.mxu0 %v15002_v51  ;;  %v15926_v47 = vpop.f32.mrf.mxu1  ;;  %10383 = vmatmul.mubr.bf16.vlgmr.msra.gmra.mxu1 %v15832_v32  ;;  %v15065_v51 = vld [vmem:[#allocation11 + $0xcc0] ss:$36 sps:$4 sm:$0xff]  }
 0x586   :  { %10433 = vmatpush1.bf16.msra.mxu1 %v15005_v9  ;;  %10464 = vmatprep.mubr.bf16.mxu1 %v15834_v33  ;;  %v15070_v9 = vld [vmem:[#allocation11 + $0x88c] ss:$36 sps:$4 sm:$0xff]  }
 0x587   :  { %v15930_v62 = vpop.f32.mrf.mxu1  ;;  %10323 = vmatprep.subr.bf16.mxu0 %v15010_v53  ;;  %10434 = vmatprep.subr.bf16.mxu1 %v15013_v55  ;;  %v15073_v53 = vld [vmem:[#allocation11 + $0xc7c] ss:$36 sps:$4 sm:$0xff]  }
 0x589   :  { %10324 = vmatpush1.bf16.msra.mxu0 %v15008_v56  ;;  %v10142_v57 = vpop.f32.mrf.mxu1 }
 0x58a   :  { %10435 = vmatpush1.bf16.msra.mxu1 %v15011_v59  ;;  %10391 = vmatprep.subr.bf16.mxu0 %v15016_v61  ;;  %v15068_v59 = vld [vmem:[#allocation11 + $0x888] ss:$36 sps:$4 sm:$0xff]  }
 0x58b   :  { %v10143_v26 = vpop.f32.mrf.mxu1  ;;  %10436 = vmatprep.subr.bf16.mxu1 %v15019_v29  ;;  %v15071_v29 = vld [vmem:[#allocation11 + $0xc78] ss:$36 sps:$4 sm:$0xff]   ;;  %v15076_v57 = vld [vmem:[#allocation11 + $0x844] ss:$36 sps:$4 sm:$0xff]  }
 0x58c   :  { %10342 = vmatmul.mubr.bf16.vlgmr.msra.gmra.mxu0 %v15870_v19 }
 0x58d   :  { %10392 = vmatpush1.bf16.msra.mxu0 %v15014_v30  ;;  %10423 = vmatprep.mubr.bf16.mxu0 %v15820_v17 }
 0x58e   :  { %10437 = vmatpush1.bf16.msra.mxu1 %v15017_v21  ;;  %10393 = vmatprep.subr.bf16.mxu0 %v15022_v2  ;;  %v15079_v2 = vld [vmem:[#allocation11 + $0xc34] ss:$36 sps:$4 sm:$0xff]  }
 0x58f   :  { %10438 = vmatprep.subr.bf16.mxu1 %v15025_v4 }
 0x591   :  { %10394 = vmatpush1.bf16.msra.mxu0 %v15020_v6 }
 0x592   :  { %10439 = vmatpush1.bf16.msra.mxu1 %v15023_v45  ;;  %10395 = vmatprep.subr.bf16.mxu0 %v15028_v14  ;;  %v15077_v45 = vld [vmem:[#allocation11 + $0xc30] ss:$36 sps:$4 sm:$0xff]   ;;  %v15082_v14 = vld [vmem:[#allocation11 + $0x7fc] ss:$36 sps:$4 sm:$0xff]  }
 0x593   :  { %10440 = vmatprep.subr.bf16.mxu1 %v15031_v35  ;;  %v15085_v35 = vld [vmem:[#allocation11 + $0xbec] ss:$36 sps:$4 sm:$0xff]  }
 0x595   :  { %10396 = vmatpush1.bf16.msra.mxu0 %v15026_v42  ;;  %v15088_v42 = vld [vmem:[#allocation11 + $0x7b4] ss:$36 sps:$4 sm:$0xff]  }
 0x596   :  { %10441 = vmatpush1.bf16.msra.mxu1 %v15029_v38  ;;  %10397 = vmatprep.subr.bf16.mxu0 %v15034_v28  ;;  %v15091_v38 = vld [vmem:[#allocation11 + $0xba4] ss:$36 sps:$4 sm:$0xff]  }
 0x597   :  { %10442 = vmatprep.subr.bf16.mxu1 %v15037_v12  ;;  %v15089_v28 = vld [vmem:[#allocation11 + $0xba0] ss:$36 sps:$4 sm:$0xff]   ;;  %v15094_v12 = vld [vmem:[#allocation11 + $0x76c] ss:$36 sps:$4 sm:$0xff]  }
 0x599   :  { %10398 = vmatpush1.bf16.msra.mxu0 %v15032_v10  ;;  %v15097_v10 = vld [vmem:[#allocation11 + $0xb5c] ss:$36 sps:$4 sm:$0xff]  }
 0x59a   :  { %10443 = vmatpush1.bf16.msra.mxu1 %v15035_v5  ;;  %10399 = vmatprep.subr.bf16.mxu0 %v15040_v34  ;;  %v15092_v5 = vld [vmem:[#allocation11 + $0x768] ss:$36 sps:$4 sm:$0xff]   ;;  %v15095_v34 = vld [vmem:[#allocation11 + $0xb58] ss:$36 sps:$4 sm:$0xff]  }
 0x59b   :  { %10444 = vmatprep.subr.bf16.mxu1 %v15043_v3  ;;  %v15100_v3 = vld [vmem:[#allocation11 + $0x724] ss:$36 sps:$4 sm:$0xff]  }
 0x59d   :  { %10400 = vmatpush1.bf16.msra.mxu0 %v15038_v18  ;;  %v15103_v18 = vld [vmem:[#allocation11 + $0x1414] ss:$36 sps:$4 sm:$0xff]  }
 0x59e   :  { %10445 = vmatpush1.bf16.msra.mxu1 %v15041_v63  ;;  %10401 = vmatprep.subr.bf16.mxu0 %v15046_v13  ;;  %v15098_v63 = vld [vmem:[#allocation11 + $0x720] ss:$36 sps:$4 sm:$0xff]   ;;  %v15101_v13 = vld [vmem:[#allocation11 + $0x1410] ss:$36 sps:$4 sm:$0xff]  }
 0x59f   :  { %10446 = vmatprep.subr.bf16.mxu1 %v15049_v20  ;;  %v15106_v20 = vld [vmem:[#allocation11 + $0x6dc] ss:$36 sps:$4 sm:$0xff]  }
 0x5a1   :  { %10402 = vmatpush1.bf16.msra.mxu0 %v15044_v24  ;;  %v15109_v24 = vld [vmem:[#allocation11 + $0x13cc] ss:$36 sps:$4 sm:$0xff]  }
 0x5a2   :  { %10447 = vmatpush1.bf16.msra.mxu1 %v15047_v41  ;;  %10403 = vmatprep.subr.bf16.mxu0 %v15052_v36  ;;  %v15104_v36 = vld [vmem:[#allocation11 + $0x6d8] ss:$36 sps:$4 sm:$0xff]  }
 0x5a3   :  { %10448 = vmatprep.subr.bf16.mxu1 %v15055_v52  ;;  %v15107_v52 = vld [vmem:[#allocation11 + $0x13c8] ss:$36 sps:$4 sm:$0xff]  }
 0x5a5   :  { %10404 = vmatpush1.bf16.msra.mxu0 %v15050_v27  ;;  %v15112_v27 = vld [vmem:[#allocation11 + $0xf94] ss:$36 sps:$4 sm:$0xff]  }
 0x5a6   :  { %10449 = vmatpush2.bf16.msra.mxu1 %v15053_v44  ;;  %10405 = vmatprep.subr.bf16.mxu0 %v15058_v46  ;;  %v15115_v46 = vld [vmem:[#allocation11 + $0x1384] ss:$36 sps:$4 sm:$0xff]  }
 0x5a7   :  { %10450 = vmatprep.subr.bf16.mxu1 %v15061_v11 }
 0x5a9   :  { %10406 = vmatpush1.bf16.msra.mxu0 %v15056_v22  ;;  %v15110_v22 = vld [vmem:[#allocation11 + $0xf90] ss:$36 sps:$4 sm:$0xff]  }
 0x5aa   :  { %10451 = vmatpush2.bf16.msra.mxu1 %v15059_v49  ;;  %10407 = vmatprep.subr.bf16.mxu0 %v15064_v50  ;;  %v15113_v49 = vld [vmem:[#allocation11 + $0x1380] ss:$36 sps:$4 sm:$0xff]   ;;  %v15118_v50 = vld [vmem:[#allocation11 + $0xf4c] ss:$36 sps:$4 sm:$0xff]  }
 0x5ab   :  { %10452 = vmatprep.subr.bf16.mxu1 %v15067_v31 }
 0x5ac   :  { %v10097_v55 = vpop.f32.mrf.mxu0 }
 0x5ad   :  { %v10098_v56 = vadd.f32 %v10097_v55, %v15922_v37  ;;  %10408 = vmatpush2.bf16.msra.mxu0 %v15062_v7  ;;  %v15074_v37 = vld [vmem:[#allocation11 + $0x840] ss:$36 sps:$4 sm:$0xff]  }
 0x5ae   :  { %v10099_v61 = vpop.f32.mrf.mxu0  ;;  %10453 = vmatpush2.bf16.msra.mxu1 %v15065_v51  ;;  %10409 = vmatprep.subr.bf16.mxu0 %v15070_v9  ;;  %v15121_v7 = vld [vmem:[#allocation11 + $0x133c] ss:$36 sps:$4 sm:$0xff]   ;;  %v15116_v51 = vld [vmem:[#allocation11 + $0xf48] ss:$36 sps:$4 sm:$0xff]  }
 0x5af   :  { %v15936_v30 = vadd.f32 %v15926_v47, %v10098_v56  ;;  %v10100_v21 = vadd.f32 %v10099_v61, %v15924_v40  ;;  %10454 = vmatprep.subr.bf16.mxu1 %v15073_v53  ;;  %v15080_v47 = vld [vmem:[#allocation11 + $0x7f8] ss:$36 sps:$4 sm:$0xff]   ;;  %v15083_v40 = vld [vmem:[#allocation11 + $0xbe8] ss:$36 sps:$4 sm:$0xff]   ;;  %v15122_v55 = vld [vmem:[#allocation11 + $0xf00] ss:$36 sps:$4 sm:$0xff]  }
 0x5b0   :  { %v10101_v26 = vpop.f32.mrf.mxu0  ;;  %v15119_v9 = vld [vmem:[#allocation11 + $0x1338] ss:$36 sps:$4 sm:$0xff]   ;;  %v15125_v56 = vld [vmem:[#allocation11 + $0x12f0] ss:$36 sps:$4 sm:$0xff]  }
 0x5b1   :  { %v15940_v4 = vadd.f32 %v15930_v62, %v10100_v21  ;;  %10410 = vmatpush2.bf16.msra.mxu0 %v15068_v59  ;;  %v15086_v62 = vld [vmem:[#allocation11 + $0x7b0] ss:$36 sps:$4 sm:$0xff]   ;;  %v15130_v59 = vld [vmem:[#allocation11 + $0xebc] ss:$36 sps:$4 sm:$0xff]  }
 0x5b2   :  { %v10102_v6 = vpop.f32.mrf.mxu0  ;;  %10455 = vmatpush2.bf16.msra.mxu1 %v15071_v29  ;;  %10411 = vmatprep.subr.bf16.mxu0 %v15076_v57  ;;  %v15127_v53 = vld [vmem:[#allocation11 + $0x12f4] ss:$36 sps:$4 sm:$0xff]   ;;  %v15133_v61 = vld [vmem:[#allocation11 + $0x12ac] ss:$36 sps:$4 sm:$0xff]  }
 0x5b3   :  { %10456 = vmatprep.subr.bf16.mxu1 %v15079_v2  ;;  %v15128_v29 = vld [vmem:[#allocation11 + $0xeb8] ss:$36 sps:$4 sm:$0xff]   ;;  %v15131_v57 = vld [vmem:[#allocation11 + $0x12a8] ss:$36 sps:$4 sm:$0xff]   ;;  %v15134_v26 = vld [vmem:[#allocation11 + $0xe70] ss:$36 sps:$4 sm:$0xff]  }
 0x5b4   :  { %v15136_v21 = vld [vmem:[#allocation11 + $0xe74] ss:$36 sps:$4 sm:$0xff]   ;;  %v15139_v2 = vld [vmem:[#allocation11 + $0x1264] ss:$36 sps:$4 sm:$0xff]   ;;  %v15142_v6 = vld [vmem:[#allocation11 + $0xe2c] ss:$36 sps:$4 sm:$0xff]  }
 0x5b5   :  { %10412 = vmatpush2.bf16.msra.mxu0 %v15074_v37  ;;  %v15137_v37 = vld [vmem:[#allocation11 + $0x1260] ss:$36 sps:$4 sm:$0xff]  }
 0x5b6   :  { %10457 = vmatpush2.bf16.msra.mxu1 %v15077_v45  ;;  %10413 = vmatprep.subr.bf16.mxu0 %v15082_v14  ;;  %v15145_v45 = vld [vmem:[#allocation11 + $0x121c] ss:$36 sps:$4 sm:$0xff]   ;;  %v15140_v14 = vld [vmem:[#allocation11 + $0xe28] ss:$36 sps:$4 sm:$0xff]  }
 0x5b7   :  { %10458 = vmatprep.subr.bf16.mxu1 %v15085_v35  ;;  %v15143_v35 = vld [vmem:[#allocation11 + $0x1218] ss:$36 sps:$4 sm:$0xff]  }
 0x5b9   :  { %10414 = vmatpush2.bf16.msra.mxu0 %v15080_v47  ;;  %v15148_v47 = vld [vmem:[#allocation11 + $0xde4] ss:$36 sps:$4 sm:$0xff]  }
 0x5ba   :  { %10459 = vmatpush2.bf16.msra.mxu1 %v15083_v40  ;;  %10415 = vmatprep.subr.bf16.mxu0 %v15088_v42  ;;  %v15149_v40 = vld [vmem:[#allocation11 + $0x8d8] ss:$36 sps:$4 sm:$0xff]   ;;  %v15146_v42 = vld [vmem:[#allocation11 + $0xde0] ss:$36 sps:$4 sm:$0xff]  }
 0x5bb   :  { %10460 = vmatprep.subr.bf16.mxu1 %v15091_v38  ;;  %v15150_v38 = vld [vmem:[#allocation11 + $0x698] ss:$36 sps:$4 sm:$0xff]  }
 0x5bd   :  { %10416 = vmatpush2.bf16.msra.mxu0 %v15086_v62  ;;  %v15153_v62 = vld [vmem:[#allocation11 + $0xd9c] ss:$36 sps:$4 sm:$0xff]  }
 0x5be   :  { %10461 = vmatpush2.bf16.msra.mxu1 %v15089_v28  ;;  %10417 = vmatprep.subr.bf16.mxu0 %v15094_v12  ;;  %v15154_v28 = vld [vmem:[#allocation11 + $0x890] ss:$36 sps:$4 sm:$0xff]   ;;  %v15151_v12 = vld [vmem:[#allocation11 + $0xd98] ss:$36 sps:$4 sm:$0xff]  }
 0x5bf   :  { %10462 = vmatprep.subr.bf16.mxu1 %v15097_v10  ;;  %v15155_v10 = vld [vmem:[#allocation11 + $0x650] ss:$36 sps:$4 sm:$0xff]  }
 0x5c1   :  { %10418 = vmatpush2.bf16.msra.mxu0 %v15092_v5  ;;  %v15158_v5 = vld [vmem:[#allocation11 + $0x11d4] ss:$36 sps:$4 sm:$0xff]  }
 0x5c2   :  { %10463 = vmatpush2.bf16.msra.mxu1 %v15095_v34  ;;  %10419 = vmatprep.subr.bf16.mxu0 %v15100_v3  ;;  %v15159_v34 = vld [vmem:[#allocation11 + $0x848] ss:$36 sps:$4 sm:$0xff]   ;;  %v15952_v3 = vld [vmem:[#allocation13] sm:$0xff] }
 0x5c3   :  { %10514 = vmatprep.subr.bf16.mxu1 %v15103_v18  ;;  %v6397_v18 = vrot.slane %v15952_v3, %v15709_v15 }
 0x5c5   :  { %10420 = vmatpush2.bf16.msra.mxu0 %v15098_v63  ;;  %v15942_v41 = vpop.f32.mrf.mxu1  ;;  %10465 = vmatmul.mubr.bf16.vlgmr.msra.gmra.mxu1 %v15847_v1  ;;  %v15156_v63 = vld [vmem:[#allocation11 + $0x11d0] ss:$36 sps:$4 sm:$0xff]  }
 0x5c6   :  { %10515 = vmatpush1.bf16.msra.mxu1 %v15101_v13  ;;  %10421 = vmatprep.subr.bf16.mxu0 %v15106_v20  ;;  %v15160_v13 = vld [vmem:[#allocation11 + $0x608] ss:$36 sps:$4 sm:$0xff]  }
 0x5c7   :  { %v15945_v44 = vpop.f32.mrf.mxu1  ;;  %10516 = vmatprep.subr.bf16.mxu1 %v15109_v24  ;;  %10546 = vmatprep.mubr.bf16.mxu1 %v15549_v0  ;;  %v15124_v0 = vld [vmem:[#allocation11 + $0xf04] ss:$36 sps:$4 sm:$0xff]   ;;  %v15163_v20 = vld [vmem:[#allocation11 + $0x118c] ss:$36 sps:$4 sm:$0xff]   ;;  %v6401_v24 = vrot.slane %v15952_v3, %v15688_v58 }
 0x5c8   :  { %v15166_v58 = vld [vmem:[#allocation11 + $0x1140] ss:$36 sps:$4 sm:$0xff]  }
 0x5c9   :  { %10422 = vmatpush2.bf16.msra.mxu0 %v15104_v36  ;;  %v10224_v11 = vpop.f32.mrf.mxu1 }
 0x5ca   :  { %10517 = vmatpush1.bf16.msra.mxu1 %v15107_v52  ;;  %10473 = vmatprep.subr.bf16.mxu0 %v15112_v27  ;;  %v15161_v27 = vld [vmem:[#allocation11 + $0x1188] ss:$36 sps:$4 sm:$0xff]   ;;  %v15165_v11 = vld [vmem:[#allocation11 + $0x5c0] ss:$36 sps:$4 sm:$0xff]  }
 0x5cb   :  { %v10225_v31 = vpop.f32.mrf.mxu1  ;;  %10518 = vmatprep.subr.bf16.mxu1 %v15115_v46 }
 0x5cc   :  { %10424 = vmatmul.mubr.bf16.vlgmr.msra.gmra.mxu0 %v15839_v48 }
 0x5cd   :  { %10474 = vmatpush1.bf16.msra.mxu0 %v15110_v22  ;;  %10505 = vmatprep.mubr.bf16.mxu0 %v15853_v8  ;;  %v15168_v22 = vld [vmem:[#allocation11 + $0x1144] ss:$36 sps:$4 sm:$0xff]  }
 0x5ce   :  { %10519 = vmatpush1.bf16.msra.mxu1 %v15113_v49  ;;  %10475 = vmatprep.subr.bf16.mxu0 %v15118_v50  ;;  %v15169_v49 = vld [vmem:[#allocation11 + $0x7b8] ss:$36 sps:$4 sm:$0xff]  }
 0x5cf   :  { %10520 = vmatprep.subr.bf16.mxu1 %v15121_v7 }
 0x5d1   :  { %10476 = vmatpush1.bf16.msra.mxu0 %v15116_v51 }
 0x5d2   :  { %10521 = vmatpush1.bf16.msra.mxu1 %v15119_v9  ;;  %10477 = vmatprep.subr.bf16.mxu0 %v15124_v0  ;;  %v15170_v9 = vld [vmem:[#allocation11 + $0x578] ss:$36 sps:$4 sm:$0xff]  }
 0x5d3   :  { %10522 = vmatprep.subr.bf16.mxu1 %v15127_v53  ;;  %v15173_v0 = vld [vmem:[#allocation11 + $0x10fc] ss:$36 sps:$4 sm:$0xff]   ;;  %v15174_v53 = vld [vmem:[#allocation11 + $0x770] ss:$36 sps:$4 sm:$0xff]  }
 0x5d5   :  { %10478 = vmatpush1.bf16.msra.mxu0 %v15122_v55  ;;  %v15171_v55 = vld [vmem:[#allocation11 + $0x10f8] ss:$36 sps:$4 sm:$0xff]  }
 0x5d6   :  { %10523 = vmatpush1.bf16.msra.mxu1 %v15125_v56  ;;  %10479 = vmatprep.subr.bf16.mxu0 %v15130_v59  ;;  %v15175_v56 = vld [vmem:[#allocation11 + $0x530] ss:$36 sps:$4 sm:$0xff]   ;;  %v15179_v59 = vld [vmem:[#allocation11 + $0x728] ss:$36 sps:$4 sm:$0xff]  }
 0x5d7   :  { %10524 = vmatprep.subr.bf16.mxu1 %v15133_v61  ;;  %v15176_v61 = vld [vmem:[#allocation11 + $0x10b0] ss:$36 sps:$4 sm:$0xff]  }
 0x5d9   :  { %10480 = vmatpush1.bf16.msra.mxu0 %v15128_v29  ;;  %v15183_v29 = vld [vmem:[#allocation11 + $0x106c] ss:$36 sps:$4 sm:$0xff]  }
 0x5da   :  { %10525 = vmatpush1.bf16.msra.mxu1 %v15131_v57  ;;  %10481 = vmatprep.subr.bf16.mxu0 %v15136_v21  ;;  %v15184_v57 = vld [vmem:[#allocation11 + $0x6e0] ss:$36 sps:$4 sm:$0xff]   ;;  %v15181_v21 = vld [vmem:[#allocation11 + $0x1068] ss:$36 sps:$4 sm:$0xff]  }
 0x5db   :  { %10526 = vmatprep.subr.bf16.mxu1 %v15139_v2  ;;  %v15185_v2 = vld [vmem:[#allocation11 + $0x4a0] ss:$36 sps:$4 sm:$0xff]  }
 0x5dd   :  { %10482 = vmatpush1.bf16.msra.mxu0 %v15134_v26  ;;  %v15188_v26 = vld [vmem:[#allocation11 + $0x1024] ss:$36 sps:$4 sm:$0xff]  }
 0x5de   :  { %10527 = vmatpush1.bf16.msra.mxu1 %v15137_v37  ;;  %10483 = vmatprep.subr.bf16.mxu0 %v15142_v6  ;;  %v15189_v37 = vld [vmem:[#allocation11 + $0x11d8] ss:$36 sps:$4 sm:$0xff]   ;;  %v15186_v6 = vld [vmem:[#allocation11 + $0x1020] ss:$36 sps:$4 sm:$0xff]  }
 0x5df   :  { %10528 = vmatprep.subr.bf16.mxu1 %v15145_v45  ;;  %v15190_v45 = vld [vmem:[#allocation11 + $0xf98] ss:$36 sps:$4 sm:$0xff]  }
 0x5e1   :  { %10484 = vmatpush1.bf16.msra.mxu0 %v15140_v14  ;;  %v15193_v14 = vld [vmem:[#allocation11 + $0xfdc] ss:$36 sps:$4 sm:$0xff]  }
 0x5e2   :  { %10529 = vmatpush1.bf16.msra.mxu1 %v15143_v35  ;;  %10485 = vmatprep.subr.bf16.mxu0 %v15148_v47  ;;  %v15194_v35 = vld [vmem:[#allocation11 + $0x1190] ss:$36 sps:$4 sm:$0xff]  }
 0x5e3   :  { %13093 = vmatprep.subr.bf16.mxu1 %v15149_v40  ;;  %v15191_v40 = vld [vmem:[#allocation11 + $0xfd8] ss:$36 sps:$4 sm:$0xff]  }
 0x5e5   :  { %10486 = vmatpush1.bf16.msra.mxu0 %v15146_v42  ;;  %10547 = vmatmul.mubr.bf16.vlgmr.msra.gmra.mxu1 %v15870_v19  ;;  %v15195_v42 = vld [vmem:[#allocation11 + $0xf50] ss:$36 sps:$4 sm:$0xff]  }
 0x5e6   :  { %13094 = vmatpush3.bf16.msra.mxu1 %v15150_v38  ;;  %10627 = vmatprep.mubr.bf16.mxu1 %v15820_v17  ;;  %v15164_v17 = vld [vmem:[#allocation11 + $0x800] ss:$36 sps:$4 sm:$0xff]   ;;  %v15196_v38 = vld [vmem:[#allocation11 + $0x458] ss:$36 sps:$4 sm:$0xff]  }
 0x5e7   :  { %10487 = vmatprep.subr.bf16.mxu0 %v15153_v62  ;;  %13095 = vmatprep.subr.bf16.mxu1 %v15154_v28  ;;  %v15198_v28 = vld [vmem:[#allocation11 + $0x1148] ss:$36 sps:$4 sm:$0xff]  }
 0x5e9   :  { %10488 = vmatpush1.bf16.msra.mxu0 %v15151_v12 }
 0x5ea   :  { %13096 = vmatpush3.bf16.msra.mxu1 %v15155_v10  ;;  %10489 = vmatprep.subr.bf16.mxu0 %v15158_v5  ;;  %v15197_v10 = vld [vmem:[#allocation11 + $0x218] ss:$36 sps:$4 sm:$0xff]   ;;  %v15199_v5 = vld [vmem:[#allocation11 + $0xf08] ss:$36 sps:$4 sm:$0xff]  }
 0x5eb   :  { %13097 = vmatprep.subr.bf16.mxu1 %v15159_v34  ;;  %v15200_v34 = vld [vmem:[#allocation11 + $0x410] ss:$36 sps:$4 sm:$0xff]  }
 0x5ec   :  { %v10179_v36 = vpop.f32.mrf.mxu0 }
 0x5ed   :  { %v10180_v52 = vadd.f32 %v10179_v36, %v6397_v18  ;;  %10490 = vmatpush2.bf16.msra.mxu0 %v15156_v63  ;;  %v15203_v63 = vld [vmem:[#allocation11 + $0xec0] ss:$36 sps:$4 sm:$0xff]  }
 0x5ee   :  { %v10181_v46 = vpop.f32.mrf.mxu0  ;;  %13098 = vmatpush3.bf16.msra.mxu1 %v15160_v13  ;;  %10491 = vmatprep.subr.bf16.mxu0 %v15163_v20  ;;  %v15204_v13 = vld [vmem:[#allocation11 + $0x3c8] ss:$36 sps:$4 sm:$0xff]   ;;  %v15206_v20 = vld [vmem:[#allocation11 + $0x10b8] ss:$36 sps:$4 sm:$0xff]   ;;  %v15208_v36 = vld [vmem:[#allocation11 + $0x380] ss:$36 sps:$4 sm:$0xff]  }
 0x5ef   :  { %v10182_v15 = vadd.f32 %v10181_v46, %v6401_v24  ;;  %13099 = vmatprep.subr.bf16.mxu1 %v15164_v17  ;;  %v15959_v50 = vadd.f32 %v15942_v41, %v10180_v52  ;;  %v15178_v41 = vld [vmem:[#allocation11 + $0x10b4] ss:$36 sps:$4 sm:$0xff]   ;;  %v15205_v24 = vld [vmem:[#allocation11 + $0x188] ss:$36 sps:$4 sm:$0xff]  }
 0x5f0   :  { %v10183_v31 = vpop.f32.mrf.mxu0  ;;  %v15207_v17 = vld [vmem:[#allocation11 + $0xe78] ss:$36 sps:$4 sm:$0xff]   ;;  %v15210_v52 = vld [vmem:[#allocation11 + $0x1070] ss:$36 sps:$4 sm:$0xff]  }
 0x5f1   :  { %10492 = vmatpush2.bf16.msra.mxu0 %v15161_v27  ;;  %v15962_v7 = vadd.f32 %v15945_v44, %v10182_v15  ;;  %v15180_v44 = vld [vmem:[#allocation11 + $0x4e8] ss:$36 sps:$4 sm:$0xff]   ;;  %v15209_v27 = vld [vmem:[#allocation11 + $0x140] ss:$36 sps:$4 sm:$0xff]   ;;  %v15212_v46 = vld [vmem:[#allocation11 + $0x338] ss:$36 sps:$4 sm:$0xff]  }
 0x5f2   :  { %v10184_v51 = vpop.f32.mrf.mxu0  ;;  %13100 = vmatpush3.bf16.msra.mxu1 %v15165_v11  ;;  %10493 = vmatprep.subr.bf16.mxu0 %v15168_v22  ;;  %v15214_v11 = vld [vmem:[#allocation11 + $0x1028] ss:$36 sps:$4 sm:$0xff]   ;;  %v15213_v22 = vld [vmem:[#allocation11 + $0xf8] ss:$36 sps:$4 sm:$0xff]   ;;  %v15218_v31 = vld [vmem:[#allocation11 + $0xfe0] ss:$36 sps:$4 sm:$0xff]  }
 0x5f3   :  { %13101 = vmatprep.subr.bf16.mxu1 %v15169_v49  ;;  %v15215_v15 = vld [vmem:[#allocation11 + $0xde8] ss:$36 sps:$4 sm:$0xff]   ;;  %v15216_v49 = vld [vmem:[#allocation11 + $0x2f0] ss:$36 sps:$4 sm:$0xff]   ;;  %v15219_v51 = vld [vmem:[#allocation11 + $0xda0] ss:$36 sps:$4 sm:$0xff]  }
 0x5f5   :  { %10494 = vmatpush2.bf16.msra.mxu0 %v15166_v58  ;;  %v15217_v58 = vld [vmem:[#allocation11 + $0xb0] ss:$36 sps:$4 sm:$0xff]  }
 0x5f6   :  { %13102 = vmatpush3.bf16.msra.mxu1 %v15170_v9  ;;  %10495 = vmatprep.subr.bf16.mxu0 %v15173_v0  ;;  %v15220_v9 = vld [vmem:[#allocation11 + $0x2a8] ss:$36 sps:$4 sm:$0xff]  }
 0x5f7   :  { %13103 = vmatprep.subr.bf16.mxu1 %v15174_v53  ;;  %v15222_v0 = vld [vmem:[#allocation14 + $0x78] sm:$0xff]   ;;  %v10756_v53 = vmax.f32 %v15910_v39, 0.0  ;;  %v15230_v39 = vld [vmem:[#allocation14 + $0x68] sm:$0xff]  }
 0x5f9   :  { %10496 = vmatpush2.bf16.msra.mxu0 %v15171_v55  ;;  %v15221_v55 = vld [vmem:[#allocation11 + $0x68] ss:$36 sps:$4 sm:$0xff]  }
 0x5fa   :  { %13104 = vmatpush3.bf16.msra.mxu1 %v15175_v56  ;;  %10497 = vmatprep.subr.bf16.mxu0 %v15178_v41  ;;  %v15223_v56 = vld [vmem:[#allocation14 + $0x38] sm:$0xff]  }
 0x5fb   :  { %13105 = vmatprep.subr.bf16.mxu1 %v15179_v59  ;;  %v15224_v41 = vld [vmem:[#allocation11 + $0x260] ss:$36 sps:$4 sm:$0xff]  }
 0x5fc   :  { %v15226_v59 = vld [vmem:[#allocation14 + $0x70] sm:$0xff]  }
 0x5fd   :  { %10498 = vmatpush2.bf16.msra.mxu0 %v15176_v61  ;;  %v10765_v61 = vpack.c.bf16 %v10756_v53, %v10756_v53 }
 0x5fe   :  { %13106 = vmatpush3.bf16.msra.mxu1 %v15180_v44  ;;  %10499 = vmatprep.subr.bf16.mxu0 %v15183_v29  ;;  %v15225_v44 = vld [vmem:[#allocation11 + $0x20] ss:$36 sps:$4 sm:$0xff]  }
 0x5ff   :  { %13107 = vmatprep.subr.bf16.mxu1 %v15184_v57  ;;  %v15227_v29 = vld [vmem:[#allocation14 + $0x30] sm:$0xff]  }
 0x600   :  { %v15228_v57 = vld [vmem:[#allocation11 + $0xd58] ss:$36 sps:$4 sm:$0xff]  }
 0x601   :  { %10500 = vmatpush2.bf16.msra.mxu0 %v15181_v21  ;;  %v15229_v21 = vld [vmem:[#allocation11 + $0xb18] ss:$36 sps:$4 sm:$0xff]  }
 0x602   :  { %13108 = vmatpush3.bf16.msra.mxu1 %v15185_v2  ;;  %10501 = vmatprep.subr.bf16.mxu0 %v15188_v26  ;;  %v15231_v2 = vld [vmem:[#allocation14 + $0x28] sm:$0xff]  }
 0x603   :  { %13137 = vmatprep.subr.bf16.mxu1 %v15189_v37  ;;  %v15232_v26 = vld [vmem:[#allocation11 + $0xd10] ss:$36 sps:$4 sm:$0xff]  }
 0x604   :  { %v15234_v37 = vld [vmem:[#allocation14 + $0x60] sm:$0xff]  }
 0x605   :  { %10502 = vmatpush2.bf16.msra.mxu0 %v15186_v6  ;;  %v15964_v47 = vpop.f32.mrf.mxu1  ;;  %10628 = vmatmul.mubr.bf16.vlgmr.msra.gmra.mxu1 %v15839_v48  ;;  %v15202_v48 = vld [vmem:[#allocation11 + $0x1100] ss:$36 sps:$4 sm:$0xff]  }
 0x606   :  { %13138 = vmatpush3.bf16.msra.mxu1 %v15190_v45  ;;  %10707 = vmatprep.mubr.bf16.mxu1 %v15853_v8  ;;  %v15201_v8 = vld [vmem:[#allocation11 + $0x1d0] ss:$36 sps:$4 sm:$0xff]  }
 0x607   :  { %v15968_v62 = vpop.f32.mrf.mxu1  ;;  %10503 = vmatprep.subr.bf16.mxu0 %v15193_v14  ;;  %13139 = vmatprep.subr.bf16.mxu1 %v15194_v35  ;;  %v15233_v45 = vld [vmem:[#allocation11 + $0xad0] ss:$36 sps:$4 sm:$0xff]  }
 0x608   :  { %v15235_v35 = vld [vmem:[#allocation14 + $0x20] sm:$0xff]  }
 0x609   :  { %10504 = vmatpush2.bf16.msra.mxu0 %v15191_v40  ;;  %v10306_v12 = vpop.f32.mrf.mxu1  ;;  %v15236_v40 = vld [vmem:[#allocation11 + $0xcc8] ss:$36 sps:$4 sm:$0xff]  }
 0x60a   :  { %13140 = vmatpush3.bf16.msra.mxu1 %v15195_v42  ;;  %13071 = vmatprep.subr.bf16.mxu0 %v15196_v38  ;;  %v15238_v38 = vld [vmem:[#allocation14 + $0x58] sm:$0xff]  }
 0x60b   :  { %v10307_v18 = vpop.f32.mrf.mxu1  ;;  %13141 = vmatprep.subr.bf16.mxu1 %v15198_v28 }
 0x60c   :  { %10506 = vmatmul.mubr.bf16.vlgmr.msra.gmra.mxu0 %v15858_v54  ;;  %v15243_v18 = vld [vmem:[#allocation14 + $0x10] sm:$0xff]  }
 0x60d   :  { %13072 = vmatpush3.bf16.msra.mxu0 %v15197_v10  ;;  %10587 = vmatprep.mubr.bf16.mxu0 %v15810_v60  ;;  %v15211_v60 = vld [vmem:[#allocation11 + $0xe30] ss:$36 sps:$4 sm:$0xff]   ;;  %v15239_v10 = vld [vmem:[#allocation14 + $0x18] sm:$0xff]  }
 0x60e   :  { %13142 = vmatpush3.bf16.msra.mxu1 %v15199_v5  ;;  %13073 = vmatprep.subr.bf16.mxu0 %v15200_v34  ;;  %v15240_v5 = vld [vmem:[#allocation11 + $0xc80] ss:$36 sps:$4 sm:$0xff]  }
 0x60f   :  { %13143 = vmatprep.subr.bf16.mxu1 %v15202_v48  ;;  %v15242_v34 = vld [vmem:[#allocation14 + $0x50] sm:$0xff]   ;;  %v15246_v48 = vld [vmem:[#allocation14 + $0x48] sm:$0xff]  }
 0x611   :  { %13074 = vmatpush3.bf16.msra.mxu0 %v15201_v8  ;;  %v15245_v8 = vld [vmem:[#allocation11 + $0x9f8] ss:$36 sps:$4 sm:$0xff]  }
 0x612   :  { %13144 = vmatpush3.bf16.msra.mxu1 %v15203_v63  ;;  %13075 = vmatprep.subr.bf16.mxu0 %v15204_v13  ;;  %v15248_v63 = vld [vmem:[#allocation11 + $0xbf0] ss:$36 sps:$4 sm:$0xff]  }
 0x613   :  { %13145 = vmatprep.subr.bf16.mxu1 %v15206_v20  ;;  %v15250_v13 = vld [vmem:[#allocation14 + $0x40] sm:$0xff]  }
 0x614   :  { %v15249_v20 = vld [vmem:[#allocation11 + $0x9b0] ss:$36 sps:$4 sm:$0xff]  }
 0x615   :  { %13076 = vmatpush3.bf16.msra.mxu0 %v15205_v24  ;;  %v15251_v24 = vld [vmem:[#allocation14] sm:$0xff]  }
 0x616   :  { %13146 = vmatpush3.bf16.msra.mxu1 %v15207_v17  ;;  %13077 = vmatprep.subr.bf16.mxu0 %v15208_v36  ;;  %v15252_v17 = vld [vmem:[#allocation11 + $0xba8] ss:$36 sps:$4 sm:$0xff]   ;;  %v10755_v36 = vmax.f32 %v15906_v16, 0.0 }
 0x617   :  { %13147 = vmatprep.subr.bf16.mxu1 %v15210_v52  ;;  %v15254_v52 = vld [vmem:[#allocation14 + $0x178] sm:$0xff]  }
 0x619   :  { %13078 = vmatpush3.bf16.msra.mxu0 %v15209_v27  ;;  %v15253_v27 = vld [vmem:[#allocation11 + $0x968] ss:$36 sps:$4 sm:$0xff]  }
 0x61a   :  { %13148 = vmatpush3.bf16.msra.mxu1 %v15211_v60  ;;  %13079 = vmatprep.subr.bf16.mxu0 %v15212_v46  ;;  %v15255_v60 = vld [vmem:[#allocation14 + $0x138] sm:$0xff]  }
 0x61b   :  { %13149 = vmatprep.subr.bf16.mxu1 %v15214_v11  ;;  %v15256_v46 = vld [vmem:[#allocation11 + $0xb60] ss:$36 sps:$4 sm:$0xff]   ;;  %v10764_v11 = vpack.c.bf16 %v10755_v36, %v10755_v36  ;;  %v15294_v36 = vld [vmem:[#allocation14 + $0xc0] sm:$0xff]  }
 0x61d   :  { %13080 = vmatpush3.bf16.msra.mxu0 %v15213_v22  ;;  %v15258_v22 = vld [vmem:[#allocation14 + $0x170] sm:$0xff]  }
 0x61e   :  { %13150 = vmatpush3.bf16.msra.mxu1 %v15215_v15  ;;  %13081 = vmatprep.subr.bf16.mxu0 %v15216_v49  ;;  %v15257_v49 = vld [vmem:[#allocation11 + $0x920] ss:$36 sps:$4 sm:$0xff]  }
 0x61f   :  { %13151 = vmatprep.subr.bf16.mxu1 %v15218_v31  ;;  %v15259_v31 = vld [vmem:[#allocation14 + $0x130] sm:$0xff]  }
 0x621   :  { %13082 = vmatpush3.bf16.msra.mxu0 %v15217_v58  ;;  %v15261_v58 = vld [vmem:[#allocation14 + $0x168] sm:$0xff]  }
 0x622   :  { %13152 = vmatpush3.bf16.msra.mxu1 %v15219_v51  ;;  %13083 = vmatprep.subr.bf16.mxu0 %v15220_v9  ;;  %v15260_v9 = vld [vmem:[#allocation11 + $0x1418] ss:$36 sps:$4 sm:$0xff]  }
 0x623   :  { %13168 = vmatprep.subr.bf16.mxu1 %v15222_v0  ;;  %v15262_v0 = vld [vmem:[#allocation14 + $0x128] sm:$0xff]  }
 0x625   :  { %13084 = vmatpush3.bf16.msra.mxu0 %v15221_v55  ;;  %10708 = vmatmul.mubr.bf16.vlgmr.msra.gmra.mxu1 %v15858_v54  ;;  %v15264_v55 = vld [vmem:[#allocation14 + $0x160] sm:$0xff]  }
 0x626   :  { %13169 = vmatpush3.bf16.msra.mxu1 %v15223_v56  ;;  %11388 = vmatprep.mubr.bf16.mxu1 %v10765_v61  ;;  %v15265_v61 = vld [vmem:[#allocation14 + $0x120] sm:$0xff]  }
 0x627   :  { %13085 = vmatprep.subr.bf16.mxu0 %v15224_v41  ;;  %13170 = vmatprep.subr.bf16.mxu1 %v15226_v59  ;;  %v15263_v41 = vld [vmem:[#allocation11 + $0x13d0] ss:$36 sps:$4 sm:$0xff]  }
 0x629   :  { %13086 = vmatpush3.bf16.msra.mxu0 %v15225_v44 }
 0x62a   :  { %13171 = vmatpush3.bf16.msra.mxu1 %v15227_v29  ;;  %13115 = vmatprep.subr.bf16.mxu0 %v15228_v57  ;;  %v15267_v29 = vld [vmem:[#allocation14 + $0x158] sm:$0xff]  }
 0x62b   :  { %13172 = vmatprep.subr.bf16.mxu1 %v15230_v39 }
 0x62c   :  { %v10261_v6 = vpop.f32.mrf.mxu0  ;;  %10588 = vmatmul.mubr.bf16.vlgmr.msra.gmra.mxu0 %v15832_v32  ;;  %v15237_v32 = vld [vmem:[#allocation11 + $0xa88] ss:$36 sps:$4 sm:$0xff]  }
 0x62d   :  { %v10262_v54 = vadd.f32 %v10261_v6, %v15959_v50  ;;  %13116 = vmatpush3.bf16.msra.mxu0 %v15229_v21  ;;  %10667 = vmatprep.mubr.bf16.mxu0 %v15834_v33  ;;  %v15266_v21 = vld [vmem:[#allocation11 + $0x1388] ss:$36 sps:$4 sm:$0xff]   ;;  %v15269_v6 = vld [vmem:[#allocation11 + $0x1340] ss:$36 sps:$4 sm:$0xff]  }
 0x62e   :  { %v10263_v14 = vpop.f32.mrf.mxu0  ;;  %13173 = vmatpush3.bf16.msra.mxu1 %v15231_v2  ;;  %13117 = vmatprep.subr.bf16.mxu0 %v15232_v26 }
 0x62f   :  { %v10264_v42 = vadd.f32 %v10263_v14, %v15962_v7  ;;  %13174 = vmatprep.subr.bf16.mxu1 %v15234_v37  ;;  %v15979_v28 = vadd.f32 %v15964_v47, %v10262_v54  ;;  %v15241_v7 = vld [vmem:[#allocation11 + $0xa40] ss:$36 sps:$4 sm:$0xff]   ;;  %v15244_v47 = vld [vmem:[#allocation11 + $0xc38] ss:$36 sps:$4 sm:$0xff]  }
 0x630   :  { %v10265_v12 = vpop.f32.mrf.mxu0  ;;  %v15270_v37 = vld [vmem:[#allocation14 + $0x150] sm:$0xff]  }
 0x631   :  { %13118 = vmatpush3.bf16.msra.mxu0 %v15233_v45  ;;  %v15982_v50 = vadd.f32 %v15968_v62, %v10264_v42  ;;  %v15247_v62 = vld [vmem:[#allocation14 + $0x8] sm:$0xff]   ;;  %v15271_v54 = vld [vmem:[#allocation14 + $0x110] sm:$0xff]   ;;  %v15276_v42 = vld [vmem:[#allocation14 + $0x140] sm:$0xff]  }
 0x632   :  { %v10266_v33 = vpop.f32.mrf.mxu0  ;;  %13175 = vmatpush3.bf16.msra.mxu1 %v15235_v35  ;;  %13119 = vmatprep.subr.bf16.mxu0 %v15236_v40  ;;  %v15273_v45 = vld [vmem:[#allocation14 + $0x148] sm:$0xff]   ;;  %v15277_v12 = vld [vmem:[#allocation14 + $0x100] sm:$0xff]  }
 0x633   :  { %13176 = vmatprep.subr.bf16.mxu1 %v15238_v38  ;;  %v15272_v14 = vld [vmem:[#allocation11 + $0x12f8] ss:$36 sps:$4 sm:$0xff]   ;;  %v15275_v38 = vld [vmem:[#allocation11 + $0x12b0] ss:$36 sps:$4 sm:$0xff]  }
 0x634   :  { %v15274_v35 = vld [vmem:[#allocation14 + $0x108] sm:$0xff]  }
 0x635   :  { %13120 = vmatpush3.bf16.msra.mxu0 %v15237_v32 }
 0x636   :  { %13177 = vmatpush3.bf16.msra.mxu1 %v15239_v10  ;;  %13121 = vmatprep.subr.bf16.mxu0 %v15240_v5  ;;  %v15280_v10 = vld [vmem:[#allocation14 + $0xf8] sm:$0xff]   ;;  %v10758_v5 = vmax.f32 %v15940_v4, 0.0 }
 0x637   :  { %13178 = vmatprep.subr.bf16.mxu1 %v15242_v34  ;;  %v15281_v34 = vld [vmem:[#allocation14 + $0xb8] sm:$0xff]  }
 0x638   :  { %v15288_v4 = vld [vmem:[#allocation14 + $0xd8] sm:$0xff]  }
 0x639   :  { %13122 = vmatpush3.bf16.msra.mxu0 %v15241_v7  ;;  %v15282_v7 = vld [vmem:[#allocation14 + $0xf0] sm:$0xff]  }
 0x63a   :  { %13179 = vmatpush3.bf16.msra.mxu1 %v15243_v18  ;;  %13123 = vmatprep.subr.bf16.mxu0 %v15244_v47  ;;  %v10767_v18 = vpack.c.bf16 %v10758_v5, %v10758_v5  ;;  %v15283_v47 = vld [vmem:[#allocation14 + $0xb0] sm:$0xff]  }
 0x63b   :  { %13180 = vmatprep.subr.bf16.mxu1 %v15246_v48  ;;  %v15284_v48 = vld [vmem:[#allocation14 + $0xe8] sm:$0xff]  }
 0x63d   :  { %13124 = vmatpush3.bf16.msra.mxu0 %v15245_v8  ;;  %v15285_v8 = vld [vmem:[#allocation14 + $0xa8] sm:$0xff]  }
 0x63e   :  { %13181 = vmatpush3.bf16.msra.mxu1 %v15247_v62  ;;  %13125 = vmatprep.subr.bf16.mxu0 %v15248_v63  ;;  %v15286_v62 = vld [vmem:[#allocation14 + $0xe0] sm:$0xff]  }
 0x63f   :  { %13182 = vmatprep.subr.bf16.mxu1 %v15250_v13  ;;  %v15287_v63 = vld [vmem:[#allocation14 + $0xa0] sm:$0xff]   ;;  %v15289_v13 = vld [vmem:[#allocation14 + $0x98] sm:$0xff]  }
 0x641   :  { %13126 = vmatpush3.bf16.msra.mxu0 %v15249_v20  ;;  %v15290_v20 = vld [vmem:[#allocation14 + $0xd0] sm:$0xff]  }
 0x642   :  { %13183 = vmatpush3.bf16.msra.mxu1 %v15251_v24  ;;  %13127 = vmatprep.subr.bf16.mxu0 %v15252_v17  ;;  %v15291_v24 = vld [vmem:[#allocation14 + $0x90] sm:$0xff]   ;;  %v15293_v17 = vld [vmem:[#allocation14 + $0x88] sm:$0xff]  }
 0x643   :  { %13212 = vmatprep.subr.bf16.mxu1 %v15254_v52 }
 0x645   :  { %13128 = vmatpush3.bf16.msra.mxu0 %v15253_v27  ;;  %v15985_v15 = vpop.f32.mrf.mxu1  ;;  %11389 = vmatmul.mubr.bf16.vlgmr.msra.gmra.mxu1 %v10764_v11  ;;  %v15295_v27 = vld [vmem:[#allocation14 + $0x80] sm:$0xff]   ;;  %v6405_v11 = vrot.slane %v15952_v3, %v15714_v23  ;;  %v15299_v23 = vld [vmem:[#allocation14 + $0x1b0] sm:$0xff]  }
 0x646   :  { %13213 = vmatpush3.bf16.msra.mxu1 %v15255_v60  ;;  %13129 = vmatprep.subr.bf16.mxu0 %v15256_v46  ;;  %v10757_v60 = vmax.f32 %v15936_v30, 0.0  ;;  %v15296_v46 = vld [vmem:[#allocation14 + $0x1f8] sm:$0xff]  }
 0x647   :  { %v15987_v16 = vpop.f32.mrf.mxu1  ;;  %13214 = vmatprep.subr.bf16.mxu1 %v15258_v22 }
 0x649   :  { %13130 = vmatpush3.bf16.msra.mxu0 %v15257_v49  ;;  %v10388_v51 = vpop.f32.mrf.mxu1  ;;  %v6409_v49 = vrot.slane %v15952_v3, %v15673_v43 }
 0x64a   :  { %13215 = vmatpush3.bf16.msra.mxu1 %v15259_v31  ;;  %13293 = vmatprep.subr.bf16.mxu0 %v15550_v25  ;;  %v10766_v51 = vpack.c.bf16 %v10757_v60, %v10757_v60 }
 0x64b   :  { %v10389_v53 = vpop.f32.mrf.mxu1  ;;  %13216 = vmatprep.subr.bf16.mxu1 %v15261_v58  ;;  %v15297_v58 = vld [vmem:[#allocation14 + $0x1b8] sm:$0xff]   ;;  %v10387_v30 = vadd.f32 %v15987_v16, %v6409_v49  ;;  %v15303_v16 = vld [vmem:[#allocation14 + $0x1a0] sm:$0xff]  }
 0x64c   :  { %v10343_v56 = vpop.f32.mrf.mxu0  ;;  %10668 = vmatmul.mubr.bf16.vlgmr.msra.gmra.mxu0 %v15847_v1  ;;  %v15268_v1 = vld [vmem:[#allocation14 + $0x118] sm:$0xff]  }
 0x64d   :  { %13294 = vmatpush3.bf16.msra.mxu0 %v15260_v9  ;;  %13309 = vmatprep.mubr.msk.bf16.mxu0 %vm15551_vm1, %v15550_v25  ;;  %v10344_v40 = vadd.f32 %v10343_v56, %v15979_v28  ;;  %v15279_v28 = vld [vmem:[#allocation11 + $0x1220] ss:$36 sps:$4 sm:$0xff]  }
 0x64e   :  { %v10345_v59 = vpop.f32.mrf.mxu0  ;;  %13217 = vmatpush3.bf16.msra.mxu1 %v15262_v0  ;;  %13295 = vmatprep.subr.bf16.mxu0 %v15550_v25  ;;  %v15298_v9 = vld [vmem:[#allocation14 + $0x1f0] sm:$0xff]   ;;  %v10385_v0 = vadd.f32 %v15985_v15, %v6405_v11  ;;  %v15302_v15 = vld [vmem:[#allocation14 + $0x1e0] sm:$0xff]  }
 0x64f   :  { %v10346_v44 = vadd.f32 %v10345_v59, %v15982_v50  ;;  %13218 = vmatprep.subr.bf16.mxu1 %v15264_v55  ;;  %v10759_v32 = vmax.f32 %v10344_v40, 0.0  ;;  %v15278_v50 = vld [vmem:[#allocation11 + $0x1268] ss:$36 sps:$4 sm:$0xff]   ;;  %v15300_v59 = vld [vmem:[#allocation14 + $0x1e8] sm:$0xff]  }
 0x650   :  { %v10347_v57 = vpop.f32.mrf.mxu0  ;;  %v15310_v40 = vld [vmem:[#allocation14 + $0x1c0] sm:$0xff]  }
 0x651   :  { %v10760_v39 = vmax.f32 %v10346_v44, 0.0  ;;  %13296 = vmatpush3.bf16.msra.mxu0 %v15263_v41  ;;  %v10768_v33 = vpack.c.bf16 %v10759_v32, %v10759_v32  ;;  %v15301_v44 = vld [vmem:[#allocation14 + $0x1a8] sm:$0xff]  }
 0x652   :  { %v10348_v2 = vpop.f32.mrf.mxu0  ;;  %13219 = vmatpush3.bf16.msra.mxu1 %v15265_v61  ;;  %13297 = vmatprep.subr.bf16.mxu0 %v15550_v25 }
 0x653   :  { %v10769_v26 = vpack.c.bf16 %v10760_v39, %v10760_v39  ;;  %13220 = vmatprep.subr.bf16.mxu1 %v15267_v29  ;;  %v15312_v39 = vld [vmem:[#allocation14 + $0x238] sm:$0xff]  }
 0x654   :  { %v15304_v2 = vld [vmem:[#allocation14 + $0x1d8] sm:$0xff]  }
 0x655   :  { %13298 = vmatpush3.bf16.msra.mxu0 %v15266_v21  ;;  %11468 = vmatprep.mubr.bf16.mxu1 %v10769_v26  ;;  %v15313_v21 = vld [vmem:[#allocation14 + $0x230] sm:$0xff]   ;;  %v15305_v26 = vld [vmem:[#allocation14 + $0x198] sm:$0xff]  }
 0x656   :  { %13221 = vmatpush3.bf16.msra.mxu1 %v15268_v1  ;;  %13299 = vmatprep.subr.bf16.mxu0 %v15550_v25  ;;  %v15314_v1 = vld [vmem:[#allocation14 + $0x228] sm:$0xff]  }
 0x657   :  { %13222 = vmatprep.subr.bf16.mxu1 %v15270_v37  ;;  %v15306_v37 = vld [vmem:[#allocation14 + $0x1d0] sm:$0xff]  }
 0x659   :  { %13300 = vmatpush3.bf16.msra.mxu0 %v15269_v6  ;;  %v15315_v6 = vld [vmem:[#allocation14 + $0x220] sm:$0xff]  }
 0x65a   :  { %13223 = vmatpush3.bf16.msra.mxu1 %v15271_v54  ;;  %13301 = vmatprep.subr.bf16.mxu0 %v15550_v25  ;;  %v15307_v54 = vld [vmem:[#allocation14 + $0x190] sm:$0xff]  }
 0x65b   :  { %13224 = vmatprep.subr.bf16.mxu1 %v15273_v45  ;;  %v15308_v45 = vld [vmem:[#allocation14 + $0x1c8] sm:$0xff]  }
 0x65d   :  { %13302 = vmatpush3.bf16.msra.mxu0 %v15272_v14  ;;  %v15316_v14 = vld [vmem:[#allocation14 + $0x218] sm:$0xff]  }
 0x65e   :  { %13225 = vmatpush3.bf16.msra.mxu1 %v15274_v35  ;;  %13303 = vmatprep.subr.bf16.mxu0 %v15550_v25  ;;  %v15309_v35 = vld [vmem:[#allocation14 + $0x188] sm:$0xff]  }
 0x65f   :  { %13226 = vmatprep.subr.bf16.mxu1 %v15276_v42 }
 0x661   :  { %13304 = vmatpush3.bf16.msra.mxu0 %v15275_v38  ;;  %v15311_v38 = vld [vmem:[#allocation14 + $0x180] sm:$0xff]  }
 0x662   :  { %13227 = vmatpush3.bf16.msra.mxu1 %v15277_v12  ;;  %13305 = vmatprep.subr.bf16.mxu0 %v15550_v25  ;;  %v15317_v12 = vld [vmem:[#allocation14 + $0x210] sm:$0xff]  }
 0x663   :  { %13313 = vmatprep.subr.bf16.mxu1 %v15550_v25 }
 0x665   :  { %13306 = vmatpush3.bf16.msra.mxu0 %v15278_v50  ;;  %11469 = vmatmul.mubr.bf16.vlgmr.msra.gmra.mxu1 %v10768_v33  ;;  %v15318_v33 = vld [vmem:[#allocation14 + $0x208] sm:$0xff]  }
 0x666   :  { %13307 = vmatprep.subr.bf16.mxu0 %v15550_v25  ;;  %13329 = vmatprep.mubr.msk.bf16.mxu1 %vm15551_vm1, %v15550_v25 }
 0x667   :  { %13314 = vmatpush3.bf16.msra.mxu1 %v15312_v39 }
 0x668   :  { %13315 = vmatprep.subr.bf16.mxu1 %v15550_v25 }
 0x669   :  { %13308 = vmatpush3.bf16.msra.mxu0 %v15279_v28 }
 0x66a   :  { %13190 = vmatprep.subr.bf16.mxu0 %v15280_v10  ;;  %v15319_v10 = vld [vmem:[#allocation14 + $0x200] sm:$0xff]  }
 0x66b   :  { %13316 = vmatpush3.bf16.msra.mxu1 %v15313_v21 }
 0x66c   :  { %13310 = vmatmul.mubr.bf16.vlgmr.msra.gmra.mxu0 %v15870_v19  ;;  %v15292_v19 = vld [vmem:[#allocation14 + $0xc8] sm:$0xff]   ;;  %13317 = vmatprep.subr.bf16.mxu1 %v15550_v25 }
 0x66d   :  { %13191 = vmatpush3.bf16.msra.mxu0 %v15281_v34  ;;  %11428 = vmatprep.mubr.bf16.mxu0 %v10767_v18 }
 0x66e   :  { %13192 = vmatprep.subr.bf16.mxu0 %v15282_v7 }
 0x66f   :  { %13318 = vmatpush3.bf16.msra.mxu1 %v15314_v1 }
 0x670   :  { %13319 = vmatprep.subr.bf16.mxu1 %v15550_v25 }
 0x671   :  { %13193 = vmatpush3.bf16.msra.mxu0 %v15283_v47 }
 0x672   :  { %13194 = vmatprep.subr.bf16.mxu0 %v15284_v48 }
 0x673   :  { %13320 = vmatpush3.bf16.msra.mxu1 %v15315_v6 }
 0x674   :  { %13321 = vmatprep.subr.bf16.mxu1 %v15550_v25 }
 0x675   :  { %13195 = vmatpush3.bf16.msra.mxu0 %v15285_v8 }
 0x676   :  { %13196 = vmatprep.subr.bf16.mxu0 %v15286_v62 }
 0x677   :  { %13322 = vmatpush3.bf16.msra.mxu1 %v15316_v14 }
 0x678   :  { %13323 = vmatprep.subr.bf16.mxu1 %v15550_v25 }
 0x679   :  { %13197 = vmatpush3.bf16.msra.mxu0 %v15287_v63 }
 0x67a   :  { %13198 = vmatprep.subr.bf16.mxu0 %v15288_v4 }
 0x67b   :  { %13324 = vmatpush3.bf16.msra.mxu1 %v15317_v12 }
 0x67c   :  { %13325 = vmatprep.subr.bf16.mxu1 %v15550_v25 }
 0x67d   :  { %13199 = vmatpush3.bf16.msra.mxu0 %v15289_v13 }
 0x67e   :  { %13200 = vmatprep.subr.bf16.mxu0 %v15290_v20 }
 0x67f   :  { %13326 = vmatpush3.bf16.msra.mxu1 %v15318_v33 }
 0x680   :  { %13327 = vmatprep.subr.bf16.mxu1 %v15550_v25 }
 0x681   :  { %13201 = vmatpush3.bf16.msra.mxu0 %v15291_v24 }
 0x682   :  { %13202 = vmatprep.subr.bf16.mxu0 %v15292_v19 }
 0x683   :  { %13328 = vmatpush3.bf16.msra.mxu1 %v15319_v10 }
 0x685   :  { %13203 = vmatpush3.bf16.msra.mxu0 %v15293_v17  ;;  %v10466_v52 = vpop.f32.mrf.mxu1 }
 0x686   :  { %13204 = vmatprep.subr.bf16.mxu0 %v15294_v36 }
 0x687   :  { %v10468_v22 = vpop.f32.mrf.mxu1 }
 0x689   :  { %13205 = vmatpush3.bf16.msra.mxu0 %v15295_v27  ;;  %v10470_v31 = vpop.f32.mrf.mxu1 }
 0x68a   :  { %13234 = vmatprep.subr.bf16.mxu0 %v15296_v46 }
 0x68b   :  { %v10471_v53 = vpop.f32.mrf.mxu1 }
 0x68c   :  { %v10425_v55 = vpop.f32.mrf.mxu0  ;;  %11429 = vmatmul.mubr.bf16.vlgmr.msra.gmra.mxu0 %v10766_v51  ;;  %v12249_v53 = vld [vmem:[#allocation13 + $0x8] ss:$0 sm:$0xff] }
 0x68d   :  { %v10426_v56 = vadd.f32 %v10425_v55, %v10385_v0  ;;  %13235 = vmatpush3.bf16.msra.mxu0 %v15297_v58 }
 0x68e   :  { %v10427_v41 = vpop.f32.mrf.mxu0  ;;  %13236 = vmatprep.subr.bf16.mxu0 %v15298_v9 }
 0x68f   :  { %v10428_v43 = vadd.f32 %v10427_v41, %v10387_v30  ;;  %v10467_v3 = vadd.f32 %v10466_v52, %v10426_v56 }
 0x690   :  { %v10429_v61 = vpop.f32.mrf.mxu0 }
 0x691   :  { %13237 = vmatpush3.bf16.msra.mxu0 %v15299_v23  ;;  %v10469_v29 = vadd.f32 %v10468_v22, %v10428_v43 }
 0x692   :  { %v10430_v57 = vpop.f32.mrf.mxu0  ;;  %13238 = vmatprep.subr.bf16.mxu0 %v15300_v59 }
 0x695   :  { %13239 = vmatpush3.bf16.msra.mxu0 %v15301_v44 }
 0x696   :  { %13240 = vmatprep.subr.bf16.mxu0 %v15302_v15 }
 0x699   :  { %13241 = vmatpush3.bf16.msra.mxu0 %v15303_v16 }
 0x69a   :  { %13242 = vmatprep.subr.bf16.mxu0 %v15304_v2 }
 0x69d   :  { %13243 = vmatpush3.bf16.msra.mxu0 %v15305_v26 }
 0x69e   :  { %13244 = vmatprep.subr.bf16.mxu0 %v15306_v37 }
 0x6a1   :  { %13245 = vmatpush3.bf16.msra.mxu0 %v15307_v54 }
 0x6a2   :  { %13246 = vmatprep.subr.bf16.mxu0 %v15308_v45 }
 0x6a5   :  { %v10548_v42 = vpop.f32.mrf.mxu1  ;;  %13247 = vmatpush3.bf16.msra.mxu0 %v15309_v35  ;;  %v12898_v35 = vld [vmem:[#allocation16] ss:$0 sm:$0xff] }
 0x6a6   :  { %13248 = vmatprep.subr.bf16.mxu0 %v15310_v40 }
 0x6a7   :  { %v10550_v32 = vpop.f32.mrf.mxu1 }
 0x6a9   :  { %v10552_v50 = vpop.f32.mrf.mxu1  ;;  %13249 = vmatpush3.bf16.msra.mxu0 %v15311_v38 }
 0x6ab   :  { %v10553_v28 = vpop.f32.mrf.mxu1 }
 0x6c5   :  { %v13109_v5 = vpop.f32.mrf.mxu1 }
 0x6c7   :  { %v13110_v34 = vpop.f32.mrf.mxu1 }
 0x6c8   :  { %v13111_v7 = vadd.f32 %v13110_v34, %v13109_v5 }
 0x6c9   :  { %v13112_v18 = vpop.f32.mrf.mxu1 }
 0x6cb   :  { %v13113_v47 = vpop.f32.mrf.mxu1 }
 0x6cc   :  { %v10507_v48 = vpop.f32.mrf.mxu0 }
 0x6cd   :  { %v10508_v8 = vadd.f32 %v10507_v48, %v10467_v3 }
 0x6ce   :  { %v10509_v62 = vpop.f32.mrf.mxu0 }
 0x6cf   :  { %v10549_v63 = vadd.f32 %v10548_v42, %v10508_v8  ;;  %v10510_v4 = vadd.f32 %v10509_v62, %v10469_v29 }
 0x6d0   :  { %v10511_v13 = vpop.f32.mrf.mxu0 }
 0x6d1   :  { %v10551_v20 = vadd.f32 %v10550_v32, %v10510_v4  ;;  %v10761_v24 = vmax.f32 %v10549_v63, 0.0 }
 0x6d2   :  { %v10512_v19 = vpop.f32.mrf.mxu0 }
 0x6d3   :  { %v10762_v17 = vmax.f32 %v10551_v20, 0.0  ;;  %v10770_v52 = vpack.c.bf16 %v10761_v24, %v10761_v24 }
 0x6d5   :  { %v10771_v36 = vpack.c.bf16 %v10762_v17, %v10762_v17 }
 0x6d7   :  { %11508 = vmatprep.mubr.bf16.mxu0 %v10771_v36 }
 0x6d8   :  { %11509 = vmatmul.mubr.bf16.vlgmr.msra.gmra.mxu0 %v10770_v52 }
 0x6e5   :  { %v13153_v25 = vpop.f32.mrf.mxu1 }
 0x6e7   :  { %v13154_v27 = vpop.f32.mrf.mxu1 }
 0x6e8   :  { %v13155_v60 = vadd.f32 %v13154_v27, %v13153_v25 }
 0x6e9   :  { %v13156_v46 = vpop.f32.mrf.mxu1 }
 0x6eb   :  { %v13157_v11 = vpop.f32.mrf.mxu1 }
 0x6ec   :  { %v13087_v22 = vpop.f32.mrf.mxu0 }
 0x6ee   :  { %v13088_v49 = vpop.f32.mrf.mxu0 }
 0x6ef   :  { %v13089_v9 = vadd.f32 %v13088_v49, %v13087_v22 }
 0x6f0   :  { %v13090_v31 = vpop.f32.mrf.mxu0 }
 0x6f1   :  { %v10590_v56 = vadd.f32 %v13089_v9, %v12249_v53 }
 0x6f2   :  { %v13091_v58 = vpop.f32.mrf.mxu0 }
 0x6f3   :  { %v10630_v43 = vadd.f32 %v13111_v7, %v10590_v56 }
 0x705   :  { %v13184_v51 = vpop.f32.mrf.mxu1 }
 0x707   :  { %v13185_v0 = vpop.f32.mrf.mxu1 }
 0x708   :  { %v13186_v55 = vadd.f32 %v13185_v0, %v13184_v51 }
 0x709   :  { %v13187_v30 = vpop.f32.mrf.mxu1 }
 0x70a   :  { %v11391_v38 = vadd.f32 %v13186_v55, %v12898_v35 }
 0x70b   :  { %v13188_v23 = vpop.f32.mrf.mxu1 }
 0x70c   :  { %v13131_v41 = vpop.f32.mrf.mxu0 }
 0x70e   :  { %v13132_v59 = vpop.f32.mrf.mxu0 }
 0x70f   :  { %v13133_v3 = vadd.f32 %v13132_v59, %v13131_v41 }
 0x710   :  { %v13134_v61 = vpop.f32.mrf.mxu0 }
 0x711   :  { %v10670_v44 = vadd.f32 %v13133_v3, %v10630_v43 }
 0x712   :  { %v13135_v29 = vpop.f32.mrf.mxu0 }
 0x713   :  { %v10710_v57 = vadd.f32 %v13155_v60, %v10670_v44 }
 0x725   :  { %v13228_v15 = vpop.f32.mrf.mxu1 }
 0x727   :  { %v13229_v39 = vpop.f32.mrf.mxu1 }
 0x728   :  { %v13230_v21 = vadd.f32 %v13229_v39, %v13228_v15 }
 0x729   :  { %v13231_v16 = vpop.f32.mrf.mxu1 }
 0x72b   :  { %v13232_v2 = vpop.f32.mrf.mxu1 }
 0x72c   :  { %v10749_v1 = vpop.f32.mrf.mxu0 }
 0x72d   :  { %v10750_v26 = vadd.f32 %v10749_v1, %v10710_v57 }
 0x72e   :  { %v13311_v37 = vpop.f32.mrf.mxu0 }
 0x72f   :  { %v10763_v6 = vmax.f32 %v10750_v26, 0.0 }
 0x730   :  { %v10752_v54 = vpop.f32.mrf.mxu0 }
 0x731   :  { %v10772_v45 = vpack.c.bf16 %v10763_v6, %v10763_v6 }
 0x732   :  { %v13312_v14 = vpop.f32.mrf.mxu0 }
 0x733   :  { %13330 = vmatmul.mubr.bf16.vlgmr.msra.gmra.mxu1 %v10772_v45 }
 0x74c   :  { %v13206_v40 = vpop.f32.mrf.mxu0 }
 0x74e   :  { %v13207_v42 = vpop.f32.mrf.mxu0 }
 0x74f   :  { %v13208_v12 = vadd.f32 %v13207_v42, %v13206_v40 }
 0x750   :  { %v13209_v32 = vpop.f32.mrf.mxu0 }
 0x751   :  { %v11431_v50 = vadd.f32 %v13208_v12, %v11391_v38 }
 0x752   :  { %v13210_v33 = vpop.f32.mrf.mxu0 }
 0x753   :  { %v11471_v28 = vadd.f32 %v13230_v21, %v11431_v50 }
 0x798   :  { %v13250_v10 = vpop.f32.mrf.mxu0 }
 0x79a   :  { %v13251_v5 = vpop.f32.mrf.mxu0 }
 0x79b   :  { %v13252_v34 = vadd.f32 %v13251_v5, %v13250_v10 }
 0x79c   :  { %v13253_v7 = vpop.f32.mrf.mxu0 }
 0x79d   :  { %v11511_v18 = vadd.f32 %v13252_v34, %v11471_v28 }
 0x79e   :  { %v13254_v47 = vpop.f32.mrf.mxu0 }
 0x7f3   :  { %v11550_v48 = vpop.f32.mrf.mxu1 }
 0x7f4   :  { %v11551_v8 = vadd.f32 %v11550_v48, %v11511_v18 }
 0x7f5   :  { %v13331_v62 = vpop.f32.mrf.mxu1 }
 0x7f6   :  { %11556 = vst [vmem:[#allocation17] sm:$0xff] %v11551_v8 }
 0x7f7   :  { %v11553_v63 = vpop.f32.mrf.mxu1 }
 0x7f8   :  { %15515 = shalt.err (!%p15512_p7)
}
 0x7f9   :  { %11566 = dma.vmem_to_hbm [thread:$0]  %s11564_s8, 128, %s16033_s9, [#allocation4]   ;;  %v13332_v4 = vpop.f32.mrf.mxu1 }
 0x7fa   :  { %15534 = dma.done.wait [#allocation4], 128  }
 0x7fb   :  { %15535 = vsyncadd [#allocation4], 4294967168 }
 0x7fc   :  { %11570 = vsyncpa [#allocation3], 1 }
 0x7fd   :  { %11571 = vsyncpa [#allocation6], 1 }
 0x7fe   :  { %11572 = vsyncpa [#allocation9], 1 }
 0x7ff   :  { %11573 = vsyncpa [#allocation12], 1 }
 0x800   :  { %11574 = vsyncpa [#allocation15], 1 }
 0x801   :  { %11575 = vsyncpa [#allocation4], 1 }

</bundles_post_ra>
